<compile_context>
chip_gen: v6e
topology: v6e:2x2x1
jax: 0.10.0
libtpu: 0.0.40
codegen_flags: <defaults>
</compile_context>

<pallas_src>
import functools

import jax
import jax.numpy as jnp
from jax import lax
from jax.experimental import pallas as pl
from jax.experimental.pallas import tpu as pltpu

FEAT_DIM = 512
HIDDEN_DIM = 128
IN_CHANNELS = 6

PIXEL_TILE = 2048            # pixel tile for the global image: feat tile 512*2048*4 = 4 MB
LOCAL_PIXEL_BUDGET = 2048    # target pixels per grid step on the local/patch path
LOCAL_MAX_UNROLL = 16        # cap on statically-unrolled patches per grid step
VMEM_LIMIT_BYTES = 32 * 1024 * 1024


# -----------------------------------------------------------------------------
# Kernel 1: global image.  Pointwise conv (C_in -> FEAT) + ReLU + global mean,
# tiled over pixels with a running-sum accumulator.
#   x_ref  : (1, C_in, P_TILE)   bf16     (pixels on lanes, channels on sublanes)
#   wt_ref : (FEAT, C_in)        bf16
#   b_ref  : (FEAT, 1)           f32
#   o_ref  : (1, FEAT, 1)        f32      written only on the last pixel tile
#   acc_ref: (FEAT, 1)           f32      VMEM scratch, persists across k
# -----------------------------------------------------------------------------
def _global_conv_pool_kernel(x_ref, wt_ref, b_ref, o_ref, acc_ref, *,
                             n_pix, p_tile):
    k = pl.program_id(1)

    @pl.when(k == 0)
    def _():
        acc_ref[...] = jnp.zeros_like(acc_ref)

    x = x_ref[0]                                                   # (C, P_TILE)
    feat = jnp.dot(wt_ref[...], x,
                   preferred_element_type=jnp.float32)             # (FEAT, P_TILE)
    feat = jnp.maximum(feat + b_ref[...], 0.0)                     # bias + ReLU (f32)

    if n_pix % p_tile != 0:
        # Partial last tile: padded columns must not contribute (even ReLU(b) biases
        # the mean).  Mask AFTER the ReLU, divide by the true pixel count below.
        col = lax.broadcasted_iota(jnp.int32, (1, p_tile), 1) + k * p_tile
        feat = jnp.where(col < n_pix, feat, 0.0)

    acc_ref[...] += jnp.sum(feat, axis=-1, keepdims=True)          # (FEAT, 1)

    @pl.when(k == pl.num_programs(1) - 1)
    def _():
        o_ref[...] = (acc_ref[...] * (1.0 / n_pix))[None]          # (1, FEAT, 1)


def conv_pool_global(x_bcp, w, b, *, p_tile_max=PIXEL_TILE):
    """x_bcp: (n_imgs, C, P)  ->  pooled features (n_imgs, FEAT) f32."""
    n_imgs, cin, n_pix = x_bcp.shape
    cout = w.shape[1]

    p_tile = n_pix if n_pix <= p_tile_max else p_tile_max
    num_k = pl.cdiv(n_pix, p_tile)

    x_bf = x_bcp.astype(jnp.bfloat16)                  # no-op if already bf16
    wt = jnp.transpose(w).astype(jnp.bfloat16)         # (FEAT, C)
    b2d = b.reshape(cout, 1).astype(jnp.float32)

    kernel = functools.partial(_global_conv_pool_kernel,
                               n_pix=n_pix, p_tile=p_tile)
    out = pl.pallas_call(
        kernel,
        out_shape=jax.ShapeDtypeStruct((n_imgs, cout, 1), jnp.float32),
        grid_spec=pltpu.PrefetchScalarGridSpec(
            num_scalar_prefetch=0,
            grid=(n_imgs, num_k),                      # image axis parallel (v7x 2 TCs)
            in_specs=[
                pl.BlockSpec((1, cin, p_tile), lambda i, k: (i, 0, k)),
                pl.BlockSpec((cout, cin), lambda i, k: (0, 0)),
                pl.BlockSpec((cout, 1), lambda i, k: (0, 0)),
            ],
            out_specs=pl.BlockSpec((1, cout, 1), lambda i, k: (i, 0, 0)),
            scratch_shapes=[pltpu.VMEM((cout, 1), jnp.float32)],
        ),
        compiler_params=pltpu.CompilerParams(
            dimension_semantics=("parallel", "arbitrary"),
            vmem_limit_bytes=VMEM_LIMIT_BYTES),
    )(x_bf, wt, b2d)
    return out[:, :, 0]                                # (n_imgs, FEAT)


# -----------------------------------------------------------------------------
# Kernel 2: local patches.  Processes a chunk of N_TILE patches of one sample
# per grid step (statically unrolled), pooling ReLU(conv) over ALL patches and
# pixels of the sample directly (mean-over-pixels then mean-over-patches ==
# mean over all N*ph*pw pixels since every patch has the same size), so F_l
# comes out of the kernel without an extra XLA reshape/mean pass.
#   x_ref  : (1, N_TILE, C_in, PP)  bf16
#   o_ref  : (1, FEAT, 1)           f32
# -----------------------------------------------------------------------------
def _local_conv_pool_kernel(x_ref, wt_ref, b_ref, o_ref, acc_ref, *,
                            n_patches, n_tile, pix_per_patch):
    k = pl.program_id(1)

    @pl.when(k == 0)
    def _():
        acc_ref[...] = jnp.zeros_like(acc_ref)

    wt = wt_ref[...]                                               # (FEAT, C)
    bias = b_ref[...]                                              # (FEAT, 1)
    partial = jnp.zeros((wt.shape[0], 1), jnp.float32)
    for n in range(n_tile):                                        # static unroll
        x = x_ref[0, n]                                            # (C, PP)
        feat = jnp.dot(wt, x, preferred_element_type=jnp.float32)  # (FEAT, PP)
        feat = jnp.maximum(feat + bias, 0.0)
        s = jnp.sum(feat, axis=-1, keepdims=True)                  # (FEAT, 1)
        if n_patches % n_tile != 0:
            # Padded patches in the last chunk must not contribute.
            s = jnp.where(k * n_tile + n < n_patches, s, 0.0)
        partial = partial + s
    acc_ref[...] += partial

    @pl.when(k == pl.num_programs(1) - 1)
    def _():
        inv = 1.0 / (n_patches * pix_per_patch)
        o_ref[...] = (acc_ref[...] * inv)[None]                    # (1, FEAT, 1)


def conv_pool_local(x_bncp, w, b, *, pix_budget=LOCAL_PIXEL_BUDGET,
                    max_unroll=LOCAL_MAX_UNROLL):
    """x_bncp: (B, N, C, PP)  ->  per-sample pooled features (B, FEAT) f32."""
    # TODO(synk): if individual patches ever exceed ~2k pixels * 512 feats in f32,
    #             additionally tile the pixel axis inside a patch (as in the global kernel).
    bsz, n_patches, cin, pp = x_bncp.shape
    cout = w.shape[1]

    n_tile = max(1, min(n_patches, max_unroll, pix_budget // pp))
    num_k = pl.cdiv(n_patches, n_tile)

    x_bf = x_bncp.astype(jnp.bfloat16)
    wt = jnp.transpose(w).astype(jnp.bfloat16)         # (FEAT, C)
    b2d = b.reshape(cout, 1).astype(jnp.float32)

    kernel = functools.partial(_local_conv_pool_kernel, n_patches=n_patches,
                               n_tile=n_tile, pix_per_patch=pp)
    out = pl.pallas_call(
        kernel,
        out_shape=jax.ShapeDtypeStruct((bsz, cout, 1), jnp.float32),
        grid_spec=pltpu.PrefetchScalarGridSpec(
            num_scalar_prefetch=0,
            grid=(bsz, num_k),
            in_specs=[
                pl.BlockSpec((1, n_tile, cin, pp), lambda i, k: (i, k, 0, 0)),
                pl.BlockSpec((cout, cin), lambda i, k: (0, 0)),
                pl.BlockSpec((cout, 1), lambda i, k: (0, 0)),
            ],
            out_specs=pl.BlockSpec((1, cout, 1), lambda i, k: (i, 0, 0)),
            scratch_shapes=[pltpu.VMEM((cout, 1), jnp.float32)],
        ),
        compiler_params=pltpu.CompilerParams(
            dimension_semantics=("parallel", "arbitrary"),
            vmem_limit_bytes=VMEM_LIMIT_BYTES),
    )(x_bf, wt, b2d)
    return out[:, :, 0]                                # (B, FEAT)


# -----------------------------------------------------------------------------
# FeatureFusion (512->128->512) + AgeRegressionHead (512->128->1).
# ~0.5 MFLOP on tiny (B, 512) tensors: per perf review this stays in plain XLA
# instead of its own pallas_call (launch/DMA overhead would dominate).
# -----------------------------------------------------------------------------
def _fusion_and_head(f_g, f_l, params):
    x = f_g + f_l                                                  # (B, 512)
    h1 = jnp.maximum(x @ params["w1"] + params["b1"], 0.0)         # (B, 128)
    f = jnp.maximum(h1 @ params["w2"] + params["b2"], 0.0)         # (B, 512)
    h2 = jnp.maximum(f @ params["w3"] + params["b3"], 0.0)         # (B, 128)
    y = h2 @ params["w4"] + params["b4"]                           # (B, 1)
    return y[:, 0]                                                 # squeeze(-1)


# -----------------------------------------------------------------------------
# Model wrapper (pure layout reshapes -- no transposes of the big tensors).
# -----------------------------------------------------------------------------
def init_params(key):
    ks = jax.random.split(key, 6)
    scale = 0.02
    return {
        # GlobalNet / LocalNet 1x1 conv weights (6 -> 512)
        "wg": jax.random.normal(ks[0], (IN_CHANNELS, FEAT_DIM), jnp.float32) * scale,
        "bg": jnp.zeros((FEAT_DIM,), jnp.float32),
        "wl": jax.random.normal(ks[1], (IN_CHANNELS, FEAT_DIM), jnp.float32) * scale,
        "bl": jnp.zeros((FEAT_DIM,), jnp.float32),
        # FeatureFusion: 512 -> 128 -> 512
        "w1": jax.random.normal(ks[2], (FEAT_DIM, HIDDEN_DIM), jnp.float32) * scale,
        "b1": jnp.zeros((HIDDEN_DIM,), jnp.float32),
        "w2": jax.random.normal(ks[3], (HIDDEN_DIM, FEAT_DIM), jnp.float32) * scale,
        "b2": jnp.zeros((FEAT_DIM,), jnp.float32),
        # AgeRegressionHead: 512 -> 128 -> 1
        "w3": jax.random.normal(ks[4], (FEAT_DIM, HIDDEN_DIM), jnp.float32) * scale,
        "b3": jnp.zeros((HIDDEN_DIM,), jnp.float32),
        "w4": jax.random.normal(ks[5], (HIDDEN_DIM, 1), jnp.float32) * scale,
        "b4": jnp.zeros((1,), jnp.float32),
    }


def brain_age_forward(params, global_img, local_img):
    """
    global_img: (B, 6, H, W)          [NCHW, like PyTorch]
    local_img : (B, N, 6, ph, pw)
    returns   : (B,)
    """
    bsz, cch, h, w = global_img.shape
    _, n_patch, _, ph, pw = local_img.shape

    # Free reshapes only (channels stay ahead of pixels -> no HBM transpose pass).
    g = global_img.reshape(bsz, cch, h * w)                        # (B, C, HW)
    f_g = conv_pool_global(g, params["wg"], params["bg"])          # (B, 512)

    l = local_img.reshape(bsz, n_patch, cch, ph * pw)              # (B, N, C, PP)
    f_l = conv_pool_local(l, params["wl"], params["bl"])           # (B, 512)  (mean over N fused)

    return _fusion_and_head(f_g, f_l, params)                      # (B,)


if __name__ == "__main__":
    key = jax.random.PRNGKey(0)
    k_p, k_g, k_l = jax.random.split(key, 3)

    params = init_params(k_p)

    B, N, H, W, ph, pw = 2, 3, 16, 16, 8, 8
    global_img = jax.random.normal(k_g, (B, IN_CHANNELS, H, W), jnp.float32)
    local_img = jax.random.normal(k_l, (B, N, IN_CHANNELS, ph, pw), jnp.float32)

    fwd = jax.jit(brain_age_forward)
    y_pred = fwd(params, global_img, local_img)
    jax.block_until_ready(y_pred)
    assert y_pred.shape == (B,), y_pred.shape
    print("KERNEL_OK")
</pallas_src>

<mosaic_0001>
module attributes {stable_mosaic.version = 11 : i64} {
  func.func @_local_conv_pool_kernel(%arg0: i32, %arg1: i32, %arg2: memref<1x3x6x64xbf16, #tpu.memory_space<vmem>>, %arg3: memref<512x6xbf16, #tpu.memory_space<vmem>>, %arg4: memref<512x1xf32, #tpu.memory_space<vmem>>, %arg5: memref<1x512x1xf32, #tpu.memory_space<vmem>>, %arg6: memref<512x1xf32, #tpu.memory_space<vmem>>) attributes {dimension_semantics = [#tpu.dimension_semantics<parallel>, #tpu.dimension_semantics<arbitrary>], iteration_bounds = array<i64: 2, 1>, scalar_prefetch = 0 : i64, scratch_operands = 1 : i64, tpu.core_type = #tpu.core_type<tc>, window_params = [{transform_indices = @transform_0, window_bounds = array<i64: 1, 3, 6, 64>}, {pipeline_mode = #tpu.pipeline_mode<synchronous>, transform_indices = @transform_1, window_bounds = array<i64: 512, 6>}, {pipeline_mode = #tpu.pipeline_mode<synchronous>, transform_indices = @transform_2, window_bounds = array<i64: 512, 1>}, {transform_indices = @transform_3, window_bounds = array<i64: 1, 512, 1>}]} {
    %c0_i32 = arith.constant 0 : i32
    %0 = arith.cmpi eq, %arg1, %c0_i32 : i32
    %1 = arith.extui %0 : i1 to i32
    %c0_i32_0 = arith.constant 0 : i32
    %2 = arith.cmpi ne, %1, %c0_i32_0 : i32
    scf.if %2 {
      %cst_29 = arith.constant 0.000000e+00 : f32
      %42 = vector.broadcast %cst_29 : f32 to vector<512x1xf32>
      %c0_30 = arith.constant 0 : index
      %c0_31 = arith.constant 0 : index
      %43 = vector.load %arg6[%c0_30, %c0_31] : memref<512x1xf32, #tpu.memory_space<vmem>>, vector<512x1xf32>
      tpu.vector_store %arg6[%c0_30, %c0_31], %42 {strides = array<i32>} : memref<512x1xf32, #tpu.memory_space<vmem>>, vector<512x1xf32>,
    } else {
    }
    %c0 = arith.constant 0 : index
    %c0_1 = arith.constant 0 : index
    %3 = vector.load %arg3[%c0, %c0_1] : memref<512x6xbf16, #tpu.memory_space<vmem>>, vector<512x6xbf16>
    %c0_2 = arith.constant 0 : index
    %c0_3 = arith.constant 0 : index
    %4 = vector.load %arg4[%c0_2, %c0_3] : memref<512x1xf32, #tpu.memory_space<vmem>>, vector<512x1xf32>
    %cst = arith.constant 0.000000e+00 : f32
    %5 = vector.broadcast %cst : f32 to vector<512x1xf32>
    %c0_4 = arith.constant 0 : index
    %c0_5 = arith.constant 0 : index
    %c0_6 = arith.constant 0 : index
    %c0_7 = arith.constant 0 : index
    %6 = vector.load %arg2[%c0_4, %c0_5, %c0_6, %c0_7] : memref<1x3x6x64xbf16, #tpu.memory_space<vmem>>, vector<1x1x6x64xbf16>
    %7 = vector.shape_cast %6 : vector<1x1x6x64xbf16> to vector<6x64xbf16>
    %cst_8 = arith.constant dense<0.000000e+00> : vector<512x64xf32>
    %8 = tpu.matmul %3, %7, %cst_8 {dimension_numbers = #tpu.dot_dimension_numbers<[1], [0], [0], [1], [0, 0, 1, 1], [], []>} : vector<512x6xbf16>, vector<6x64xbf16>, vector<512x64xf32> -> vector<512x64xf32>
    %9 = vector.broadcast %4 : vector<512x1xf32> to vector<512x64xf32>
    %10 = arith.addf %8, %9 : vector<512x64xf32>
    %cst_9 = arith.constant 0.000000e+00 : f32
    %11 = vector.broadcast %cst_9 : f32 to vector<512x64xf32>
    %12 = arith.maximumf %10, %11 : vector<512x64xf32>
    %cst_10 = arith.constant dense<0.000000e+00> : vector<512xf32>
    %13 = vector.multi_reduction <add>, %12, %cst_10 [1] : vector<512x64xf32> to vector<512xf32>
    %14 = vector.shape_cast %13 : vector<512xf32> to vector<512x1xf32>
    %15 = arith.addf %5, %14 : vector<512x1xf32>
    %c0_11 = arith.constant 0 : index
    %c1 = arith.constant 1 : index
    %c0_12 = arith.constant 0 : index
    %c0_13 = arith.constant 0 : index
    %16 = vector.load %arg2[%c0_11, %c1, %c0_12, %c0_13] : memref<1x3x6x64xbf16, #tpu.memory_space<vmem>>, vector<1x1x6x64xbf16>
    %17 = vector.shape_cast %16 : vector<1x1x6x64xbf16> to vector<6x64xbf16>
    %cst_14 = arith.constant dense<0.000000e+00> : vector<512x64xf32>
    %18 = tpu.matmul %3, %17, %cst_14 {dimension_numbers = #tpu.dot_dimension_numbers<[1], [0], [0], [1], [0, 0, 1, 1], [], []>} : vector<512x6xbf16>, vector<6x64xbf16>, vector<512x64xf32> -> vector<512x64xf32>
    %19 = vector.broadcast %4 : vector<512x1xf32> to vector<512x64xf32>
    %20 = arith.addf %18, %19 : vector<512x64xf32>
    %cst_15 = arith.constant 0.000000e+00 : f32
    %21 = vector.broadcast %cst_15 : f32 to vector<512x64xf32>
    %22 = arith.maximumf %20, %21 : vector<512x64xf32>
    %cst_16 = arith.constant dense<0.000000e+00> : vector<512xf32>
    %23 = vector.multi_reduction <add>, %22, %cst_16 [1] : vector<512x64xf32> to vector<512xf32>
    %24 = vector.shape_cast %23 : vector<512xf32> to vector<512x1xf32>
    %25 = arith.addf %15, %24 : vector<512x1xf32>
    %c0_17 = arith.constant 0 : index
    %c2 = arith.constant 2 : index
    %c0_18 = arith.constant 0 : index
    %c0_19 = arith.constant 0 : index
    %26 = vector.load %arg2[%c0_17, %c2, %c0_18, %c0_19] : memref<1x3x6x64xbf16, #tpu.memory_space<vmem>>, vector<1x1x6x64xbf16>
    %27 = vector.shape_cast %26 : vector<1x1x6x64xbf16> to vector<6x64xbf16>
    %cst_20 = arith.constant dense<0.000000e+00> : vector<512x64xf32>
    %28 = tpu.matmul %3, %27, %cst_20 {dimension_numbers = #tpu.dot_dimension_numbers<[1], [0], [0], [1], [0, 0, 1, 1], [], []>} : vector<512x6xbf16>, vector<6x64xbf16>, vector<512x64xf32> -> vector<512x64xf32>
    %29 = vector.broadcast %4 : vector<512x1xf32> to vector<512x64xf32>
    %30 = arith.addf %28, %29 : vector<512x64xf32>
    %cst_21 = arith.constant 0.000000e+00 : f32
    %31 = vector.broadcast %cst_21 : f32 to vector<512x64xf32>
    %32 = arith.maximumf %30, %31 : vector<512x64xf32>
    %cst_22 = arith.constant dense<0.000000e+00> : vector<512xf32>
    %33 = vector.multi_reduction <add>, %32, %cst_22 [1] : vector<512x64xf32> to vector<512xf32>
    %34 = vector.shape_cast %33 : vector<512xf32> to vector<512x1xf32>
    %35 = arith.addf %25, %34 : vector<512x1xf32>
    %c0_23 = arith.constant 0 : index
    %c0_24 = arith.constant 0 : index
    %36 = vector.load %arg6[%c0_23, %c0_24] : memref<512x1xf32, #tpu.memory_space<vmem>>, vector<512x1xf32>
    %37 = arith.addf %36, %35 : vector<512x1xf32>
    %c0_25 = arith.constant 0 : index
    %c0_26 = arith.constant 0 : index
    %38 = vector.load %arg6[%c0_25, %c0_26] : memref<512x1xf32, #tpu.memory_space<vmem>>, vector<512x1xf32>
    tpu.vector_store %arg6[%c0_25, %c0_26], %37 {strides = array<i32>} : memref<512x1xf32, #tpu.memory_space<vmem>>, vector<512x1xf32>,
    %c0_i32_27 = arith.constant 0 : i32
    %39 = arith.cmpi eq, %arg1, %c0_i32_27 : i32
    %40 = arith.extui %39 : i1 to i32
    %c0_i32_28 = arith.constant 0 : i32
    %41 = arith.cmpi ne, %40, %c0_i32_28 : i32
    scf.if %41 {
      %c0_29 = arith.constant 0 : index
      %c0_30 = arith.constant 0 : index
      %42 = vector.load %arg6[%c0_29, %c0_30] : memref<512x1xf32, #tpu.memory_space<vmem>>, vector<512x1xf32>
      %cst_31 = arith.constant 0.00520833349 : f32
      %43 = vector.broadcast %cst_31 : f32 to vector<512x1xf32>
      %44 = arith.mulf %42, %43 : vector<512x1xf32>
      %45 = vector.shape_cast %44 : vector<512x1xf32> to vector<1x512x1xf32>
      %c0_32 = arith.constant 0 : index
      %c0_33 = arith.constant 0 : index
      %c0_34 = arith.constant 0 : index
      %46 = vector.load %arg5[%c0_32, %c0_33, %c0_34] : memref<1x512x1xf32, #tpu.memory_space<vmem>>, vector<1x512x1xf32>
      tpu.vector_store %arg5[%c0_32, %c0_33, %c0_34], %45 {strides = array<i32>} : memref<1x512x1xf32, #tpu.memory_space<vmem>>, vector<1x512x1xf32>,
    } else {
    }
    return
  }
  func.func @transform_0(%arg0: i32, %arg1: i32) -> (i32, i32, i32, i32) {
    %c0_i32 = arith.constant 0 : i32
    %c0_i32_0 = arith.constant 0 : i32
    %c0_i32_1 = arith.constant 0 : i32
    return %arg0, %arg1, %c0_i32, %c0_i32_0 : i32, i32, i32, i32
  }
  func.func @transform_1(%arg0: i32, %arg1: i32) -> (i32, i32) {
    %c0_i32 = arith.constant 0 : i32
    %c0_i32_0 = arith.constant 0 : i32
    %c0_i32_1 = arith.constant 0 : i32
    return %c0_i32, %c0_i32_0 : i32, i32
  }
  func.func @transform_2(%arg0: i32, %arg1: i32) -> (i32, i32) {
    %c0_i32 = arith.constant 0 : i32
    %c0_i32_0 = arith.constant 0 : i32
    %c0_i32_1 = arith.constant 0 : i32
    return %c0_i32, %c0_i32_0 : i32, i32
  }
  func.func @transform_3(%arg0: i32, %arg1: i32) -> (i32, i32, i32) {
    %c0_i32 = arith.constant 0 : i32
    %c0_i32_0 = arith.constant 0 : i32
    %c0_i32_1 = arith.constant 0 : i32
    return %arg0, %c0_i32, %c0_i32_0 : i32, i32, i32
  }
}

module attributes {stable_mosaic.version = 11 : i64} {
  func.func @_global_conv_pool_kernel(%arg0: i32, %arg1: i32, %arg2: memref<1x6x256xbf16, #tpu.memory_space<vmem>>, %arg3: memref<512x6xbf16, #tpu.memory_space<vmem>>, %arg4: memref<512x1xf32, #tpu.memory_space<vmem>>, %arg5: memref<1x512x1xf32, #tpu.memory_space<vmem>>, %arg6: memref<512x1xf32, #tpu.memory_space<vmem>>) attributes {dimension_semantics = [#tpu.dimension_semantics<parallel>, #tpu.dimension_semantics<arbitrary>], iteration_bounds = array<i64: 2, 1>, scalar_prefetch = 0 : i64, scratch_operands = 1 : i64, tpu.core_type = #tpu.core_type<tc>, window_params = [{transform_indices = @transform_0, window_bounds = array<i64: 1, 6, 256>}, {pipeline_mode = #tpu.pipeline_mode<synchronous>, transform_indices = @transform_1, window_bounds = array<i64: 512, 6>}, {pipeline_mode = #tpu.pipeline_mode<synchronous>, transform_indices = @transform_2, window_bounds = array<i64: 512, 1>}, {transform_indices = @transform_3, window_bounds = array<i64: 1, 512, 1>}]} {
    %c0_i32 = arith.constant 0 : i32
    %0 = arith.cmpi eq, %arg1, %c0_i32 : i32
    %1 = arith.extui %0 : i1 to i32
    %c0_i32_0 = arith.constant 0 : i32
    %2 = arith.cmpi ne, %1, %c0_i32_0 : i32
    scf.if %2 {
      %cst_15 = arith.constant 0.000000e+00 : f32
      %20 = vector.broadcast %cst_15 : f32 to vector<512x1xf32>
      %c0_16 = arith.constant 0 : index
      %c0_17 = arith.constant 0 : index
      %21 = vector.load %arg6[%c0_16, %c0_17] : memref<512x1xf32, #tpu.memory_space<vmem>>, vector<512x1xf32>
      tpu.vector_store %arg6[%c0_16, %c0_17], %20 {strides = array<i32>} : memref<512x1xf32, #tpu.memory_space<vmem>>, vector<512x1xf32>,
    } else {
    }
    %c0 = arith.constant 0 : index
    %c0_1 = arith.constant 0 : index
    %c0_2 = arith.constant 0 : index
    %3 = vector.load %arg2[%c0, %c0_1, %c0_2] : memref<1x6x256xbf16, #tpu.memory_space<vmem>>, vector<1x6x256xbf16>
    %4 = vector.shape_cast %3 : vector<1x6x256xbf16> to vector<6x256xbf16>
    %c0_3 = arith.constant 0 : index
    %c0_4 = arith.constant 0 : index
    %5 = vector.load %arg3[%c0_3, %c0_4] : memref<512x6xbf16, #tpu.memory_space<vmem>>, vector<512x6xbf16>
    %cst = arith.constant dense<0.000000e+00> : vector<512x256xf32>
    %6 = tpu.matmul %5, %4, %cst {dimension_numbers = #tpu.dot_dimension_numbers<[1], [0], [0], [1], [0, 0, 1, 1], [], []>} : vector<512x6xbf16>, vector<6x256xbf16>, vector<512x256xf32> -> vector<512x256xf32>
    %c0_5 = arith.constant 0 : index
    %c0_6 = arith.constant 0 : index
    %7 = vector.load %arg4[%c0_5, %c0_6] : memref<512x1xf32, #tpu.memory_space<vmem>>, vector<512x1xf32>
    %8 = vector.broadcast %7 : vector<512x1xf32> to vector<512x256xf32>
    %9 = arith.addf %6, %8 : vector<512x256xf32>
    %cst_7 = arith.constant 0.000000e+00 : f32
    %10 = vector.broadcast %cst_7 : f32 to vector<512x256xf32>
    %11 = arith.maximumf %9, %10 : vector<512x256xf32>
    %c0_8 = arith.constant 0 : index
    %c0_9 = arith.constant 0 : index
    %12 = vector.load %arg6[%c0_8, %c0_9] : memref<512x1xf32, #tpu.memory_space<vmem>>, vector<512x1xf32>
    %cst_10 = arith.constant dense<0.000000e+00> : vector<512xf32>
    %13 = vector.multi_reduction <add>, %11, %cst_10 [1] : vector<512x256xf32> to vector<512xf32>
    %14 = vector.shape_cast %13 : vector<512xf32> to vector<512x1xf32>
    %15 = arith.addf %12, %14 : vector<512x1xf32>
    %c0_11 = arith.constant 0 : index
    %c0_12 = arith.constant 0 : index
    %16 = vector.load %arg6[%c0_11, %c0_12] : memref<512x1xf32, #tpu.memory_space<vmem>>, vector<512x1xf32>
    tpu.vector_store %arg6[%c0_11, %c0_12], %15 {strides = array<i32>} : memref<512x1xf32, #tpu.memory_space<vmem>>, vector<512x1xf32>,
    %c0_i32_13 = arith.constant 0 : i32
    %17 = arith.cmpi eq, %arg1, %c0_i32_13 : i32
    %18 = arith.extui %17 : i1 to i32
    %c0_i32_14 = arith.constant 0 : i32
    %19 = arith.cmpi ne, %18, %c0_i32_14 : i32
    scf.if %19 {
      %c0_15 = arith.constant 0 : index
      %c0_16 = arith.constant 0 : index
      %20 = vector.load %arg6[%c0_15, %c0_16] : memref<512x1xf32, #tpu.memory_space<vmem>>, vector<512x1xf32>
      %cst_17 = arith.constant 3.906250e-03 : f32
      %21 = vector.broadcast %cst_17 : f32 to vector<512x1xf32>
      %22 = arith.mulf %20, %21 : vector<512x1xf32>
      %23 = vector.shape_cast %22 : vector<512x1xf32> to vector<1x512x1xf32>
      %c0_18 = arith.constant 0 : index
      %c0_19 = arith.constant 0 : index
      %c0_20 = arith.constant 0 : index
      %24 = vector.load %arg5[%c0_18, %c0_19, %c0_20] : memref<1x512x1xf32, #tpu.memory_space<vmem>>, vector<1x512x1xf32>
      tpu.vector_store %arg5[%c0_18, %c0_19, %c0_20], %23 {strides = array<i32>} : memref<1x512x1xf32, #tpu.memory_space<vmem>>, vector<1x512x1xf32>,
    } else {
    }
    return
  }
  func.func @transform_0(%arg0: i32, %arg1: i32) -> (i32, i32, i32) {
    %c0_i32 = arith.constant 0 : i32
    %c0_i32_0 = arith.constant 0 : i32
    return %arg0, %c0_i32, %arg1 : i32, i32, i32
  }
  func.func @transform_1(%arg0: i32, %arg1: i32) -> (i32, i32) {
    %c0_i32 = arith.constant 0 : i32
    %c0_i32_0 = arith.constant 0 : i32
    %c0_i32_1 = arith.constant 0 : i32
    return %c0_i32, %c0_i32_0 : i32, i32
  }
  func.func @transform_2(%arg0: i32, %arg1: i32) -> (i32, i32) {
    %c0_i32 = arith.constant 0 : i32
    %c0_i32_0 = arith.constant 0 : i32
    %c0_i32_1 = arith.constant 0 : i32
    return %c0_i32, %c0_i32_0 : i32, i32
  }
  func.func @transform_3(%arg0: i32, %arg1: i32) -> (i32, i32, i32) {
    %c0_i32 = arith.constant 0 : i32
    %c0_i32_0 = arith.constant 0 : i32
    %c0_i32_1 = arith.constant 0 : i32
    return %arg0, %c0_i32, %c0_i32_0 : i32, i32, i32
  }
}

</mosaic_0001>

<bundles_post_ra>
// kernel: brain_age_forward.2
= control target key start
LH: loop header
LB: loop body
LE: loop exit
PB: predicated region body
PF: predicated region fallthrough
CT: control target
= control target key end

     0   :  { %s2307_s12 = smov 0   ;;  %s2309_s13 = smov 0   ;;  %s3172_s0 = inlined_call_operand.vmem [shape: bf16[2,6,256], index: 0, kind: input, shape index: {}]   ;;  %s3173_s1 = inlined_call_operand.vmem [shape: bf16[512,6], index: 1, kind: input, shape index: {}]   ;;  %s3174_s2 = inlined_call_operand.vmem [shape: f32[512,1], index: 2, kind: input, shape index: {}]   ;;  %s3175_s3 = inlined_call_operand.vmem [shape: f32[2,512,1], index: 3, kind: output, shape index: {}]  }
   0x1   :  { %s2311_s14 = smov 0  }
   0x2 LB: > { %s25_s15 = sadd.s32 1, %s2279_s13  ;;  %p2121_p0 = scmp.ge.s32.totalorder %s2283_s14, 1  ;;  %s2283_s14 = sphi %s2311_s14, %s13_s14   ;;  %s2279_s13 = sphi %s2309_s13, %s3177_s13   ;;  %s2275_s12 = sphi %s2307_s12, %s3176_s12  }
   0x3   : > { %p27_p1 = scmp.ge.s32.totalorder %s25_s15, 2  ;;  %p156_p2 = scmp.lt.s32.totalorder %s2283_s14, 3 }
   0x5   : > { %s3179_s15 = smov (%p27_p1, %s25_s15), 0  ;;  %p157_p3 = pnand %p2121_p0, %p156_p2 }
   0x6   : > { %p185_p4 = scmp.lt.s32.totalorder (!%p157_p3), %s2275_s12, 1 }
   0x7   : > { %160 = sbr.rel (%p157_p3) target bundleno = 517 (0x205), region = 32 }
   0xc   : > { %v336_v0 = vld [vmem:[%s3174_s2 + $0x10] sm:$0xff]  ;;  %v334_v1 = vld [vmem:[%s3174_s2] sm:$0xff]  ;;  %v2285_v2 = vmov 0   ;;  %v337_v3 = vld [vmem:[%s3174_s2 + $0x18] sm:$0xff]  ;;  %s3181_s12 = smov (!%p185_p4, %s2275_s12), 1  ;;  %vm980_vm0 = vcmask 1042432  }
   0xd   : > { %2226 = vset.pattern.permute.xlu1 %v2285_v2  ;;  %2225 = vset.pattern.permute.xlu0 %v2285_v2  ;;  %v335_v4 = vld [vmem:[%s3174_s2 + $0x8] sm:$0xff]  ;;  %s2195_s24 = sshll.u32 %s3181_s12, 3  ;;  %v338_v8 = vld [vmem:[%s3174_s2 + $0x20] sm:$0xff]  ;;  %vm883_vm1 = vcmask 48128   ;;  %v341_v13 = vld [vmem:[%s3174_s2 + $0x38] sm:$0xff]  ;;  %vm204_vm2 = vcmask 7168  }
   0xe   : > { %410 = vperm.xlu1 %2226, %v336_v0   ;;  %400 = vperm.xlu0 %2225, %v334_v1   ;;  %s192_s27 = scalar_lea.vmem %s3172_s0, %s2195_s24  ;;  %v339_v7 = vld [vmem:[%s3174_s2 + $0x28] sm:$0xff]  ;;  %v2229_v11 = vld [vmem:[%s3173_s1] sm:$0xff]   ;;  %v340_v14 = vld [vmem:[%s3174_s2 + $0x30] sm:$0xff]  ;;  %s2196_s28 = sshll.u32 %s3181_s12, 9 }
   0xf   : > { %1019 = vmatprep.mubr.bf16.mxu0 %v2285_v2  ;;  %1179 = vmatprep.mubr.bf16.mxu1 %v2285_v2  ;;  %v269_v5 = vld [vmem:[%s192_s27] sm:$0x77]  ;;  %v343_v15 = vld [vmem:[%s3174_s2 + $0x48] sm:$0xff]  ;;  %v345_v19 = vld [vmem:[%s3174_s2 + $0x58] sm:$0xff]  ;;  %s2973_s4 = scalar_lea.vmem %s3175_s3, %s2196_s28 }
  0x10   : > { %v2159_v6 = vcombine.high %v269_v5, %v269_v5  ;;  %v2158_v9 = vcombine.low %v269_v5, %v269_v5  ;;  %v2230_v12 = vld [vmem:[%s3173_s1 + $0x80] sm:$0xff]   ;;  %v2231_v17 = vld [vmem:[%s3173_s1 + $0x8] sm:$0xff]   ;;  %v344_v20 = vld [vmem:[%s3174_s2 + $0x50] sm:$0xff] }
  0x11   : > { %v342_v16 = vld [vmem:[%s3174_s2 + $0x40] sm:$0xff]  ;;  %v2232_v18 = vld [vmem:[%s3173_s1 + $0x88] sm:$0xff]   ;;  %v2233_v23 = vld [vmem:[%s3173_s1 + $0x10] sm:$0xff]  }
  0x12   : > { %415 = vperm.xlu1 %2226, %v337_v3   ;;  %405 = vperm.xlu0 %2225, %v335_v4   ;;  %v982_v10 = vsel %vm980_vm0, %v2158_v9, 0  ;;  %v347_v21 = vld [vmem:[%s3174_s2 + $0x68] sm:$0xff]  ;;  %v346_v22 = vld [vmem:[%s3174_s2 + $0x60] sm:$0xff]  ;;  %v2234_v24 = vld [vmem:[%s3173_s1 + $0x90] sm:$0xff]  }
  0x13   : > { %2160 = vmatprep.subr.msk.bf16.mxu0 %vm980_vm0, %v2159_v6  ;;  %2197 = vmatprep.subr.msk.bf16.mxu1 %vm980_vm0, %v2159_v6  ;;  %v349_v25 = vld [vmem:[%s3174_s2 + $0x78] sm:$0xff]  ;;  %v348_v26 = vld [vmem:[%s3174_s2 + $0x70] sm:$0xff]  ;;  %v351_v27 = vld [vmem:[%s3174_s2 + $0x88] sm:$0xff] }
  0x14   : > { %1002 = vmatpush1.bf16.msra.mxu0 %v982_v10  ;;  %2198 = vmatpush1.bf16.msra.mxu1 %v982_v10  ;;  %v350_v28 = vld [vmem:[%s3174_s2 + $0x80] sm:$0xff]  ;;  %v2235_v29 = vld [vmem:[%s3173_s1 + $0x18] sm:$0xff]   ;;  %v352_v32 = vld [vmem:[%s3174_s2 + $0x90] sm:$0xff] }
  0x15   : > { %v2236_v30 = vld [vmem:[%s3173_s1 + $0x98] sm:$0xff]   ;;  %v355_v33 = vld [vmem:[%s3174_s2 + $0xa8] sm:$0xff]  ;;  %v354_v34 = vld [vmem:[%s3174_s2 + $0xa0] sm:$0xff] }
  0x16   : > { %425 = vperm.xlu1 %2226, %v339_v7   ;;  %420 = vperm.xlu0 %2225, %v338_v8   ;;  %v353_v31 = vld [vmem:[%s3174_s2 + $0x98] sm:$0xff]  ;;  %v2237_v35 = vld [vmem:[%s3173_s1 + $0x20] sm:$0xff]   ;;  %v356_v38 = vld [vmem:[%s3174_s2 + $0xb0] sm:$0xff] }
  0x17   : > { %2161 = vmatmul.mubr.msk.bf16.vlgmr.msra.gmra.mxu0 %vm883_vm1, %v2229_v11  ;;  %2177 = vmatmul.mubr.msk.bf16.vlgmr.msra.gmra.mxu1 %vm883_vm1, %v2230_v12  ;;  %v2238_v36 = vld [vmem:[%s3173_s1 + $0xa0] sm:$0xff]   ;;  %v357_v37 = vld [vmem:[%s3174_s2 + $0xb8] sm:$0xff]  ;;  %v359_v39 = vld [vmem:[%s3174_s2 + $0xc8] sm:$0xff] }
  0x18   : > { %1029 = vmatprep.mubr.bf16.mxu0 %v2285_v2  ;;  %1189 = vmatprep.mubr.bf16.mxu1 %v2285_v2  ;;  %v358_v40 = vld [vmem:[%s3174_s2 + $0xc0] sm:$0xff]  ;;  %v2239_v41 = vld [vmem:[%s3173_s1 + $0x28] sm:$0xff]   ;;  %v361_v43 = vld [vmem:[%s3174_s2 + $0xd8] sm:$0xff] }
  0x19   : > { %v2240_v42 = vld [vmem:[%s3173_s1 + $0xa8] sm:$0xff]   ;;  %v360_v44 = vld [vmem:[%s3174_s2 + $0xd0] sm:$0xff]  ;;  %v362_v46 = vld [vmem:[%s3174_s2 + $0xe0] sm:$0xff] }
  0x1a   : > { %435 = vperm.xlu1 %2226, %v341_v13   ;;  %430 = vperm.xlu0 %2225, %v340_v14   ;;  %v363_v45 = vld [vmem:[%s3174_s2 + $0xe8] sm:$0xff]  ;;  %v2241_v47 = vld [vmem:[%s3173_s1 + $0x30] sm:$0xff]   ;;  %v365_v49 = vld [vmem:[%s3174_s2 + $0xf8] sm:$0xff] }
  0x1b   : > { %v2242_v48 = vld [vmem:[%s3173_s1 + $0xb0] sm:$0xff]   ;;  %v367_v51 = vld [vmem:[%s3174_s2 + $0x108] sm:$0xff]  ;;  %v366_v52 = vld [vmem:[%s3174_s2 + $0x100] sm:$0xff] }
  0x1c   : > { %v364_v50 = vld [vmem:[%s3174_s2 + $0xf0] sm:$0xff]  ;;  %v2243_v53 = vld [vmem:[%s3173_s1 + $0x38] sm:$0xff]   ;;  %v371_v57 = vld [vmem:[%s3174_s2 + $0x128] sm:$0xff] }
  0x1d   : > { %v2244_v54 = vld [vmem:[%s3173_s1 + $0xb8] sm:$0xff]   ;;  %v368_v56 = vld [vmem:[%s3174_s2 + $0x110] sm:$0xff]  ;;  %v370_v58 = vld [vmem:[%s3174_s2 + $0x120] sm:$0xff] }
  0x1e   : > { %445 = vperm.xlu1 %2226, %v343_v15   ;;  %440 = vperm.xlu0 %2225, %v342_v16   ;;  %v369_v55 = vld [vmem:[%s3174_s2 + $0x118] sm:$0xff]  ;;  %v2245_v59 = vld [vmem:[%s3173_s1 + $0x40] sm:$0xff]   ;;  %v372_v62 = vld [vmem:[%s3174_s2 + $0x130] sm:$0xff] }
  0x1f   : > { %2162 = vmatmul.mubr.msk.bf16.gmra.mxu0 %vm883_vm1, %v2231_v17  ;;  %2178 = vmatmul.mubr.msk.bf16.gmra.mxu1 %vm883_vm1, %v2232_v18  ;;  %v2246_v60 = vld [vmem:[%s3173_s1 + $0xc0] sm:$0xff]   ;;  %v373_v61 = vld [vmem:[%s3174_s2 + $0x138] sm:$0xff]  ;;  %v375_v63 = vld [vmem:[%s3174_s2 + $0x148] sm:$0xff] }
  0x20   : > { %1039 = vmatprep.mubr.bf16.mxu0 %v2285_v2  ;;  %1199 = vmatprep.mubr.bf16.mxu1 %v2285_v2  ;;  %v374_v0 = vld [vmem:[%s3174_s2 + $0x140] sm:$0xff]  ;;  %v2247_v1 = vld [vmem:[%s3173_s1 + $0x48] sm:$0xff]   ;;  %v377_v4 = vld [vmem:[%s3174_s2 + $0x158] sm:$0xff] }
  0x21   : > { %v2248_v3 = vld [vmem:[%s3173_s1 + $0xc8] sm:$0xff]   ;;  %v376_v5 = vld [vmem:[%s3174_s2 + $0x150] sm:$0xff]  ;;  %v378_v7 = vld [vmem:[%s3174_s2 + $0x160] sm:$0xff] }
  0x22   : > { %455 = vperm.xlu1 %2226, %v345_v19   ;;  %450 = vperm.xlu0 %2225, %v344_v20   ;;  %v379_v6 = vld [vmem:[%s3174_s2 + $0x168] sm:$0xff]  ;;  %v2249_v8 = vld [vmem:[%s3173_s1 + $0x50] sm:$0xff]   ;;  %v381_v10 = vld [vmem:[%s3174_s2 + $0x178] sm:$0xff] }
  0x23   : > { %v2250_v9 = vld [vmem:[%s3173_s1 + $0xd0] sm:$0xff]   ;;  %v383_v12 = vld [vmem:[%s3174_s2 + $0x188] sm:$0xff]  ;;  %v382_v13 = vld [vmem:[%s3174_s2 + $0x180] sm:$0xff] }
  0x24   : > { %v380_v11 = vld [vmem:[%s3174_s2 + $0x170] sm:$0xff]  ;;  %v2251_v14 = vld [vmem:[%s3173_s1 + $0x58] sm:$0xff]   ;;  %v387_v18 = vld [vmem:[%s3174_s2 + $0x1a8] sm:$0xff] }
  0x25   : > { %v2252_v15 = vld [vmem:[%s3173_s1 + $0xd8] sm:$0xff]   ;;  %v384_v17 = vld [vmem:[%s3174_s2 + $0x190] sm:$0xff]  ;;  %v386_v19 = vld [vmem:[%s3174_s2 + $0x1a0] sm:$0xff] }
  0x26   : > { %465 = vperm.xlu1 %2226, %v347_v21   ;;  %460 = vperm.xlu0 %2225, %v346_v22   ;;  %v385_v16 = vld [vmem:[%s3174_s2 + $0x198] sm:$0xff]  ;;  %v2253_v20 = vld [vmem:[%s3173_s1 + $0x60] sm:$0xff]  }
  0x27   : > { %2163 = vmatmul.mubr.msk.bf16.gmra.mxu0 %vm883_vm1, %v2233_v23  ;;  %2179 = vmatmul.mubr.msk.bf16.gmra.mxu1 %vm883_vm1, %v2234_v24  ;;  %v2254_v21 = vld [vmem:[%s3173_s1 + $0xe0] sm:$0xff]   ;;  %v389_v22 = vld [vmem:[%s3174_s2 + $0x1b8] sm:$0xff]  ;;  %v388_v23 = vld [vmem:[%s3174_s2 + $0x1b0] sm:$0xff] }
  0x28   : > { %1049 = vmatprep.mubr.bf16.mxu0 %v2285_v2  ;;  %1209 = vmatprep.mubr.bf16.mxu1 %v2285_v2  ;;  %v391_v24 = vld [vmem:[%s3174_s2 + $0x1c8] sm:$0xff] }
  0x2a   : > { %475 = vperm.xlu1 %2226, %v349_v25   ;;  %470 = vperm.xlu0 %2225, %v348_v26   ;;  %v390_v25 = vld [vmem:[%s3174_s2 + $0x1c0] sm:$0xff]  ;;  %v2255_v26 = vld [vmem:[%s3173_s1 + $0x68] sm:$0xff]  }
  0x2e   : > { %485 = vperm.xlu1 %2226, %v351_v27   ;;  %480 = vperm.xlu0 %2225, %v350_v28   ;;  %v2256_v27 = vld [vmem:[%s3173_s1 + $0xe8] sm:$0xff]   ;;  %v393_v28 = vld [vmem:[%s3174_s2 + $0x1d8] sm:$0xff] }
  0x2f   : > { %2164 = vmatmul.mubr.msk.bf16.gmra.mxu0 %vm883_vm1, %v2235_v29  ;;  %2180 = vmatmul.mubr.msk.bf16.gmra.mxu1 %vm883_vm1, %v2236_v30  ;;  %v392_v29 = vld [vmem:[%s3174_s2 + $0x1d0] sm:$0xff]  ;;  %v395_v30 = vld [vmem:[%s3174_s2 + $0x1e8] sm:$0xff] }
  0x30   : > { %1059 = vmatprep.mubr.bf16.mxu0 %v2285_v2  ;;  %1219 = vmatprep.mubr.bf16.mxu1 %v2285_v2 }
  0x32   : > { %495 = vperm.xlu1 %2226, %v353_v31   ;;  %490 = vperm.xlu0 %2225, %v352_v32   ;;  %v394_v31 = vld [vmem:[%s3174_s2 + $0x1e0] sm:$0xff]  ;;  %v2257_v32 = vld [vmem:[%s3173_s1 + $0x70] sm:$0xff]  }
  0x36   : > { %505 = vperm.xlu1 %2226, %v355_v33   ;;  %500 = vperm.xlu0 %2225, %v354_v34   ;;  %v2258_v33 = vld [vmem:[%s3173_s1 + $0xf0] sm:$0xff]   ;;  %v397_v34 = vld [vmem:[%s3174_s2 + $0x1f8] sm:$0xff] }
  0x37   : > { %2165 = vmatmul.mubr.msk.bf16.gmra.mxu0 %vm883_vm1, %v2237_v35  ;;  %2181 = vmatmul.mubr.msk.bf16.gmra.mxu1 %vm883_vm1, %v2238_v36  ;;  %v396_v35 = vld [vmem:[%s3174_s2 + $0x1f0] sm:$0xff] }
  0x38   : > { %1069 = vmatprep.mubr.bf16.mxu0 %v2285_v2  ;;  %1229 = vmatprep.mubr.bf16.mxu1 %v2285_v2 }
  0x3a   : > { %515 = vperm.xlu1 %2226, %v357_v37   ;;  %510 = vperm.xlu0 %2225, %v356_v38  }
  0x3e   : > { %525 = vperm.xlu1 %2226, %v359_v39   ;;  %520 = vperm.xlu0 %2225, %v358_v40   ;;  %v2259_v40 = vld [vmem:[%s3173_s1 + $0x78] sm:$0xff]  }
  0x3f   : > { %2166 = vmatmul.mubr.msk.bf16.gmra.mxu0 %vm883_vm1, %v2239_v41  ;;  %2182 = vmatmul.mubr.msk.bf16.gmra.mxu1 %vm883_vm1, %v2240_v42  ;;  %v2260_v41 = vld [vmem:[%s3173_s1 + $0xf8] sm:$0xff]  }
  0x40   : > { %1079 = vmatprep.mubr.bf16.mxu0 %v2285_v2  ;;  %1239 = vmatprep.mubr.bf16.mxu1 %v2285_v2 }
  0x42   : > { %535 = vperm.xlu1 %2226, %v361_v43   ;;  %530 = vperm.xlu0 %2225, %v360_v44  }
  0x46   : > { %545 = vperm.xlu1 %2226, %v363_v45   ;;  %540 = vperm.xlu0 %2225, %v362_v46  }
  0x47   : > { %2167 = vmatmul.mubr.msk.bf16.gmra.mxu0 %vm883_vm1, %v2241_v47  ;;  %2183 = vmatmul.mubr.msk.bf16.gmra.mxu1 %vm883_vm1, %v2242_v48 }
  0x48   : > { %1089 = vmatprep.mubr.bf16.mxu0 %v2285_v2  ;;  %1249 = vmatprep.mubr.bf16.mxu1 %v2285_v2 }
  0x4a   : > { %555 = vperm.xlu1 %2226, %v365_v49   ;;  %550 = vperm.xlu0 %2225, %v364_v50  }
  0x4e   : > { %565 = vperm.xlu1 %2226, %v367_v51   ;;  %560 = vperm.xlu0 %2225, %v366_v52  }
  0x4f   : > { %2168 = vmatmul.mubr.msk.bf16.gmra.mxu0 %vm883_vm1, %v2243_v53  ;;  %2184 = vmatmul.mubr.msk.bf16.gmra.mxu1 %vm883_vm1, %v2244_v54 }
  0x50   : > { %1099 = vmatprep.mubr.bf16.mxu0 %v2285_v2  ;;  %1259 = vmatprep.mubr.bf16.mxu1 %v2285_v2 }
  0x52   : > { %575 = vperm.xlu1 %2226, %v369_v55   ;;  %570 = vperm.xlu0 %2225, %v368_v56  }
  0x56   : > { %585 = vperm.xlu1 %2226, %v371_v57   ;;  %580 = vperm.xlu0 %2225, %v370_v58  }
  0x57   : > { %2169 = vmatmul.mubr.msk.bf16.gmra.mxu0 %vm883_vm1, %v2245_v59  ;;  %2185 = vmatmul.mubr.msk.bf16.gmra.mxu1 %vm883_vm1, %v2246_v60 }
  0x58   : > { %1109 = vmatprep.mubr.bf16.mxu0 %v2285_v2  ;;  %1269 = vmatprep.mubr.bf16.mxu1 %v2285_v2 }
  0x5a   : > { %595 = vperm.xlu1 %2226, %v373_v61   ;;  %590 = vperm.xlu0 %2225, %v372_v62  }
  0x5e   : > { %605 = vperm.xlu1 %2226, %v375_v63   ;;  %600 = vperm.xlu0 %2225, %v374_v0  }
  0x5f   : > { %2170 = vmatmul.mubr.msk.bf16.gmra.mxu0 %vm883_vm1, %v2247_v1  ;;  %2186 = vmatmul.mubr.msk.bf16.gmra.mxu1 %vm883_vm1, %v2248_v3 }
  0x60   : > { %1119 = vmatprep.mubr.bf16.mxu0 %v2285_v2  ;;  %1279 = vmatprep.mubr.bf16.mxu1 %v2285_v2 }
  0x62   : > { %615 = vperm.xlu1 %2226, %v377_v4   ;;  %610 = vperm.xlu0 %2225, %v376_v5  }
  0x66   : > { %625 = vperm.xlu1 %2226, %v379_v6   ;;  %620 = vperm.xlu0 %2225, %v378_v7  }
  0x67   : > { %2171 = vmatmul.mubr.msk.bf16.gmra.mxu0 %vm883_vm1, %v2249_v8  ;;  %2187 = vmatmul.mubr.msk.bf16.gmra.mxu1 %vm883_vm1, %v2250_v9 }
  0x68   : > { %1129 = vmatprep.mubr.bf16.mxu0 %v2285_v2  ;;  %1289 = vmatprep.mubr.bf16.mxu1 %v2285_v2 }
  0x6a   : > { %635 = vperm.xlu1 %2226, %v381_v10   ;;  %630 = vperm.xlu0 %2225, %v380_v11  }
  0x6e   : > { %645 = vperm.xlu1 %2226, %v383_v12   ;;  %640 = vperm.xlu0 %2225, %v382_v13  }
  0x6f   : > { %2172 = vmatmul.mubr.msk.bf16.gmra.mxu0 %vm883_vm1, %v2251_v14  ;;  %2188 = vmatmul.mubr.msk.bf16.gmra.mxu1 %vm883_vm1, %v2252_v15 }
  0x70   : > { %1139 = vmatprep.mubr.bf16.mxu0 %v2285_v2  ;;  %1299 = vmatprep.mubr.bf16.mxu1 %v2285_v2 }
  0x72   : > { %655 = vperm.xlu1 %2226, %v385_v16   ;;  %650 = vperm.xlu0 %2225, %v384_v17  }
  0x76   : > { %665 = vperm.xlu1 %2226, %v387_v18   ;;  %660 = vperm.xlu0 %2225, %v386_v19  }
  0x77   : > { %2173 = vmatmul.mubr.msk.bf16.gmra.mxu0 %vm883_vm1, %v2253_v20  ;;  %2189 = vmatmul.mubr.msk.bf16.gmra.mxu1 %vm883_vm1, %v2254_v21 }
  0x78   : > { %1149 = vmatprep.mubr.bf16.mxu0 %v2285_v2  ;;  %1309 = vmatprep.mubr.bf16.mxu1 %v2285_v2 }
  0x7a   : > { %675 = vperm.xlu1 %2226, %v389_v22   ;;  %670 = vperm.xlu0 %2225, %v388_v23  }
  0x7e   : > { %685 = vperm.xlu1 %2226, %v391_v24   ;;  %680 = vperm.xlu0 %2225, %v390_v25  }
  0x7f   : > { %2174 = vmatmul.mubr.msk.bf16.gmra.mxu0 %vm883_vm1, %v2255_v26  ;;  %2190 = vmatmul.mubr.msk.bf16.gmra.mxu1 %vm883_vm1, %v2256_v27 }
  0x80   : > { %1159 = vmatprep.mubr.bf16.mxu0 %v2285_v2  ;;  %1319 = vmatprep.mubr.bf16.mxu1 %v2285_v2 }
  0x82   : > { %695 = vperm.xlu1 %2226, %v393_v28   ;;  %690 = vperm.xlu0 %2225, %v392_v29  }
  0x86   : > { %705 = vperm.xlu1 %2226, %v395_v30   ;;  %700 = vperm.xlu0 %2225, %v394_v31  }
  0x87   : > { %2175 = vmatmul.mubr.msk.bf16.gmra.mxu0 %vm883_vm1, %v2257_v32  ;;  %2191 = vmatmul.mubr.msk.bf16.gmra.mxu1 %vm883_vm1, %v2258_v33 }
  0x88   : > { %1169 = vmatprep.mubr.bf16.mxu0 %v2285_v2  ;;  %1329 = vmatprep.mubr.bf16.mxu1 %v2285_v2 }
  0x89   : > { %v2673_v36 = vpop.permute.xlu1 %410  ;;  %v401_v37 = vpop.permute.xlu0 %400 }
  0x8a   : > { %715 = vperm.xlu1 %2226, %v397_v34   ;;  %710 = vperm.xlu0 %2225, %v396_v35  }
  0x8d   : > { %v2679_v38 = vpop.permute.xlu1 %415  ;;  %v406_v39 = vpop.permute.xlu0 %405 }
  0x8f   : > { %2176 = vmatmul.mubr.msk.bf16.gmra.mxu0 %vm883_vm1, %v2259_v40  ;;  %2192 = vmatmul.mubr.msk.bf16.gmra.mxu1 %vm883_vm1, %v2260_v41 }
  0x91   : > { %v2687_v42 = vpop.permute.xlu1 %425  ;;  %v2689_v43 = vpop.permute.xlu0 %420 }
  0x95   : > { %v2693_v2 = vpop.permute.xlu1 %435  ;;  %v2695_v44 = vpop.permute.xlu0 %430 }
  0x99   : > { %v2697_v45 = vpop.permute.xlu1 %445  ;;  %v2699_v46 = vpop.permute.xlu0 %440 }
  0x9d   : > { %v2701_v47 = vpop.permute.xlu1 %455  ;;  %v2703_v48 = vpop.permute.xlu0 %450 }
  0xa1   : > { %v2705_v49 = vpop.permute.xlu1 %465  ;;  %v2707_v50 = vpop.permute.xlu0 %460 }
  0xa5   : > { %v2709_v51 = vpop.permute.xlu0 %470  ;;  %v2711_v52 = vpop.permute.xlu1 %475 }
  0xa9   : > { %v2713_v53 = vpop.permute.xlu0 %480  ;;  %v2715_v54 = vpop.permute.xlu1 %485 }
  0xad   : > { %v2717_v55 = vpop.permute.xlu0 %490  ;;  %v2719_v56 = vpop.permute.xlu1 %495 }
  0xb1   : > { %v2721_v57 = vpop.permute.xlu0 %500  ;;  %v2723_v58 = vpop.permute.xlu1 %505 }
  0xb5   : > { %v2725_v59 = vpop.permute.xlu0 %510  ;;  %v2727_v60 = vpop.permute.xlu1 %515 }
  0xb9   : > { %v2729_v61 = vpop.permute.xlu0 %520  ;;  %v2731_v62 = vpop.permute.xlu1 %525 }
  0xbd   : > { %v2733_v63 = vpop.permute.xlu0 %530  ;;  %v2735_v0 = vpop.permute.xlu1 %535 }
  0xc1   : > { %v2737_v1 = vpop.permute.xlu0 %540  ;;  %v2739_v3 = vpop.permute.xlu1 %545 }
  0xc5   : > { %v2741_v4 = vpop.permute.xlu0 %550  ;;  %v2743_v5 = vpop.permute.xlu1 %555 }
  0xc9   : > { %v561_v8 = vpop.permute.xlu0 %560  ;;  %v566_v13 = vpop.permute.xlu1 %565 }
  0xcd   : > { %v571_v32 = vpop.permute.xlu0 %570 }
  0xd7   : > { %v1021_v6 = vpop.f32.mrf.mxu0  ;;  %v1181_v7 = vpop.f32.mrf.mxu1 }
  0xd8   : > { %v1022_v9 = vadd.f32 %v1021_v6, %v401_v37  ;;  %v1182_v10 = vadd.f32 %v1181_v7, %v561_v8 }
  0xd9   : > { %v1023_v11 = vpop.f32.mrf.mxu0  ;;  %v1183_v12 = vpop.f32.mrf.mxu1 }
  0xda   : > { %v1024_v14 = vadd.f32 %v1023_v11, %v401_v37  ;;  %v1184_v15 = vadd.f32 %v1183_v12, %v561_v8  ;;  %v1340_v22 = vmax.f32 %v1022_v9, 0.0  ;;  %v1404_v23 = vmax.f32 %v1182_v10, 0.0 }
  0xdb   : > { %v1025_v16 = vpop.f32.mrf.mxu0  ;;  %v1185_v17 = vpop.f32.mrf.mxu1  ;;  %v2286_v9 = vmov 0.0  }
  0xdc   : > { %v1341_v18 = vmax.f32 %v1024_v14, 0.0  ;;  %v1405_v19 = vmax.f32 %v1184_v15, 0.0  ;;  %v2745_v20 = vadd.f32 %v1025_v16, %v406_v39  ;;  %v2747_v21 = vadd.f32 %v1185_v17, %v566_v13  ;;  %237 = vst.msk [vmem:[#allocation2 + $0x100] sm:$0xff] %vm204_vm2, %v2286_v9  ;;  %205 = vst.msk [vmem:[#allocation2] sm:$0xff] %vm204_vm2, %v2286_v9 }
  0xdd   : > { %v1027_v24 = vpop.f32.mrf.mxu0  ;;  %v1187_v25 = vpop.f32.mrf.mxu1  ;;  %206 = vst.msk [vmem:[#allocation2 + $0x8] sm:$0xff] %vm204_vm2, %v2286_v9  ;;  %207 = vst.msk [vmem:[#allocation2 + $0x10] sm:$0xff] %vm204_vm2, %v2286_v9 }
  0xde   : > { %v2749_v26 = vadd.f32 %v1027_v24, %v406_v39  ;;  %v2751_v27 = vadd.f32 %v1187_v25, %v566_v13  ;;  %v1628_v30 = vadd.f32 %v1405_v19, %v1404_v23  ;;  %v1532_v31 = vadd.f32 %v1341_v18, %v1340_v22  ;;  %208 = vst.msk [vmem:[#allocation2 + $0x18] sm:$0xff] %vm204_vm2, %v2286_v9 }
  0xdf   : > { %v1031_v28 = vpop.f32.mrf.mxu0  ;;  %v1191_v29 = vpop.f32.mrf.mxu1  ;;  %v1342_v33 = vmax.f32 %v2745_v20, 0.0  ;;  %v1406_v34 = vmax.f32 %v2747_v21, 0.0  ;;  %209 = vst.msk [vmem:[#allocation2 + $0x20] sm:$0xff] %vm204_vm2, %v2286_v9  ;;  %210 = vst.msk [vmem:[#allocation2 + $0x28] sm:$0xff] %vm204_vm2, %v2286_v9 }
  0xe0   : > { %v1343_v35 = vmax.f32 %v2749_v26, 0.0  ;;  %v1407_v37 = vmax.f32 %v2751_v27, 0.0  ;;  %v2758_v40 = vadd.f32 %v1031_v28, %v2673_v36  ;;  %v2760_v39 = vadd.f32 %v1191_v29, %v571_v32  ;;  %1629 = vadd.xlane.f32.xlu1 %v1628_v30  ;;  %1533 = vadd.xlane.f32.xlu0 %v1532_v31  ;;  %211 = vst.msk [vmem:[#allocation2 + $0x30] sm:$0xff] %vm204_vm2, %v2286_v9  ;;  %v576_v20 = vpop.permute.xlu1 %575 }
  0xe1   : > { %v1033_v41 = vpop.f32.mrf.mxu0  ;;  %v1193_v6 = vpop.f32.mrf.mxu1  ;;  %212 = vst.msk [vmem:[#allocation2 + $0x38] sm:$0xff] %vm204_vm2, %v2286_v9  ;;  %213 = vst.msk [vmem:[#allocation2 + $0x40] sm:$0xff] %vm204_vm2, %v2286_v9 }
  0xe2   : > { %v2763_v7 = vadd.f32 %v1033_v41, %v2673_v36  ;;  %v2765_v8 = vadd.f32 %v1193_v6, %v571_v32  ;;  %214 = vst.msk [vmem:[#allocation2 + $0x48] sm:$0xff] %vm204_vm2, %v2286_v9  ;;  %215 = vst.msk [vmem:[#allocation2 + $0x50] sm:$0xff] %vm204_vm2, %v2286_v9  ;;  %v1535_v11 = vadd.f32 %v1343_v35, %v1342_v33  ;;  %v1344_v15 = vmax.f32 %v2758_v40, 0.0  ;;  %v581_v33 = vpop.permute.xlu0 %580 }
  0xe3   : > { %216 = vst.msk [vmem:[#allocation2 + $0x58] sm:$0xff] %vm204_vm2, %v2286_v9  ;;  %217 = vst.msk [vmem:[#allocation2 + $0x60] sm:$0xff] %vm204_vm2, %v2286_v9  ;;  %v1035_v36 = vpop.f32.mrf.mxu0  ;;  %v1195_v10 = vpop.f32.mrf.mxu1  ;;  %v1631_v12 = vadd.f32 %v1407_v37, %v1406_v34  ;;  %v1408_v16 = vmax.f32 %v2760_v39, 0.0 }
  0xe4   : > { %218 = vst.msk [vmem:[#allocation2 + $0x68] sm:$0xff] %vm204_vm2, %v2286_v9  ;;  %219 = vst.msk [vmem:[#allocation2 + $0x70] sm:$0xff] %vm204_vm2, %v2286_v9  ;;  %v1345_v13 = vmax.f32 %v2763_v7, 0.0  ;;  %v1409_v14 = vmax.f32 %v2765_v8, 0.0  ;;  %v1036_v17 = vadd.f32 %v1035_v36, %v2679_v38  ;;  %1536 = vadd.xlane.f32.xlu1 %v1535_v11  ;;  %v1196_v29 = vadd.f32 %v1195_v10, %v576_v20  ;;  %v586_v11 = vpop.permute.xlu1 %585 }
  0xe5   : > { %220 = vst.msk [vmem:[#allocation2 + $0x78] sm:$0xff] %vm204_vm2, %v2286_v9  ;;  %221 = vst.msk [vmem:[#allocation2 + $0x80] sm:$0xff] %vm204_vm2, %v2286_v9  ;;  %1632 = vadd.xlane.f32.xlu0 %v1631_v12  ;;  %v1037_v18 = vpop.f32.mrf.mxu0  ;;  %v1197_v19 = vpop.f32.mrf.mxu1 }
  0xe6   : > { %222 = vst.msk [vmem:[#allocation2 + $0x88] sm:$0xff] %vm204_vm2, %v2286_v9  ;;  %223 = vst.msk [vmem:[#allocation2 + $0x90] sm:$0xff] %vm204_vm2, %v2286_v9  ;;  %v1038_v21 = vadd.f32 %v1037_v18, %v2679_v38  ;;  %v1198_v22 = vadd.f32 %v1197_v19, %v576_v20  ;;  %v1634_v25 = vadd.f32 %v1409_v14, %v1408_v16  ;;  %v1346_v28 = vmax.f32 %v1036_v17, 0.0 }
  0xe7   : > { %224 = vst.msk [vmem:[#allocation2 + $0x98] sm:$0xff] %vm204_vm2, %v2286_v9  ;;  %225 = vst.msk [vmem:[#allocation2 + $0xa0] sm:$0xff] %vm204_vm2, %v2286_v9  ;;  %v1041_v23 = vpop.f32.mrf.mxu0  ;;  %v1201_v24 = vpop.f32.mrf.mxu1  ;;  %v1538_v26 = vadd.f32 %v1345_v13, %v1344_v15  ;;  %v1410_v6 = vmax.f32 %v1196_v29, 0.0 }
  0xe8   : > { %226 = vst.msk [vmem:[#allocation2 + $0xa8] sm:$0xff] %vm204_vm2, %v2286_v9  ;;  %227 = vst.msk [vmem:[#allocation2 + $0xb0] sm:$0xff] %vm204_vm2, %v2286_v9  ;;  %v1347_v27 = vmax.f32 %v1038_v21, 0.0  ;;  %v1042_v30 = vadd.f32 %v1041_v23, %v2689_v43  ;;  %1635 = vadd.xlane.f32.xlu1 %v1634_v25  ;;  %v1411_v35 = vmax.f32 %v1198_v22, 0.0  ;;  %v1202_v8 = vadd.f32 %v1201_v24, %v581_v33  ;;  %v591_v25 = vpop.permute.xlu0 %590 }
  0xe9   : > { %228 = vst.msk [vmem:[#allocation2 + $0xb8] sm:$0xff] %vm204_vm2, %v2286_v9  ;;  %229 = vst.msk [vmem:[#allocation2 + $0xc0] sm:$0xff] %vm204_vm2, %v2286_v9  ;;  %1539 = vadd.xlane.f32.xlu0 %v1538_v26  ;;  %v1043_v31 = vpop.f32.mrf.mxu0  ;;  %v1203_v32 = vpop.f32.mrf.mxu1 }
  0xea   : > { %230 = vst.msk [vmem:[#allocation2 + $0xc8] sm:$0xff] %vm204_vm2, %v2286_v9  ;;  %231 = vst.msk [vmem:[#allocation2 + $0xd0] sm:$0xff] %vm204_vm2, %v2286_v9  ;;  %v1044_v34 = vadd.f32 %v1043_v31, %v2689_v43  ;;  %v1204_v37 = vadd.f32 %v1203_v32, %v581_v33  ;;  %v1541_v39 = vadd.f32 %v1347_v27, %v1346_v28  ;;  %v1348_v7 = vmax.f32 %v1042_v30, 0.0 }
  0xeb   : > { %232 = vst.msk [vmem:[#allocation2 + $0xd8] sm:$0xff] %vm204_vm2, %v2286_v9  ;;  %233 = vst.msk [vmem:[#allocation2 + $0xe0] sm:$0xff] %vm204_vm2, %v2286_v9  ;;  %v1045_v38 = vpop.f32.mrf.mxu0  ;;  %v1205_v40 = vpop.f32.mrf.mxu1  ;;  %v1637_v17 = vadd.f32 %v1411_v35, %v1410_v6  ;;  %v1412_v19 = vmax.f32 %v1202_v8, 0.0 }
  0xec   : > { %234 = vst.msk [vmem:[#allocation2 + $0xe8] sm:$0xff] %vm204_vm2, %v2286_v9  ;;  %235 = vst.msk [vmem:[#allocation2 + $0xf0] sm:$0xff] %vm204_vm2, %v2286_v9  ;;  %v1349_v41 = vmax.f32 %v1044_v34, 0.0  ;;  %v1413_v13 = vmax.f32 %v1204_v37, 0.0  ;;  %v1206_v21 = vadd.f32 %v1205_v40, %v586_v11 }
  0xed   : > { %236 = vst.msk [vmem:[#allocation2 + $0xf8] sm:$0xff] %vm204_vm2, %v2286_v9  ;;  %238 = vst.msk [vmem:[#allocation2 + $0x108] sm:$0xff] %vm204_vm2, %v2286_v9  ;;  %1542 = vadd.xlane.f32.xlu0 %v1541_v39  ;;  %v1047_v36 = vpop.f32.mrf.mxu0  ;;  %v1207_v10 = vpop.f32.mrf.mxu1 }
  0xee   : > { %239 = vst.msk [vmem:[#allocation2 + $0x110] sm:$0xff] %vm204_vm2, %v2286_v9  ;;  %240 = vst.msk [vmem:[#allocation2 + $0x118] sm:$0xff] %vm204_vm2, %v2286_v9  ;;  %v1048_v12 = vadd.f32 %v1047_v36, %v2687_v42  ;;  %v1208_v14 = vadd.f32 %v1207_v10, %v586_v11  ;;  %v1544_v16 = vadd.f32 %v1349_v41, %v1348_v7  ;;  %v1414_v33 = vmax.f32 %v1206_v21, 0.0  ;;  %v596_v39 = vpop.permute.xlu1 %595 }
  0xef   : > { %241 = vst.msk [vmem:[#allocation2 + $0x120] sm:$0xff] %vm204_vm2, %v2286_v9  ;;  %242 = vst.msk [vmem:[#allocation2 + $0x128] sm:$0xff] %vm204_vm2, %v2286_v9  ;;  %v1051_v43 = vpop.f32.mrf.mxu0  ;;  %v1211_v15 = vpop.f32.mrf.mxu1  ;;  %v1640_v30 = vadd.f32 %v1413_v13, %v1412_v19 }
  0xf0   : > { %243 = vst.msk [vmem:[#allocation2 + $0x130] sm:$0xff] %vm204_vm2, %v2286_v9  ;;  %244 = vst.msk [vmem:[#allocation2 + $0x138] sm:$0xff] %vm204_vm2, %v2286_v9  ;;  %v1351_v18 = vmax.f32 %v1048_v12, 0.0  ;;  %v1052_v22 = vadd.f32 %v1051_v43, %v2695_v44  ;;  %1545 = vadd.xlane.f32.xlu1 %v1544_v16  ;;  %v1212_v35 = vadd.f32 %v1211_v15, %v591_v25  ;;  %v601_v16 = vpop.permute.xlu0 %600 }
  0xf1   : > { %245 = vst.msk [vmem:[#allocation2 + $0x140] sm:$0xff] %vm204_vm2, %v2286_v9  ;;  %246 = vst.msk [vmem:[#allocation2 + $0x148] sm:$0xff] %vm204_vm2, %v2286_v9  ;;  %1638 = vadd.xlane.f32.xlu0 %v1637_v17  ;;  %v1053_v23 = vpop.f32.mrf.mxu0  ;;  %v1213_v24 = vpop.f32.mrf.mxu1 }
  0xf2   : > { %247 = vst.msk [vmem:[#allocation2 + $0x150] sm:$0xff] %vm204_vm2, %v2286_v9  ;;  %248 = vst.msk [vmem:[#allocation2 + $0x158] sm:$0xff] %vm204_vm2, %v2286_v9  ;;  %v1054_v26 = vadd.f32 %v1053_v23, %v2695_v44  ;;  %v1214_v27 = vadd.f32 %v1213_v24, %v591_v25  ;;  %v1352_v34 = vmax.f32 %v1052_v22, 0.0  ;;  %v1416_v11 = vmax.f32 %v1212_v35, 0.0 }
  0xf3   : > { %249 = vst.msk [vmem:[#allocation2 + $0x160] sm:$0xff] %vm204_vm2, %v2286_v9  ;;  %250 = vst.msk [vmem:[#allocation2 + $0x168] sm:$0xff] %vm204_vm2, %v2286_v9  ;;  %v1055_v28 = vpop.f32.mrf.mxu0  ;;  %v1215_v29 = vpop.f32.mrf.mxu1 }
  0xf4   : > { %251 = vst.msk [vmem:[#allocation2 + $0x170] sm:$0xff] %vm204_vm2, %v2286_v9  ;;  %252 = vst.msk [vmem:[#allocation2 + $0x178] sm:$0xff] %vm204_vm2, %v2286_v9  ;;  %v1353_v32 = vmax.f32 %v1054_v26, 0.0  ;;  %v1056_v37 = vadd.f32 %v1055_v28, %v2693_v2  ;;  %1641 = vadd.xlane.f32.xlu1 %v1640_v30  ;;  %v1417_v44 = vmax.f32 %v1214_v27, 0.0  ;;  %v1216_v13 = vadd.f32 %v1215_v29, %v596_v39  ;;  %v606_v29 = vpop.permute.xlu1 %605 }
  0xf5   : > { %253 = vst.msk [vmem:[#allocation2 + $0x180] sm:$0xff] %vm204_vm2, %v2286_v9  ;;  %254 = vst.msk [vmem:[#allocation2 + $0x188] sm:$0xff] %vm204_vm2, %v2286_v9  ;;  %v1217_v40 = vpop.f32.mrf.mxu1 }
  0xf6   : > { %255 = vst.msk [vmem:[#allocation2 + $0x190] sm:$0xff] %vm204_vm2, %v2286_v9  ;;  %256 = vst.msk [vmem:[#allocation2 + $0x198] sm:$0xff] %vm204_vm2, %v2286_v9  ;;  %v1218_v6 = vadd.f32 %v1217_v40, %v596_v39  ;;  %v1354_v12 = vmax.f32 %v1056_v37, 0.0  ;;  %v1646_v21 = vadd.f32 %v1417_v44, %v1416_v11  ;;  %v1418_v24 = vmax.f32 %v1216_v13, 0.0 }
  0xf7   : > { %257 = vst.msk [vmem:[#allocation2 + $0x1a0] sm:$0xff] %vm204_vm2, %v2286_v9  ;;  %258 = vst.msk [vmem:[#allocation2 + $0x1a8] sm:$0xff] %vm204_vm2, %v2286_v9  ;;  %v1221_v8 = vpop.f32.mrf.mxu1 }
  0xf8   : > { %259 = vst.msk [vmem:[#allocation2 + $0x1b0] sm:$0xff] %vm204_vm2, %v2286_v9  ;;  %260 = vst.msk [vmem:[#allocation2 + $0x1b8] sm:$0xff] %vm204_vm2, %v2286_v9  ;;  %v1222_v26 = vadd.f32 %v1221_v8, %v601_v16 }
  0xf9   : > { %261 = vst.msk [vmem:[#allocation2 + $0x1c0] sm:$0xff] %vm204_vm2, %v2286_v9  ;;  %262 = vst.msk [vmem:[#allocation2 + $0x1c8] sm:$0xff] %vm204_vm2, %v2286_v9  ;;  %v1223_v15 = vpop.f32.mrf.mxu1 }
  0xfa   : > { %263 = vst.msk [vmem:[#allocation2 + $0x1d0] sm:$0xff] %vm204_vm2, %v2286_v9  ;;  %264 = vst.msk [vmem:[#allocation2 + $0x1d8] sm:$0xff] %vm204_vm2, %v2286_v9 }
  0xfb   : > { %265 = vst.msk [vmem:[#allocation2 + $0x1e0] sm:$0xff] %vm204_vm2, %v2286_v9  ;;  %266 = vst.msk [vmem:[#allocation2 + $0x1e8] sm:$0xff] %vm204_vm2, %v2286_v9 }
  0xfc   : > { %267 = vst.msk [vmem:[#allocation2 + $0x1f0] sm:$0xff] %vm204_vm2, %v2286_v9  ;;  %268 = vst.msk [vmem:[#allocation2 + $0x1f8] sm:$0xff] %vm204_vm2, %v2286_v9  ;;  %v1046_v9 = vadd.f32 %v1045_v38, %v2687_v42  ;;  %v1415_v42 = vmax.f32 %v1208_v14, 0.0  ;;  %v1057_v38 = vpop.f32.mrf.mxu0 }
  0xfd   : > { %v1058_v41 = vadd.f32 %v1057_v38, %v2693_v2  ;;  %v1419_v2 = vmax.f32 %v1218_v6, 0.0  ;;  %v1420_v38 = vmax.f32 %v1222_v26, 0.0 }
  0xfe   : > { %v1350_v20 = vmax.f32 %v1046_v9, 0.0  ;;  %v1061_v7 = vpop.f32.mrf.mxu0  ;;  %v1550_v9 = vadd.f32 %v1353_v32, %v1352_v34  ;;  %v1643_v36 = vadd.f32 %v1415_v42, %v1414_v33 }
  0xff   : > { %v1355_v10 = vmax.f32 %v1058_v41, 0.0  ;;  %v1062_v14 = vadd.f32 %v1061_v7, %v2699_v46  ;;  %v1649_v35 = vadd.f32 %v1419_v2, %v1418_v24  ;;  %v611_v7 = vpop.permute.xlu0 %610 }
 0x100   : > { %v1547_v31 = vadd.f32 %v1351_v18, %v1350_v20  ;;  %1551 = vadd.xlane.f32.xlu1 %v1550_v9  ;;  %v1063_v43 = vpop.f32.mrf.mxu0  ;;  %v1224_v18 = vadd.f32 %v1223_v15, %v601_v16  ;;  %v1225_v20 = vpop.f32.mrf.mxu1 }
 0x101   : > { %v1064_v17 = vadd.f32 %v1063_v43, %v2699_v46  ;;  %v1553_v22 = vadd.f32 %v1355_v10, %v1354_v12  ;;  %v1356_v25 = vmax.f32 %v1062_v14, 0.0  ;;  %v1226_v39 = vadd.f32 %v1225_v20, %v606_v29 }
 0x102   : > { %1548 = vadd.xlane.f32.xlu0 %v1547_v31  ;;  %v1065_v19 = vpop.f32.mrf.mxu0  ;;  %v1227_v28 = vpop.f32.mrf.mxu1  ;;  %v1421_v46 = vmax.f32 %v1224_v18, 0.0 }
 0x103   : > { %v1357_v23 = vmax.f32 %v1064_v17, 0.0  ;;  %v1066_v42 = vadd.f32 %v1065_v19, %v2697_v45  ;;  %v1228_v31 = vadd.f32 %v1227_v28, %v606_v29  ;;  %v1422_v14 = vmax.f32 %v1226_v39, 0.0  ;;  %v616_v18 = vpop.permute.xlu1 %615 }
 0x104   : > { %1647 = vadd.xlane.f32.xlu1 %v1646_v21  ;;  %v1067_v27 = vpop.f32.mrf.mxu0  ;;  %v1231_v33 = vpop.f32.mrf.mxu1  ;;  %v1652_v11 = vadd.f32 %v1421_v46, %v1420_v38 }
 0x105   : > { %v1068_v30 = vadd.f32 %v1067_v27, %v2697_v45  ;;  %v1556_v34 = vadd.f32 %v1357_v23, %v1356_v25  ;;  %v1358_v40 = vmax.f32 %v1066_v42, 0.0  ;;  %v1423_v45 = vmax.f32 %v1228_v31, 0.0  ;;  %v621_v46 = vpop.permute.xlu0 %620 }
 0x106   : > { %1644 = vadd.xlane.f32.xlu0 %v1643_v36  ;;  %v1071_v32 = vpop.f32.mrf.mxu0  ;;  %v1233_v6 = vpop.f32.mrf.mxu1  ;;  %v1232_v15 = vadd.f32 %v1231_v33, %v611_v7 }
 0x107   : > { %v1359_v37 = vmax.f32 %v1068_v30, 0.0  ;;  %v1072_v41 = vadd.f32 %v1071_v32, %v2703_v48  ;;  %v1234_v9 = vadd.f32 %v1233_v6, %v611_v7  ;;  %v1655_v24 = vadd.f32 %v1423_v45, %v1422_v14 }
 0x108   : > { %1557 = vadd.xlane.f32.xlu1 %v1556_v34  ;;  %v1073_v44 = vpop.f32.mrf.mxu0  ;;  %v1235_v10 = vpop.f32.mrf.mxu1  ;;  %v1424_v26 = vmax.f32 %v1232_v15, 0.0 }
 0x109   : > { %v1074_v8 = vadd.f32 %v1073_v44, %v2703_v48  ;;  %v1559_v12 = vadd.f32 %v1359_v37, %v1358_v40  ;;  %v1360_v43 = vmax.f32 %v1072_v41, 0.0  ;;  %v1425_v48 = vmax.f32 %v1234_v9, 0.0 }
 0x10a   : > { %1554 = vadd.xlane.f32.xlu0 %v1553_v22  ;;  %v1075_v36 = vpop.f32.mrf.mxu0  ;;  %v1237_v2 = vpop.f32.mrf.mxu1  ;;  %v1236_v27 = vadd.f32 %v1235_v10, %v616_v18 }
 0x10b   : > { %v1361_v13 = vmax.f32 %v1074_v8, 0.0  ;;  %v1076_v16 = vadd.f32 %v1075_v36, %v2701_v47  ;;  %v1238_v20 = vadd.f32 %v1237_v2, %v616_v18  ;;  %v626_v8 = vpop.permute.xlu1 %625  ;;  %v631_v18 = vpop.permute.xlu0 %630 }
 0x10c   : > { %1653 = vadd.xlane.f32.xlu1 %v1652_v11  ;;  %v1077_v17 = vpop.f32.mrf.mxu0  ;;  %v1241_v22 = vpop.f32.mrf.mxu1  ;;  %v1426_v40 = vmax.f32 %v1236_v27, 0.0 }
 0x10d   : > { %v1078_v19 = vadd.f32 %v1077_v17, %v2701_v47  ;;  %v1562_v23 = vadd.f32 %v1361_v13, %v1360_v43  ;;  %v1362_v42 = vmax.f32 %v1076_v16, 0.0  ;;  %v1427_v47 = vmax.f32 %v1238_v20, 0.0 }
 0x10e   : > { %1650 = vadd.xlane.f32.xlu0 %v1649_v35  ;;  %v1081_v21 = vpop.f32.mrf.mxu0  ;;  %v1243_v30 = vpop.f32.mrf.mxu1  ;;  %v1658_v35 = vadd.f32 %v1425_v48, %v1424_v26  ;;  %v1242_v41 = vadd.f32 %v1241_v22, %v621_v46 }
 0x10f   : > { %v1363_v25 = vmax.f32 %v1078_v19, 0.0  ;;  %v1082_v28 = vadd.f32 %v1081_v21, %v2707_v50  ;;  %v1244_v32 = vadd.f32 %v1243_v30, %v621_v46  ;;  %v636_v30 = vpop.permute.xlu1 %635 }
 0x110   : > { %1563 = vadd.xlane.f32.xlu1 %v1562_v23  ;;  %v1083_v29 = vpop.f32.mrf.mxu0  ;;  %v1245_v34 = vpop.f32.mrf.mxu1  ;;  %v1428_v14 = vmax.f32 %v1242_v41, 0.0 }
 0x111   : > { %v1084_v31 = vadd.f32 %v1083_v29, %v2707_v50  ;;  %v1565_v37 = vadd.f32 %v1363_v25, %v1362_v42  ;;  %v1364_v39 = vmax.f32 %v1082_v28, 0.0  ;;  %v1429_v50 = vmax.f32 %v1244_v32, 0.0 }
 0x112   : > { %1560 = vadd.xlane.f32.xlu0 %v1559_v12  ;;  %v1085_v33 = vpop.f32.mrf.mxu0  ;;  %v1247_v7 = vpop.f32.mrf.mxu1  ;;  %v1661_v12 = vadd.f32 %v1427_v47, %v1426_v40  ;;  %v1246_v15 = vadd.f32 %v1245_v34, %v626_v8 }
 0x113   : > { %v1365_v38 = vmax.f32 %v1084_v31, 0.0  ;;  %v1086_v44 = vadd.f32 %v1085_v33, %v2705_v49  ;;  %v1248_v9 = vadd.f32 %v1247_v7, %v626_v8  ;;  %v1664_v22 = vadd.f32 %v1429_v50, %v1428_v14 }
 0x114   : > { %1659 = vadd.xlane.f32.xlu1 %v1658_v35  ;;  %v1087_v6 = vpop.f32.mrf.mxu0  ;;  %v1251_v10 = vpop.f32.mrf.mxu1  ;;  %v1430_v25 = vmax.f32 %v1246_v15, 0.0 }
 0x115   : > { %v1088_v45 = vadd.f32 %v1087_v6, %v2705_v49  ;;  %v1568_v11 = vadd.f32 %v1365_v38, %v1364_v39  ;;  %v1366_v43 = vmax.f32 %v1086_v44, 0.0  ;;  %v1431_v49 = vmax.f32 %v1248_v9, 0.0  ;;  %v641_v6 = vpop.permute.xlu0 %640 }
 0x116   : > { %1656 = vadd.xlane.f32.xlu0 %v1655_v24  ;;  %v1091_v36 = vpop.f32.mrf.mxu0  ;;  %v1253_v2 = vpop.f32.mrf.mxu1  ;;  %v1252_v42 = vadd.f32 %v1251_v10, %v631_v18 }
 0x117   : > { %v1367_v13 = vmax.f32 %v1088_v45, 0.0  ;;  %v1092_v16 = vadd.f32 %v1091_v36, %v2709_v51  ;;  %v1254_v48 = vadd.f32 %v1253_v2, %v631_v18  ;;  %v1667_v34 = vadd.f32 %v1431_v49, %v1430_v25 }
 0x118   : > { %1569 = vadd.xlane.f32.xlu1 %v1568_v11  ;;  %v1093_v17 = vpop.f32.mrf.mxu0  ;;  %v1255_v21 = vpop.f32.mrf.mxu1 }
 0x119   : > { %v1094_v19 = vadd.f32 %v1093_v17, %v2709_v51  ;;  %v1571_v23 = vadd.f32 %v1367_v13, %v1366_v43  ;;  %v1368_v26 = vmax.f32 %v1092_v16, 0.0  ;;  %v1433_v51 = vmax.f32 %v1254_v48, 0.0  ;;  %v646_v16 = vpop.permute.xlu1 %645 }
 0x11a   : > { %1566 = vadd.xlane.f32.xlu0 %v1565_v37  ;;  %v1095_v20 = vpop.f32.mrf.mxu0  ;;  %v1257_v29 = vpop.f32.mrf.mxu1  ;;  %v1432_v37 = vmax.f32 %v1252_v42, 0.0  ;;  %v1256_v40 = vadd.f32 %v1255_v21, %v636_v30 }
 0x11b   : > { %v1369_v24 = vmax.f32 %v1094_v19, 0.0  ;;  %v1096_v27 = vadd.f32 %v1095_v20, %v2711_v52  ;;  %v1258_v31 = vadd.f32 %v1257_v29, %v636_v30  ;;  %v651_v42 = vpop.permute.xlu0 %650 }
 0x11c   : > { %1665 = vadd.xlane.f32.xlu1 %v1664_v22  ;;  %v1097_v28 = vpop.f32.mrf.mxu0  ;;  %v1261_v32 = vpop.f32.mrf.mxu1  ;;  %v1670_v9 = vadd.f32 %v1433_v51, %v1432_v37 }
 0x11d   : > { %v1098_v46 = vadd.f32 %v1097_v28, %v2711_v52  ;;  %v1574_v33 = vadd.f32 %v1369_v24, %v1368_v26  ;;  %v1370_v38 = vmax.f32 %v1096_v27, 0.0  ;;  %v1435_v52 = vmax.f32 %v1258_v31, 0.0 }
 0x11e   : > { %1662 = vadd.xlane.f32.xlu0 %v1661_v12  ;;  %v1101_v47 = vpop.f32.mrf.mxu0  ;;  %v1263_v44 = vpop.f32.mrf.mxu1  ;;  %v1434_v12 = vmax.f32 %v1256_v40, 0.0  ;;  %v1262_v14 = vadd.f32 %v1261_v32, %v641_v6 }
 0x11f   : > { %v1371_v35 = vmax.f32 %v1098_v46, 0.0  ;;  %v1102_v39 = vadd.f32 %v1101_v47, %v2713_v53  ;;  %v1264_v8 = vadd.f32 %v1263_v44, %v641_v6 }
 0x120   : > { %1575 = vadd.xlane.f32.xlu1 %v1574_v33  ;;  %v1103_v41 = vpop.f32.mrf.mxu0  ;;  %v1265_v50 = vpop.f32.mrf.mxu1  ;;  %v1673_v48 = vadd.f32 %v1435_v52, %v1434_v12  ;;  %v1436_v22 = vmax.f32 %v1262_v14, 0.0 }
 0x121   : > { %v1104_v7 = vadd.f32 %v1103_v41, %v2713_v53  ;;  %v1577_v36 = vadd.f32 %v1371_v35, %v1370_v38  ;;  %v1372_v13 = vmax.f32 %v1102_v39, 0.0  ;;  %v1437_v53 = vmax.f32 %v1264_v8, 0.0  ;;  %v656_v38 = vpop.permute.xlu1 %655 }
 0x122   : > { %1572 = vadd.xlane.f32.xlu0 %v1571_v23  ;;  %v1105_v45 = vpop.f32.mrf.mxu0  ;;  %v1267_v15 = vpop.f32.mrf.mxu1  ;;  %v1266_v23 = vadd.f32 %v1265_v50, %v646_v16 }
 0x123   : > { %v1373_v10 = vmax.f32 %v1104_v7, 0.0  ;;  %v1106_v11 = vadd.f32 %v1105_v45, %v2715_v54  ;;  %v1268_v2 = vadd.f32 %v1267_v15, %v646_v16  ;;  %v1676_v51 = vadd.f32 %v1437_v53, %v1436_v22 }
 0x124   : > { %1671 = vadd.xlane.f32.xlu1 %v1670_v9  ;;  %v1107_v43 = vpop.f32.mrf.mxu0  ;;  %v1271_v19 = vpop.f32.mrf.mxu1  ;;  %v1438_v47 = vmax.f32 %v1266_v23, 0.0 }
 0x125   : > { %v1108_v17 = vadd.f32 %v1107_v43, %v2715_v54  ;;  %v1580_v49 = vadd.f32 %v1373_v10, %v1372_v13  ;;  %v1374_v20 = vmax.f32 %v1106_v11, 0.0  ;;  %v1439_v28 = vmax.f32 %v1268_v2, 0.0  ;;  %v661_v11 = vpop.permute.xlu0 %660 }
 0x126   : > { %1668 = vadd.xlane.f32.xlu0 %v1667_v34  ;;  %v1111_v18 = vpop.f32.mrf.mxu0  ;;  %v1273_v26 = vpop.f32.mrf.mxu1  ;;  %v1272_v33 = vadd.f32 %v1271_v19, %v651_v42 }
 0x127   : > { %v1375_v21 = vmax.f32 %v1108_v17, 0.0  ;;  %v1112_v24 = vadd.f32 %v1111_v18, %v2717_v55  ;;  %v1274_v29 = vadd.f32 %v1273_v26, %v651_v42  ;;  %v1679_v39 = vadd.f32 %v1439_v28, %v1438_v47 }
 0x128   : > { %1581 = vadd.xlane.f32.xlu1 %v1580_v49  ;;  %v1113_v25 = vpop.f32.mrf.mxu0  ;;  %v1275_v46 = vpop.f32.mrf.mxu1  ;;  %v1440_v45 = vmax.f32 %v1272_v33, 0.0 }
 0x129   : > { %v1583_v27 = vadd.f32 %v1375_v21, %v1374_v20  ;;  %v1114_v54 = vadd.f32 %v1113_v25, %v2717_v55  ;;  %v1376_v32 = vmax.f32 %v1112_v24, 0.0  ;;  %v1441_v55 = vmax.f32 %v1274_v29, 0.0  ;;  %v666_v20 = vpop.permute.xlu1 %665 }
 0x12a   : > { %1578 = vadd.xlane.f32.xlu0 %v1577_v36  ;;  %v1115_v30 = vpop.f32.mrf.mxu0  ;;  %v1277_v37 = vpop.f32.mrf.mxu1  ;;  %v1276_v50 = vadd.f32 %v1275_v46, %v656_v38 }
 0x12b   : > { %v1116_v31 = vadd.f32 %v1115_v30, %v2719_v56  ;;  %v1377_v34 = vmax.f32 %v1114_v54, 0.0  ;;  %v1278_v44 = vadd.f32 %v1277_v37, %v656_v38  ;;  %v1682_v13 = vadd.f32 %v1441_v55, %v1440_v45 }
 0x12c   : > { %1677 = vadd.xlane.f32.xlu1 %v1676_v51  ;;  %v1117_v35 = vpop.f32.mrf.mxu0  ;;  %v1281_v7 = vpop.f32.mrf.mxu1  ;;  %v1442_v53 = vmax.f32 %v1276_v50, 0.0 }
 0x12d   : > { %v1118_v40 = vadd.f32 %v1117_v35, %v2719_v56  ;;  %v1586_v41 = vadd.f32 %v1377_v34, %v1376_v32  ;;  %v1378_v52 = vmax.f32 %v1116_v31, 0.0  ;;  %v1443_v56 = vmax.f32 %v1278_v44, 0.0  ;;  %v671_v51 = vpop.permute.xlu0 %670 }
 0x12e   : > { %1674 = vadd.xlane.f32.xlu0 %v1673_v48  ;;  %v1121_v6 = vpop.f32.mrf.mxu0  ;;  %v1283_v10 = vpop.f32.mrf.mxu1  ;;  %v1282_v18 = vadd.f32 %v1281_v7, %v661_v11 }
 0x12f   : > { %v1379_v8 = vmax.f32 %v1118_v40, 0.0  ;;  %v1122_v9 = vadd.f32 %v1121_v6, %v2721_v57  ;;  %v1284_v43 = vadd.f32 %v1283_v10, %v661_v11  ;;  %v1685_v22 = vadd.f32 %v1443_v56, %v1442_v53  ;;  %v676_v6 = vpop.permute.xlu1 %675 }
 0x130   : > { %1587 = vadd.xlane.f32.xlu1 %v1586_v41  ;;  %v1123_v36 = vpop.f32.mrf.mxu0  ;;  %v1285_v16 = vpop.f32.mrf.mxu1  ;;  %v1444_v28 = vmax.f32 %v1282_v18, 0.0 }
 0x131   : > { %v1589_v12 = vadd.f32 %v1379_v8, %v1378_v52  ;;  %v1124_v14 = vadd.f32 %v1123_v36, %v2721_v57  ;;  %v1380_v2 = vmax.f32 %v1122_v9, 0.0  ;;  %v1445_v24 = vmax.f32 %v1284_v43, 0.0  ;;  %v681_v43 = vpop.permute.xlu0 %680 }
 0x132   : > { %1584 = vadd.xlane.f32.xlu0 %v1583_v27  ;;  %v1125_v15 = vpop.f32.mrf.mxu0  ;;  %v1287_v48 = vpop.f32.mrf.mxu1  ;;  %v1286_v54 = vadd.f32 %v1285_v16, %v666_v20 }
 0x133   : > { %v1126_v17 = vadd.f32 %v1125_v15, %v2723_v58  ;;  %v1381_v19 = vmax.f32 %v1124_v14, 0.0  ;;  %v1288_v57 = vadd.f32 %v1287_v48, %v666_v20  ;;  %v1688_v47 = vadd.f32 %v1445_v24, %v1444_v28  ;;  %v686_v24 = vpop.permute.xlu1 %685 }
 0x134   : > { %1683 = vadd.xlane.f32.xlu1 %v1682_v13  ;;  %v1127_v49 = vpop.f32.mrf.mxu0  ;;  %v1291_v26 = vpop.f32.mrf.mxu1  ;;  %v1446_v38 = vmax.f32 %v1286_v54, 0.0 }
 0x135   : > { %v1128_v21 = vadd.f32 %v1127_v49, %v2723_v58  ;;  %v1592_v23 = vadd.f32 %v1381_v19, %v1380_v2  ;;  %v1382_v42 = vmax.f32 %v1126_v17, 0.0  ;;  %v1447_v58 = vmax.f32 %v1288_v57, 0.0 }
 0x136   : > { %1680 = vadd.xlane.f32.xlu0 %v1679_v39  ;;  %v1131_v25 = vpop.f32.mrf.mxu0  ;;  %v1293_v46 = vpop.f32.mrf.mxu1  ;;  %v1292_v39 = vadd.f32 %v1291_v26, %v671_v51 }
 0x137   : > { %v1383_v27 = vmax.f32 %v1128_v21, 0.0  ;;  %v1132_v29 = vadd.f32 %v1131_v25, %v2725_v59  ;;  %v1294_v33 = vadd.f32 %v1293_v46, %v671_v51  ;;  %v1691_v52 = vadd.f32 %v1447_v58, %v1446_v38  ;;  %v691_v58 = vpop.permute.xlu0 %690 }
 0x138   : > { %1593 = vadd.xlane.f32.xlu1 %v1592_v23  ;;  %v1133_v30 = vpop.f32.mrf.mxu0  ;;  %v1295_v35 = vpop.f32.mrf.mxu1  ;;  %v1448_v11 = vmax.f32 %v1292_v39, 0.0 }
 0x139   : > { %v1595_v31 = vadd.f32 %v1383_v27, %v1382_v42  ;;  %v1134_v32 = vadd.f32 %v1133_v30, %v2725_v59  ;;  %v1384_v40 = vmax.f32 %v1132_v29, 0.0  ;;  %v1449_v45 = vmax.f32 %v1294_v33, 0.0 }
 0x13a   : > { %1590 = vadd.xlane.f32.xlu0 %v1589_v12  ;;  %v1135_v34 = vpop.f32.mrf.mxu0  ;;  %v1297_v44 = vpop.f32.mrf.mxu1  ;;  %v1296_v12 = vadd.f32 %v1295_v35, %v676_v6 }
 0x13b   : > { %v1136_v37 = vadd.f32 %v1135_v34, %v2727_v60  ;;  %v1385_v41 = vmax.f32 %v1134_v32, 0.0  ;;  %v1298_v59 = vadd.f32 %v1297_v44, %v676_v6  ;;  %v1694_v16 = vadd.f32 %v1449_v45, %v1448_v11 }
 0x13c   : > { %1689 = vadd.xlane.f32.xlu1 %v1688_v47  ;;  %v1137_v55 = vpop.f32.mrf.mxu0  ;;  %v1301_v9 = vpop.f32.mrf.mxu1  ;;  %v1450_v49 = vmax.f32 %v1296_v12, 0.0 }
 0x13d   : > { %v1138_v7 = vadd.f32 %v1137_v55, %v2727_v60  ;;  %v1598_v8 = vadd.f32 %v1385_v41, %v1384_v40  ;;  %v1386_v36 = vmax.f32 %v1136_v37, 0.0  ;;  %v1451_v60 = vmax.f32 %v1298_v59, 0.0 }
 0x13e   : > { %1686 = vadd.xlane.f32.xlu0 %v1685_v22  ;;  %v1141_v50 = vpop.f32.mrf.mxu0  ;;  %v1303_v14 = vpop.f32.mrf.mxu1  ;;  %v1302_v20 = vadd.f32 %v1301_v9, %v681_v43 }
 0x13f   : > { %v1387_v10 = vmax.f32 %v1138_v7, 0.0  ;;  %v1142_v13 = vadd.f32 %v1141_v50, %v2729_v61  ;;  %v1304_v53 = vadd.f32 %v1303_v14, %v681_v43  ;;  %v1697_v25 = vadd.f32 %v1451_v60, %v1450_v49 }
 0x140   : > { %1599 = vadd.xlane.f32.xlu1 %v1598_v8  ;;  %v1143_v56 = vpop.f32.mrf.mxu0  ;;  %v1305_v18 = vpop.f32.mrf.mxu1  ;;  %v1452_v30 = vmax.f32 %v1302_v20, 0.0 }
 0x141   : > { %v1601_v15 = vadd.f32 %v1387_v10, %v1386_v36  ;;  %v1144_v17 = vadd.f32 %v1143_v56, %v2729_v61  ;;  %v1388_v48 = vmax.f32 %v1142_v13, 0.0  ;;  %v1453_v42 = vmax.f32 %v1304_v53, 0.0 }
 0x142   : > { %1596 = vadd.xlane.f32.xlu0 %v1595_v31  ;;  %v1145_v2 = vpop.f32.mrf.mxu0  ;;  %v1307_v23 = vpop.f32.mrf.mxu1  ;;  %v1306_v46 = vadd.f32 %v1305_v18, %v686_v24 }
 0x143   : > { %v1146_v19 = vadd.f32 %v1145_v2, %v2731_v62  ;;  %v1389_v21 = vmax.f32 %v1144_v17, 0.0  ;;  %v1308_v61 = vadd.f32 %v1307_v23, %v686_v24  ;;  %v1700_v33 = vadd.f32 %v1453_v42, %v1452_v30 }
 0x144   : > { %1695 = vadd.xlane.f32.xlu1 %v1694_v16  ;;  %v1147_v22 = vpop.f32.mrf.mxu0  ;;  %v1311_v28 = vpop.f32.mrf.mxu1  ;;  %v1454_v39 = vmax.f32 %v1306_v46, 0.0 }
 0x145   : > { %v1148_v57 = vadd.f32 %v1147_v22, %v2731_v62  ;;  %v1604_v26 = vadd.f32 %v1389_v21, %v1388_v48  ;;  %v1390_v54 = vmax.f32 %v1146_v19, 0.0  ;;  %v1455_v62 = vmax.f32 %v1308_v61, 0.0 }
 0x146   : > { %1692 = vadd.xlane.f32.xlu0 %v1691_v52  ;;  %v1151_v27 = vpop.f32.mrf.mxu0  ;;  %v1313_v47 = vpop.f32.mrf.mxu1  ;;  %v1312_v55 = vadd.f32 %v1311_v28, %v691_v58 }
 0x147   : > { %v1391_v29 = vmax.f32 %v1148_v57, 0.0  ;;  %v1152_v51 = vadd.f32 %v1151_v27, %v2733_v63  ;;  %v1314_v35 = vadd.f32 %v1313_v47, %v691_v58  ;;  %v696_v52 = vpop.permute.xlu1 %695  ;;  %v1703_v45 = vadd.f32 %v1455_v62, %v1454_v39 }
 0x148   : > { %1605 = vadd.xlane.f32.xlu1 %v1604_v26  ;;  %v1153_v31 = vpop.f32.mrf.mxu0  ;;  %v1315_v38 = vpop.f32.mrf.mxu1  ;;  %v1456_v12 = vmax.f32 %v1312_v55, 0.0 }
 0x149   : > { %v1607_v32 = vadd.f32 %v1391_v29, %v1390_v54  ;;  %v1154_v34 = vadd.f32 %v1153_v31, %v2733_v63  ;;  %v1392_v41 = vmax.f32 %v1152_v51, 0.0  ;;  %v1457_v50 = vmax.f32 %v1314_v35, 0.0 }
 0x14a   : > { %1602 = vadd.xlane.f32.xlu0 %v1601_v15  ;;  %v1155_v37 = vpop.f32.mrf.mxu0  ;;  %v1317_v7 = vpop.f32.mrf.mxu1  ;;  %v1316_v13 = vadd.f32 %v1315_v38, %v696_v52 }
 0x14b   : > { %v1156_v40 = vadd.f32 %v1155_v37, %v2735_v0  ;;  %v1393_v44 = vmax.f32 %v1154_v34, 0.0  ;;  %v1318_v63 = vadd.f32 %v1317_v7, %v696_v52  ;;  %v701_v15 = vpop.permute.xlu0 %700  ;;  %v1706_v60 = vadd.f32 %v1457_v50, %v1456_v12  ;;  %v706_v24 = vpop.permute.xlu1 %705 }
 0x14c   : > { %1701 = vadd.xlane.f32.xlu1 %v1700_v33  ;;  %v1157_v6 = vpop.f32.mrf.mxu0  ;;  %v1321_v36 = vpop.f32.mrf.mxu1  ;;  %v1458_v49 = vmax.f32 %v1316_v13, 0.0 }
 0x14d   : > { %v1158_v8 = vadd.f32 %v1157_v6, %v2735_v0  ;;  %v1610_v59 = vadd.f32 %v1393_v44, %v1392_v41  ;;  %v1394_v10 = vmax.f32 %v1156_v40, 0.0  ;;  %v1459_v0 = vmax.f32 %v1318_v63, 0.0 }
 0x14e   : > { %1698 = vadd.xlane.f32.xlu0 %v1697_v25  ;;  %v1161_v9 = vpop.f32.mrf.mxu0  ;;  %v1323_v43 = vpop.f32.mrf.mxu1  ;;  %v1322_v20 = vadd.f32 %v1321_v36, %v701_v15 }
 0x14f   : > { %v1395_v11 = vmax.f32 %v1158_v8, 0.0  ;;  %v1162_v56 = vadd.f32 %v1161_v9, %v2737_v1  ;;  %v1324_v53 = vadd.f32 %v1323_v43, %v701_v15  ;;  %v1709_v25 = vadd.f32 %v1459_v0, %v1458_v49  ;;  %v711_v47 = vpop.permute.xlu0 %710  ;;  %v716_v6 = vpop.permute.xlu1 %715  ;;  %v1501_v0 = vld [vmem:[#allocation2 + $0x108] sm:$0xff]  ;;  %v1470_v49 = vld [vmem:[#allocation2 + $0x10] sm:$0xff] }
 0x150   : > { %1611 = vadd.xlane.f32.xlu1 %v1610_v59  ;;  %v1163_v14 = vpop.f32.mrf.mxu0  ;;  %v1325_v18 = vpop.f32.mrf.mxu1  ;;  %v1460_v29 = vmax.f32 %v1322_v20, 0.0 }
 0x151   : > { %v1613_v16 = vadd.f32 %v1395_v11, %v1394_v10  ;;  %v1164_v17 = vadd.f32 %v1163_v14, %v2737_v1  ;;  %v1396_v48 = vmax.f32 %v1162_v56, 0.0  ;;  %v1461_v42 = vmax.f32 %v1324_v53, 0.0  ;;  %v1500_v56 = vld [vmem:[#allocation2 + $0x100] sm:$0xff] }
 0x152   : > { %1608 = vadd.xlane.f32.xlu0 %v1607_v32  ;;  %v1165_v2 = vpop.f32.mrf.mxu0  ;;  %v1327_v23 = vpop.f32.mrf.mxu1  ;;  %v1326_v30 = vadd.f32 %v1325_v18, %v706_v24 }
 0x153   : > { %v1166_v19 = vadd.f32 %v1165_v2, %v2739_v3  ;;  %v1397_v21 = vmax.f32 %v1164_v17, 0.0  ;;  %v1328_v1 = vadd.f32 %v1327_v23, %v706_v24  ;;  %v1712_v32 = vadd.f32 %v1461_v42, %v1460_v29 }
 0x154   : > { %1707 = vadd.xlane.f32.xlu1 %v1706_v60  ;;  %v1167_v22 = vpop.f32.mrf.mxu0  ;;  %v1331_v27 = vpop.f32.mrf.mxu1  ;;  %v1462_v38 = vmax.f32 %v1326_v30, 0.0  ;;  %v1469_v60 = vld [vmem:[#allocation2 + $0x8] sm:$0xff] }
 0x155   : > { %v1168_v57 = vadd.f32 %v1167_v22, %v2739_v3  ;;  %v1616_v26 = vadd.f32 %v1397_v21, %v1396_v48  ;;  %v1398_v28 = vmax.f32 %v1166_v19, 0.0  ;;  %v1463_v3 = vmax.f32 %v1328_v1, 0.0  ;;  %v1502_v19 = vld [vmem:[#allocation2 + $0x110] sm:$0xff] }
 0x156   : > { %1704 = vadd.xlane.f32.xlu0 %v1703_v45  ;;  %v1171_v61 = vpop.f32.mrf.mxu0  ;;  %v1333_v31 = vpop.f32.mrf.mxu1  ;;  %v1332_v39 = vadd.f32 %v1331_v27, %v711_v47 }
 0x157   : > { %v1399_v54 = vmax.f32 %v1168_v57, 0.0  ;;  %v1172_v46 = vadd.f32 %v1171_v61, %v2741_v4  ;;  %v1334_v62 = vadd.f32 %v1333_v31, %v711_v47  ;;  %v1715_v52 = vadd.f32 %v1463_v3, %v1462_v38  ;;  %v1471_v57 = vld [vmem:[#allocation2 + $0x18] sm:$0xff]  ;;  %v1472_v61 = vld [vmem:[#allocation2 + $0x20] sm:$0xff] }
 0x158   : > { %1617 = vadd.xlane.f32.xlu1 %v1616_v26  ;;  %v1173_v51 = vpop.f32.mrf.mxu0  ;;  %v1335_v35 = vpop.f32.mrf.mxu1  ;;  %v1464_v63 = vmax.f32 %v1332_v39, 0.0 }
 0x159   : > { %v1619_v58 = vadd.f32 %v1399_v54, %v1398_v28  ;;  %v1174_v33 = vadd.f32 %v1173_v51, %v2741_v4  ;;  %v1400_v40 = vmax.f32 %v1172_v46, 0.0  ;;  %v1465_v45 = vmax.f32 %v1334_v62, 0.0  ;;  %v1503_v54 = vld [vmem:[#allocation2 + $0x118] sm:$0xff] }
 0x15a   : > { %1614 = vadd.xlane.f32.xlu0 %v1613_v16  ;;  %v1175_v34 = vpop.f32.mrf.mxu0  ;;  %v1337_v44 = vpop.f32.mrf.mxu1  ;;  %v1336_v9 = vadd.f32 %v1335_v35, %v716_v6 }
 0x15b   : > { %v1176_v37 = vadd.f32 %v1175_v34, %v2743_v5  ;;  %v1401_v41 = vmax.f32 %v1174_v33, 0.0  ;;  %v1338_v4 = vadd.f32 %v1337_v44, %v716_v6  ;;  %v1718_v10 = vadd.f32 %v1465_v45, %v1464_v63  ;;  %v1473_v33 = vld [vmem:[#allocation2 + $0x28] sm:$0xff]  ;;  %v1506_v45 = vld [vmem:[#allocation2 + $0x130] sm:$0xff] }
 0x15c   : > { %1713 = vadd.xlane.f32.xlu1 %v1712_v32  ;;  %v1177_v55 = vpop.f32.mrf.mxu0  ;;  %v1466_v12 = vmax.f32 %v1336_v9, 0.0 }
 0x15d   : > { %v1178_v7 = vadd.f32 %v1177_v55, %v2743_v5  ;;  %v1622_v8 = vadd.f32 %v1401_v41, %v1400_v40  ;;  %v1402_v59 = vmax.f32 %v1176_v37, 0.0  ;;  %v1467_v11 = vmax.f32 %v1338_v4, 0.0  ;;  %v1468_v5 = vld [vmem:[#allocation2] sm:$0xff]  ;;  %v1474_v41 = vld [vmem:[#allocation2 + $0x30] sm:$0xff]  ;;  %v1505_v55 = vld [vmem:[#allocation2 + $0x128] sm:$0xff] }
 0x15e   : > { %1710 = vadd.xlane.f32.xlu0 %v1709_v25 }
 0x15f   : > { %v1403_v50 = vmax.f32 %v1178_v7, 0.0  ;;  %v1721_v13 = vadd.f32 %v1467_v11, %v1466_v12 }
 0x160   : > { %1623 = vadd.xlane.f32.xlu1 %v1622_v8 }
 0x161   : > { %v1625_v36 = vadd.f32 %v1403_v50, %v1402_v59  ;;  %v1475_v50 = vld [vmem:[#allocation2 + $0x38] sm:$0xff] }
 0x162   : > { %1620 = vadd.xlane.f32.xlu0 %v1619_v58  ;;  %v1504_v58 = vld [vmem:[#allocation2 + $0x120] sm:$0xff] }
 0x164   : > { %1719 = vadd.xlane.f32.xlu1 %v1718_v10 }
 0x166   : > { %1716 = vadd.xlane.f32.xlu0 %v1715_v52 }
 0x169   : > { %v1630_v14 = vpop.xlane.xlu1 %1629  ;;  %v1534_v43 = vpop.xlane.xlu0 %1533 }
 0x16a   : > { %1626 = vadd.xlane.f32.xlu0 %v1625_v36  ;;  %v1756_v15 = vadd.f32 %v1630_v14, %v1500_v56  ;;  %v1724_v16 = vadd.f32 %v1534_v43, %v1468_v5  ;;  %v1507_v14 = vld [vmem:[#allocation2 + $0x138] sm:$0xff] }
 0x16c   : > { %1821 = vst.msk [vmem:[#allocation2 + $0x100] sm:$0xff] %vm204_vm2, %v1756_v15  ;;  %1789 = vst.msk [vmem:[#allocation2] sm:$0xff] %vm204_vm2, %v1724_v16 }
 0x16d   : > { %v1537_v17 = vpop.xlane.xlu1 %1536 }
 0x16e   : > { %1722 = vadd.xlane.f32.xlu0 %v1721_v13  ;;  %v1633_v53 = vpop.xlane.xlu0 %1632  ;;  %v1725_v2 = vadd.f32 %v1537_v17, %v1469_v60  ;;  %v1476_v13 = vld [vmem:[#allocation2 + $0x40] sm:$0xff] }
 0x16f   : > { %v1757_v18 = vadd.f32 %v1633_v53, %v1501_v0  ;;  %v1508_v53 = vld [vmem:[#allocation2 + $0x140] sm:$0xff] }
 0x170   : > { %1790 = vst.msk [vmem:[#allocation2 + $0x8] sm:$0xff] %vm204_vm2, %v1725_v2 }
 0x171   : > { %1822 = vst.msk [vmem:[#allocation2 + $0x108] sm:$0xff] %vm204_vm2, %v1757_v18  ;;  %v1636_v48 = vpop.xlane.xlu1 %1635 }
 0x172   : > { %v1540_v20 = vpop.xlane.xlu0 %1539  ;;  %v1758_v21 = vadd.f32 %v1636_v48, %v1502_v19  ;;  %v1477_v19 = vld [vmem:[#allocation2 + $0x48] sm:$0xff] }
 0x173   : > { %v1726_v22 = vadd.f32 %v1540_v20, %v1470_v49  ;;  %v1888_v23 = vld [vmem:[#allocation2 + $0x100] sm:$0xff] }
 0x174   : > { %v1856_v24 = vld [vmem:[#allocation2] sm:$0xff]  ;;  %v1952_v25 = vmul.f32 0.00390625, %v1888_v23  ;;  %1823 = vst.msk [vmem:[#allocation2 + $0x110] sm:$0xff] %vm204_vm2, %v1758_v21 }
 0x175   : > { %v1920_v26 = vmul.f32 0.00390625, %v1856_v24  ;;  %1791 = vst.msk [vmem:[#allocation2 + $0x10] sm:$0xff] %vm204_vm2, %v1726_v22  ;;  %v1478_v24 = vld [vmem:[#allocation2 + $0x50] sm:$0xff] }
 0x176   : > { %v1543_v42 = vpop.xlane.xlu0 %1542  ;;  %2016 = vst.msk [vmem:[%s2973_s4 + $0x100] sm:$0xff] %vm204_vm2, %v1952_v25 }
 0x177   : > { %1984 = vst.msk [vmem:[%s2973_s4] sm:$0xff] %vm204_vm2, %v1920_v26  ;;  %v1727_v1 = vadd.f32 %v1543_v42, %v1471_v57  ;;  %v1857_v27 = vld [vmem:[#allocation2 + $0x8] sm:$0xff] }
 0x178   : > { %v1889_v28 = vld [vmem:[#allocation2 + $0x108] sm:$0xff]  ;;  %v1921_v29 = vmul.f32 0.00390625, %v1857_v27 }
 0x179   : > { %v1953_v30 = vmul.f32 0.00390625, %v1889_v28  ;;  %1792 = vst.msk [vmem:[#allocation2 + $0x18] sm:$0xff] %vm204_vm2, %v1727_v1  ;;  %v1546_v46 = vpop.xlane.xlu1 %1545  ;;  %v1509_v26 = vld [vmem:[#allocation2 + $0x148] sm:$0xff] }
 0x17a   : > { %v1639_v51 = vpop.xlane.xlu0 %1638  ;;  %1985 = vst.msk [vmem:[%s2973_s4 + $0x8] sm:$0xff] %vm204_vm2, %v1921_v29  ;;  %v1728_v31 = vadd.f32 %v1546_v46, %v1472_v61  ;;  %v1510_v29 = vld [vmem:[#allocation2 + $0x150] sm:$0xff] }
 0x17b   : > { %2017 = vst.msk [vmem:[%s2973_s4 + $0x108] sm:$0xff] %vm204_vm2, %v1953_v30  ;;  %v1759_v47 = vadd.f32 %v1639_v51, %v1503_v54  ;;  %v1890_v32 = vld [vmem:[#allocation2 + $0x110] sm:$0xff]  ;;  %v1479_v51 = vld [vmem:[#allocation2 + $0x58] sm:$0xff] }
 0x17c   : > { %v1858_v3 = vld [vmem:[#allocation2 + $0x10] sm:$0xff]  ;;  %v1954_v62 = vmul.f32 0.00390625, %v1890_v32  ;;  %1793 = vst.msk [vmem:[#allocation2 + $0x20] sm:$0xff] %vm204_vm2, %v1728_v31 }
 0x17d   : > { %v1922_v34 = vmul.f32 0.00390625, %v1858_v3  ;;  %1824 = vst.msk [vmem:[#allocation2 + $0x118] sm:$0xff] %vm204_vm2, %v1759_v47  ;;  %v1642_v35 = vpop.xlane.xlu1 %1641 }
 0x17e   : > { %2018 = vst.msk [vmem:[%s2973_s4 + $0x110] sm:$0xff] %vm204_vm2, %v1954_v62  ;;  %v1760_v38 = vadd.f32 %v1642_v35, %v1504_v58  ;;  %v1480_v62 = vld [vmem:[#allocation2 + $0x60] sm:$0xff] }
 0x17f   : > { %1986 = vst.msk [vmem:[%s2973_s4 + $0x10] sm:$0xff] %vm204_vm2, %v1922_v34 }
 0x180   : > { %v1859_v39 = vld [vmem:[#allocation2 + $0x18] sm:$0xff]  ;;  %1825 = vst.msk [vmem:[#allocation2 + $0x120] sm:$0xff] %vm204_vm2, %v1760_v38 }
 0x181   : > { %v1923_v44 = vmul.f32 0.00390625, %v1859_v39 }
 0x183   : > { %1987 = vst.msk [vmem:[%s2973_s4 + $0x18] sm:$0xff] %vm204_vm2, %v1923_v44  ;;  %v1860_v4 = vld [vmem:[#allocation2 + $0x20] sm:$0xff] }
 0x184   : > { %v1891_v59 = vld [vmem:[#allocation2 + $0x118] sm:$0xff]  ;;  %v1924_v63 = vmul.f32 0.00390625, %v1860_v4 }
 0x185   : > { %v1955_v9 = vmul.f32 0.00390625, %v1891_v59 }
 0x186   : > { %1988 = vst.msk [vmem:[%s2973_s4 + $0x20] sm:$0xff] %vm204_vm2, %v1924_v63 }
 0x187   : > { %2019 = vst.msk [vmem:[%s2973_s4 + $0x118] sm:$0xff] %vm204_vm2, %v1955_v9  ;;  %v1892_v56 = vld [vmem:[#allocation2 + $0x120] sm:$0xff] }
 0x188   : > { %v1956_v43 = vmul.f32 0.00390625, %v1892_v56 }
 0x189   : > { %v1552_v6 = vpop.xlane.xlu1 %1551 }
 0x18a   : > { %v1730_v52 = vadd.f32 %v1552_v6, %v1474_v41  ;;  %2020 = vst.msk [vmem:[%s2973_s4 + $0x120] sm:$0xff] %vm204_vm2, %v1956_v43  ;;  %v1512_v6 = vld [vmem:[#allocation2 + $0x160] sm:$0xff] }
 0x18b   : > { %v1549_v37 = vpop.xlane.xlu0 %1548 }
 0x18c   : > { %v1729_v40 = vadd.f32 %v1549_v37, %v1473_v33  ;;  %1795 = vst.msk [vmem:[#allocation2 + $0x30] sm:$0xff] %vm204_vm2, %v1730_v52  ;;  %v1511_v37 = vld [vmem:[#allocation2 + $0x158] sm:$0xff] }
 0x18d   : > { %v1648_v36 = vpop.xlane.xlu1 %1647 }
 0x18e   : > { %1794 = vst.msk [vmem:[#allocation2 + $0x28] sm:$0xff] %vm204_vm2, %v1729_v40  ;;  %v1762_v11 = vadd.f32 %v1648_v36, %v1506_v45  ;;  %v1482_v36 = vld [vmem:[#allocation2 + $0x70] sm:$0xff] }
 0x18f   : > { %v1645_v7 = vpop.xlane.xlu0 %1644 }
 0x190   : > { %v1761_v8 = vadd.f32 %v1645_v7, %v1505_v55  ;;  %1827 = vst.msk [vmem:[#allocation2 + $0x130] sm:$0xff] %vm204_vm2, %v1762_v11 }
 0x191   : > { %v1558_v16 = vpop.xlane.xlu1 %1557 }
 0x192   : > { %1826 = vst.msk [vmem:[#allocation2 + $0x128] sm:$0xff] %vm204_vm2, %v1761_v8  ;;  %v1732_v0 = vadd.f32 %v1558_v16, %v1476_v13  ;;  %v1481_v8 = vld [vmem:[#allocation2 + $0x68] sm:$0xff]  ;;  %v1514_v16 = vld [vmem:[#allocation2 + $0x170] sm:$0xff] }
 0x193   : > { %v1555_v10 = vpop.xlane.xlu0 %1554  ;;  %v1862_v2 = vld [vmem:[#allocation2 + $0x30] sm:$0xff] }
 0x194   : > { %v1731_v12 = vadd.f32 %v1555_v10, %v1475_v50  ;;  %v1926_v49 = vmul.f32 0.00390625, %v1862_v2  ;;  %1797 = vst.msk [vmem:[#allocation2 + $0x40] sm:$0xff] %vm204_vm2, %v1732_v0 }
 0x195   : > { %v1861_v5 = vld [vmem:[#allocation2 + $0x28] sm:$0xff]  ;;  %v1654_v20 = vpop.xlane.xlu1 %1653 }
 0x196   : > { %v1925_v15 = vmul.f32 0.00390625, %v1861_v5  ;;  %1796 = vst.msk [vmem:[#allocation2 + $0x38] sm:$0xff] %vm204_vm2, %v1731_v12  ;;  %1990 = vst.msk [vmem:[%s2973_s4 + $0x30] sm:$0xff] %vm204_vm2, %v1926_v49  ;;  %v1764_v22 = vadd.f32 %v1654_v20, %v1508_v53  ;;  %v1513_v12 = vld [vmem:[#allocation2 + $0x168] sm:$0xff]  ;;  %v1484_v20 = vld [vmem:[#allocation2 + $0x80] sm:$0xff] }
 0x197   : > { %v1651_v60 = vpop.xlane.xlu0 %1650  ;;  %v1894_v57 = vld [vmem:[#allocation2 + $0x130] sm:$0xff] }
 0x198   : > { %1989 = vst.msk [vmem:[%s2973_s4 + $0x28] sm:$0xff] %vm204_vm2, %v1925_v15  ;;  %v1763_v17 = vadd.f32 %v1651_v60, %v1507_v14  ;;  %v1958_v42 = vmul.f32 0.00390625, %v1894_v57  ;;  %1829 = vst.msk [vmem:[#allocation2 + $0x140] sm:$0xff] %vm204_vm2, %v1764_v22 }
 0x199   : > { %v1893_v18 = vld [vmem:[#allocation2 + $0x128] sm:$0xff]  ;;  %v1564_v61 = vpop.xlane.xlu1 %1563 }
 0x19a   : > { %v1957_v48 = vmul.f32 0.00390625, %v1893_v18  ;;  %1828 = vst.msk [vmem:[#allocation2 + $0x138] sm:$0xff] %vm204_vm2, %v1763_v17  ;;  %2022 = vst.msk [vmem:[%s2973_s4 + $0x130] sm:$0xff] %vm204_vm2, %v1958_v42  ;;  %v1734_v28 = vadd.f32 %v1564_v61, %v1478_v24  ;;  %v1483_v17 = vld [vmem:[#allocation2 + $0x78] sm:$0xff]  ;;  %v1516_v61 = vld [vmem:[#allocation2 + $0x180] sm:$0xff] }
 0x19b   : > { %v1561_v21 = vpop.xlane.xlu0 %1560  ;;  %v1864_v30 = vld [vmem:[#allocation2 + $0x40] sm:$0xff] }
 0x19c   : > { %2021 = vst.msk [vmem:[%s2973_s4 + $0x128] sm:$0xff] %vm204_vm2, %v1957_v48  ;;  %v1733_v23 = vadd.f32 %v1561_v21, %v1477_v19  ;;  %v1928_v31 = vmul.f32 0.00390625, %v1864_v30  ;;  %1799 = vst.msk [vmem:[#allocation2 + $0x50] sm:$0xff] %vm204_vm2, %v1734_v28 }
 0x19d   : > { %v1863_v25 = vld [vmem:[#allocation2 + $0x38] sm:$0xff]  ;;  %v1660_v58 = vpop.xlane.xlu1 %1659 }
 0x19e   : > { %v1927_v1 = vmul.f32 0.00390625, %v1863_v25  ;;  %1798 = vst.msk [vmem:[#allocation2 + $0x48] sm:$0xff] %vm204_vm2, %v1733_v23  ;;  %1992 = vst.msk [vmem:[%s2973_s4 + $0x40] sm:$0xff] %vm204_vm2, %v1928_v31  ;;  %v1766_v3 = vadd.f32 %v1660_v58, %v1510_v29  ;;  %v1515_v23 = vld [vmem:[#allocation2 + $0x178] sm:$0xff]  ;;  %v1486_v58 = vld [vmem:[#allocation2 + $0x90] sm:$0xff] }
 0x19f   : > { %v1657_v27 = vpop.xlane.xlu0 %1656  ;;  %v1896_v34 = vld [vmem:[#allocation2 + $0x140] sm:$0xff] }
 0x1a0   : > { %1991 = vst.msk [vmem:[%s2973_s4 + $0x38] sm:$0xff] %vm204_vm2, %v1927_v1  ;;  %v1765_v54 = vadd.f32 %v1657_v27, %v1509_v26  ;;  %v1960_v38 = vmul.f32 0.00390625, %v1896_v34  ;;  %1831 = vst.msk [vmem:[#allocation2 + $0x150] sm:$0xff] %vm204_vm2, %v1766_v3 }
 0x1a1   : > { %v1895_v46 = vld [vmem:[#allocation2 + $0x138] sm:$0xff]  ;;  %v1570_v39 = vpop.xlane.xlu1 %1569 }
 0x1a2   : > { %v1959_v47 = vmul.f32 0.00390625, %v1895_v46  ;;  %1830 = vst.msk [vmem:[#allocation2 + $0x148] sm:$0xff] %vm204_vm2, %v1765_v54  ;;  %2024 = vst.msk [vmem:[%s2973_s4 + $0x140] sm:$0xff] %vm204_vm2, %v1960_v38  ;;  %v1736_v55 = vadd.f32 %v1570_v39, %v1480_v62  ;;  %v1485_v54 = vld [vmem:[#allocation2 + $0x88] sm:$0xff]  ;;  %v1518_v39 = vld [vmem:[#allocation2 + $0x190] sm:$0xff] }
 0x1a3   : > { %v1567_v32 = vpop.xlane.xlu0 %1566  ;;  %v1866_v7 = vld [vmem:[#allocation2 + $0x50] sm:$0xff] }
 0x1a4   : > { %2023 = vst.msk [vmem:[%s2973_s4 + $0x138] sm:$0xff] %vm204_vm2, %v1959_v47  ;;  %v1735_v33 = vadd.f32 %v1567_v32, %v1479_v51  ;;  %v1930_v45 = vmul.f32 0.00390625, %v1866_v7  ;;  %1801 = vst.msk [vmem:[#allocation2 + $0x60] sm:$0xff] %vm204_vm2, %v1736_v55 }
 0x1a5   : > { %v1865_v35 = vld [vmem:[#allocation2 + $0x48] sm:$0xff]  ;;  %v1666_v59 = vpop.xlane.xlu1 %1665 }
 0x1a6   : > { %v1929_v40 = vmul.f32 0.00390625, %v1865_v35  ;;  %1800 = vst.msk [vmem:[#allocation2 + $0x58] sm:$0xff] %vm204_vm2, %v1735_v33  ;;  %1994 = vst.msk [vmem:[%s2973_s4 + $0x50] sm:$0xff] %vm204_vm2, %v1930_v45  ;;  %v1768_v63 = vadd.f32 %v1666_v59, %v1512_v6  ;;  %v1517_v33 = vld [vmem:[#allocation2 + $0x188] sm:$0xff]  ;;  %v1488_v59 = vld [vmem:[#allocation2 + $0xa0] sm:$0xff] }
 0x1a7   : > { %v1663_v41 = vpop.xlane.xlu0 %1662  ;;  %v1898_v10 = vld [vmem:[#allocation2 + $0x150] sm:$0xff] }
 0x1a8   : > { %1993 = vst.msk [vmem:[%s2973_s4 + $0x48] sm:$0xff] %vm204_vm2, %v1929_v40  ;;  %v1767_v44 = vadd.f32 %v1663_v41, %v1511_v37  ;;  %v1962_v13 = vmul.f32 0.00390625, %v1898_v10  ;;  %1833 = vst.msk [vmem:[#allocation2 + $0x160] sm:$0xff] %vm204_vm2, %v1768_v63 }
 0x1a9   : > { %v1897_v52 = vld [vmem:[#allocation2 + $0x148] sm:$0xff]  ;;  %v1576_v5 = vpop.xlane.xlu1 %1575 }
 0x1aa   : > { %v1961_v4 = vmul.f32 0.00390625, %v1897_v52  ;;  %1832 = vst.msk [vmem:[#allocation2 + $0x158] sm:$0xff] %vm204_vm2, %v1767_v44  ;;  %2026 = vst.msk [vmem:[%s2973_s4 + $0x150] sm:$0xff] %vm204_vm2, %v1962_v13  ;;  %v1738_v43 = vadd.f32 %v1576_v5, %v1482_v36  ;;  %v1487_v44 = vld [vmem:[#allocation2 + $0x98] sm:$0xff]  ;;  %v1520_v5 = vld [vmem:[#allocation2 + $0x1a0] sm:$0xff] }
 0x1ab   : > { %v1573_v50 = vpop.xlane.xlu0 %1572  ;;  %v1868_v60 = vld [vmem:[#allocation2 + $0x60] sm:$0xff] }
 0x1ac   : > { %2025 = vst.msk [vmem:[%s2973_s4 + $0x148] sm:$0xff] %vm204_vm2, %v1961_v4  ;;  %v1737_v9 = vadd.f32 %v1573_v50, %v1481_v8  ;;  %v1932_v53 = vmul.f32 0.00390625, %v1868_v60  ;;  %1803 = vst.msk [vmem:[#allocation2 + $0x70] sm:$0xff] %vm204_vm2, %v1738_v43 }
 0x1ad   : > { %v1867_v11 = vld [vmem:[#allocation2 + $0x58] sm:$0xff]  ;;  %v1672_v18 = vpop.xlane.xlu1 %1671 }
 0x1ae   : > { %v1931_v56 = vmul.f32 0.00390625, %v1867_v11  ;;  %1802 = vst.msk [vmem:[#allocation2 + $0x68] sm:$0xff] %vm204_vm2, %v1737_v9  ;;  %1996 = vst.msk [vmem:[%s2973_s4 + $0x60] sm:$0xff] %vm204_vm2, %v1932_v53  ;;  %v1770_v49 = vadd.f32 %v1672_v18, %v1514_v16  ;;  %v1519_v9 = vld [vmem:[#allocation2 + $0x198] sm:$0xff]  ;;  %v1490_v18 = vld [vmem:[#allocation2 + $0xb0] sm:$0xff] }
 0x1af   : > { %v1669_v14 = vpop.xlane.xlu0 %1668  ;;  %v1900_v21 = vld [vmem:[#allocation2 + $0x160] sm:$0xff] }
 0x1b0   : > { %1995 = vst.msk [vmem:[%s2973_s4 + $0x58] sm:$0xff] %vm204_vm2, %v1931_v56  ;;  %v1769_v15 = vadd.f32 %v1669_v14, %v1513_v12  ;;  %v1964_v24 = vmul.f32 0.00390625, %v1900_v21  ;;  %1835 = vst.msk [vmem:[#allocation2 + $0x170] sm:$0xff] %vm204_vm2, %v1770_v49 }
 0x1b1   : > { %v1899_v0 = vld [vmem:[#allocation2 + $0x158] sm:$0xff]  ;;  %v1582_v25 = vpop.xlane.xlu1 %1581 }
 0x1b2   : > { %v1963_v2 = vmul.f32 0.00390625, %v1899_v0  ;;  %1834 = vst.msk [vmem:[#allocation2 + $0x168] sm:$0xff] %vm204_vm2, %v1769_v15  ;;  %2028 = vst.msk [vmem:[%s2973_s4 + $0x160] sm:$0xff] %vm204_vm2, %v1964_v24  ;;  %v1740_v42 = vadd.f32 %v1582_v25, %v1484_v20  ;;  %v1489_v15 = vld [vmem:[#allocation2 + $0xa8] sm:$0xff]  ;;  %v1522_v25 = vld [vmem:[#allocation2 + $0x1b0] sm:$0xff] }
 0x1b3   : > { %v1579_v19 = vpop.xlane.xlu0 %1578  ;;  %v1870_v27 = vld [vmem:[#allocation2 + $0x70] sm:$0xff] }
 0x1b4   : > { %2027 = vst.msk [vmem:[%s2973_s4 + $0x158] sm:$0xff] %vm204_vm2, %v1963_v2  ;;  %v1739_v48 = vadd.f32 %v1579_v19, %v1483_v17  ;;  %v1934_v29 = vmul.f32 0.00390625, %v1870_v27  ;;  %1805 = vst.msk [vmem:[#allocation2 + $0x80] sm:$0xff] %vm204_vm2, %v1740_v42 }
 0x1b5   : > { %v1869_v22 = vld [vmem:[#allocation2 + $0x68] sm:$0xff]  ;;  %v1678_v46 = vpop.xlane.xlu1 %1677 }
 0x1b6   : > { %v1933_v57 = vmul.f32 0.00390625, %v1869_v22  ;;  %1804 = vst.msk [vmem:[#allocation2 + $0x78] sm:$0xff] %vm204_vm2, %v1739_v48  ;;  %1998 = vst.msk [vmem:[%s2973_s4 + $0x70] sm:$0xff] %vm204_vm2, %v1934_v29  ;;  %v1772_v31 = vadd.f32 %v1678_v46, %v1516_v61  ;;  %v1521_v48 = vld [vmem:[#allocation2 + $0x1a8] sm:$0xff]  ;;  %v1492_v46 = vld [vmem:[#allocation2 + $0xc0] sm:$0xff] }
 0x1b7   : > { %v1675_v26 = vpop.xlane.xlu0 %1674  ;;  %v1902_v32 = vld [vmem:[#allocation2 + $0x170] sm:$0xff] }
 0x1b8   : > { %1997 = vst.msk [vmem:[%s2973_s4 + $0x68] sm:$0xff] %vm204_vm2, %v1933_v57  ;;  %v1771_v1 = vadd.f32 %v1675_v26, %v1515_v23  ;;  %v1966_v62 = vmul.f32 0.00390625, %v1902_v32  ;;  %1837 = vst.msk [vmem:[#allocation2 + $0x180] sm:$0xff] %vm204_vm2, %v1772_v31 }
 0x1b9   : > { %v1901_v28 = vld [vmem:[#allocation2 + $0x168] sm:$0xff]  ;;  %v1588_v35 = vpop.xlane.xlu1 %1587 }
 0x1ba   : > { %v1965_v30 = vmul.f32 0.00390625, %v1901_v28  ;;  %1836 = vst.msk [vmem:[#allocation2 + $0x178] sm:$0xff] %vm204_vm2, %v1771_v1  ;;  %2030 = vst.msk [vmem:[%s2973_s4 + $0x170] sm:$0xff] %vm204_vm2, %v1966_v62  ;;  %v1742_v38 = vadd.f32 %v1588_v35, %v1486_v58  ;;  %v1491_v1 = vld [vmem:[#allocation2 + $0xb8] sm:$0xff]  ;;  %v1524_v35 = vld [vmem:[#allocation2 + $0x1c0] sm:$0xff] }
 0x1bb   : > { %v1585_v51 = vpop.xlane.xlu0 %1584  ;;  %v1872_v41 = vld [vmem:[#allocation2 + $0x80] sm:$0xff] }
 0x1bc   : > { %2029 = vst.msk [vmem:[%s2973_s4 + $0x168] sm:$0xff] %vm204_vm2, %v1965_v30  ;;  %v1741_v47 = vadd.f32 %v1585_v51, %v1485_v54  ;;  %v1936_v6 = vmul.f32 0.00390625, %v1872_v41  ;;  %1807 = vst.msk [vmem:[#allocation2 + $0x90] sm:$0xff] %vm204_vm2, %v1742_v38 }
 0x1bd   : > { %v1871_v3 = vld [vmem:[#allocation2 + $0x78] sm:$0xff]  ;;  %v1684_v52 = vpop.xlane.xlu1 %1683 }
 0x1be   : > { %v1935_v34 = vmul.f32 0.00390625, %v1871_v3  ;;  %1806 = vst.msk [vmem:[#allocation2 + $0x88] sm:$0xff] %vm204_vm2, %v1741_v47  ;;  %2000 = vst.msk [vmem:[%s2973_s4 + $0x80] sm:$0xff] %vm204_vm2, %v1936_v6  ;;  %v1774_v45 = vadd.f32 %v1684_v52, %v1518_v39  ;;  %v1523_v47 = vld [vmem:[#allocation2 + $0x1b8] sm:$0xff]  ;;  %v1494_v52 = vld [vmem:[#allocation2 + $0xd0] sm:$0xff] }
 0x1bf   : > { %v1681_v37 = vpop.xlane.xlu0 %1680  ;;  %v1904_v50 = vld [vmem:[#allocation2 + $0x180] sm:$0xff] }
 0x1c0   : > { %1999 = vst.msk [vmem:[%s2973_s4 + $0x78] sm:$0xff] %vm204_vm2, %v1935_v34  ;;  %v1773_v40 = vadd.f32 %v1681_v37, %v1517_v33  ;;  %v1968_v36 = vmul.f32 0.00390625, %v1904_v50  ;;  %1839 = vst.msk [vmem:[#allocation2 + $0x190] sm:$0xff] %vm204_vm2, %v1774_v45 }
 0x1c1   : > { %v1903_v55 = vld [vmem:[#allocation2 + $0x178] sm:$0xff]  ;;  %v1594_v11 = vpop.xlane.xlu1 %1593 }
 0x1c2   : > { %v1967_v7 = vmul.f32 0.00390625, %v1903_v55  ;;  %1838 = vst.msk [vmem:[#allocation2 + $0x188] sm:$0xff] %vm204_vm2, %v1773_v40  ;;  %2032 = vst.msk [vmem:[%s2973_s4 + $0x180] sm:$0xff] %vm204_vm2, %v1968_v36  ;;  %v1744_v13 = vadd.f32 %v1594_v11, %v1488_v59  ;;  %v1493_v40 = vld [vmem:[#allocation2 + $0xc8] sm:$0xff]  ;;  %v1526_v11 = vld [vmem:[#allocation2 + $0x1d0] sm:$0xff] }
 0x1c3   : > { %v1591_v8 = vpop.xlane.xlu0 %1590  ;;  %v1874_v14 = vld [vmem:[#allocation2 + $0x90] sm:$0xff] }
 0x1c4   : > { %2031 = vst.msk [vmem:[%s2973_s4 + $0x178] sm:$0xff] %vm204_vm2, %v1967_v7  ;;  %v1743_v4 = vadd.f32 %v1591_v8, %v1487_v44  ;;  %v1938_v16 = vmul.f32 0.00390625, %v1874_v14  ;;  %1809 = vst.msk [vmem:[#allocation2 + $0xa0] sm:$0xff] %vm204_vm2, %v1744_v13 }
 0x1c5   : > { %v1873_v63 = vld [vmem:[#allocation2 + $0x88] sm:$0xff]  ;;  %v1690_v0 = vpop.xlane.xlu1 %1689 }
 0x1c6   : > { %v1937_v10 = vmul.f32 0.00390625, %v1873_v63  ;;  %1808 = vst.msk [vmem:[#allocation2 + $0x98] sm:$0xff] %vm204_vm2, %v1743_v4  ;;  %2002 = vst.msk [vmem:[%s2973_s4 + $0x90] sm:$0xff] %vm204_vm2, %v1938_v16  ;;  %v1776_v53 = vadd.f32 %v1690_v0, %v1520_v5  ;;  %v1525_v4 = vld [vmem:[#allocation2 + $0x1c8] sm:$0xff]  ;;  %v1496_v0 = vld [vmem:[#allocation2 + $0xe0] sm:$0xff] }
 0x1c7   : > { %v1687_v12 = vpop.xlane.xlu0 %1686  ;;  %v1906_v19 = vld [vmem:[#allocation2 + $0x190] sm:$0xff] }
 0x1c8   : > { %2001 = vst.msk [vmem:[%s2973_s4 + $0x88] sm:$0xff] %vm204_vm2, %v1937_v10  ;;  %v1775_v56 = vadd.f32 %v1687_v12, %v1519_v9  ;;  %v1970_v20 = vmul.f32 0.00390625, %v1906_v19  ;;  %1841 = vst.msk [vmem:[#allocation2 + $0x1a0] sm:$0xff] %vm204_vm2, %v1776_v53 }
 0x1c9   : > { %v1905_v43 = vld [vmem:[#allocation2 + $0x188] sm:$0xff]  ;;  %v1600_v22 = vpop.xlane.xlu1 %1599 }
 0x1ca   : > { %v1969_v60 = vmul.f32 0.00390625, %v1905_v43  ;;  %1840 = vst.msk [vmem:[#allocation2 + $0x198] sm:$0xff] %vm204_vm2, %v1775_v56  ;;  %2034 = vst.msk [vmem:[%s2973_s4 + $0x190] sm:$0xff] %vm204_vm2, %v1970_v20  ;;  %v1746_v24 = vadd.f32 %v1600_v22, %v1490_v18  ;;  %v1495_v56 = vld [vmem:[#allocation2 + $0xd8] sm:$0xff]  ;;  %v1528_v22 = vld [vmem:[#allocation2 + $0x1e0] sm:$0xff] }
 0x1cb   : > { %v1597_v17 = vpop.xlane.xlu0 %1596  ;;  %v1876_v26 = vld [vmem:[#allocation2 + $0xa0] sm:$0xff] }
 0x1cc   : > { %2033 = vst.msk [vmem:[%s2973_s4 + $0x188] sm:$0xff] %vm204_vm2, %v1969_v60  ;;  %v1745_v2 = vadd.f32 %v1597_v17, %v1489_v15  ;;  %v1940_v61 = vmul.f32 0.00390625, %v1876_v26  ;;  %1811 = vst.msk [vmem:[#allocation2 + $0xb0] sm:$0xff] %vm204_vm2, %v1746_v24 }
 0x1cd   : > { %v1875_v49 = vld [vmem:[#allocation2 + $0x98] sm:$0xff]  ;;  %v1696_v28 = vpop.xlane.xlu1 %1695 }
 0x1ce   : > { %v1939_v21 = vmul.f32 0.00390625, %v1875_v49  ;;  %1810 = vst.msk [vmem:[#allocation2 + $0xa8] sm:$0xff] %vm204_vm2, %v1745_v2  ;;  %2004 = vst.msk [vmem:[%s2973_s4 + $0xa0] sm:$0xff] %vm204_vm2, %v1940_v61  ;;  %v1778_v29 = vadd.f32 %v1696_v28, %v1522_v25  ;;  %v1527_v2 = vld [vmem:[#allocation2 + $0x1d8] sm:$0xff]  ;;  %v1498_v28 = vld [vmem:[#allocation2 + $0xf0] sm:$0xff] }
 0x1cf   : > { %v1693_v23 = vpop.xlane.xlu0 %1692  ;;  %v1908_v51 = vld [vmem:[#allocation2 + $0x1a0] sm:$0xff] }
 0x1d0   : > { %2003 = vst.msk [vmem:[%s2973_s4 + $0x98] sm:$0xff] %vm204_vm2, %v1939_v21  ;;  %v1777_v57 = vadd.f32 %v1693_v23, %v1521_v48  ;;  %v1972_v58 = vmul.f32 0.00390625, %v1908_v51  ;;  %1843 = vst.msk [vmem:[#allocation2 + $0x1b0] sm:$0xff] %vm204_vm2, %v1778_v29 }
 0x1d1   : > { %v1907_v42 = vld [vmem:[#allocation2 + $0x198] sm:$0xff]  ;;  %v1606_v3 = vpop.xlane.xlu1 %1605 }
 0x1d2   : > { %v1971_v27 = vmul.f32 0.00390625, %v1907_v42  ;;  %1842 = vst.msk [vmem:[#allocation2 + $0x1a8] sm:$0xff] %vm204_vm2, %v1777_v57  ;;  %2036 = vst.msk [vmem:[%s2973_s4 + $0x1a0] sm:$0xff] %vm204_vm2, %v1972_v58  ;;  %v1748_v62 = vadd.f32 %v1606_v3, %v1492_v46  ;;  %v1497_v57 = vld [vmem:[#allocation2 + $0xe8] sm:$0xff]  ;;  %v1530_v3 = vld [vmem:[#allocation2 + $0x1f0] sm:$0xff] }
 0x1d3   : > { %v1603_v54 = vpop.xlane.xlu0 %1602  ;;  %v1878_v37 = vld [vmem:[#allocation2 + $0xb0] sm:$0xff] }
 0x1d4   : > { %2035 = vst.msk [vmem:[%s2973_s4 + $0x198] sm:$0xff] %vm204_vm2, %v1971_v27  ;;  %v1747_v30 = vadd.f32 %v1603_v54, %v1491_v1  ;;  %v1942_v39 = vmul.f32 0.00390625, %v1878_v37  ;;  %1813 = vst.msk [vmem:[#allocation2 + $0xc0] sm:$0xff] %vm204_vm2, %v1748_v62 }
 0x1d5   : > { %v1877_v31 = vld [vmem:[#allocation2 + $0xa8] sm:$0xff]  ;;  %v1702_v55 = vpop.xlane.xlu1 %1701 }
 0x1d6   : > { %v1941_v32 = vmul.f32 0.00390625, %v1877_v31  ;;  %1812 = vst.msk [vmem:[#allocation2 + $0xb8] sm:$0xff] %vm204_vm2, %v1747_v30  ;;  %2006 = vst.msk [vmem:[%s2973_s4 + $0xb0] sm:$0xff] %vm204_vm2, %v1942_v39  ;;  %v1780_v6 = vadd.f32 %v1702_v55, %v1524_v35  ;;  %v1529_v30 = vld [vmem:[#allocation2 + $0x1e8] sm:$0xff] }
 0x1d7   : > { %v1699_v33 = vpop.xlane.xlu0 %1698  ;;  %v1910_v8 = vld [vmem:[#allocation2 + $0x1b0] sm:$0xff] }
 0x1d8   : > { %2005 = vst.msk [vmem:[%s2973_s4 + $0xa8] sm:$0xff] %vm204_vm2, %v1941_v32  ;;  %v1779_v34 = vadd.f32 %v1699_v33, %v1523_v47  ;;  %v1974_v59 = vmul.f32 0.00390625, %v1910_v8  ;;  %1845 = vst.msk [vmem:[#allocation2 + $0x1c0] sm:$0xff] %vm204_vm2, %v1780_v6  ;;  %v1531_v6 = vld [vmem:[#allocation2 + $0x1f8] sm:$0xff] }
 0x1d9   : > { %v1909_v38 = vld [vmem:[#allocation2 + $0x1a8] sm:$0xff]  ;;  %v1612_v63 = vpop.xlane.xlu1 %1611 }
 0x1da   : > { %v1973_v41 = vmul.f32 0.00390625, %v1909_v38  ;;  %1844 = vst.msk [vmem:[#allocation2 + $0x1b8] sm:$0xff] %vm204_vm2, %v1779_v34  ;;  %2038 = vst.msk [vmem:[%s2973_s4 + $0x1b0] sm:$0xff] %vm204_vm2, %v1974_v59  ;;  %v1750_v36 = vadd.f32 %v1612_v63, %v1494_v52  ;;  %v1499_v34 = vld [vmem:[#allocation2 + $0xf8] sm:$0xff] }
 0x1db   : > { %v1609_v44 = vpop.xlane.xlu0 %1608  ;;  %v1880_v12 = vld [vmem:[#allocation2 + $0xc0] sm:$0xff] }
 0x1dc   : > { %2037 = vst.msk [vmem:[%s2973_s4 + $0x1a8] sm:$0xff] %vm204_vm2, %v1973_v41  ;;  %v1749_v7 = vadd.f32 %v1609_v44, %v1493_v40  ;;  %v1944_v5 = vmul.f32 0.00390625, %v1880_v12  ;;  %1815 = vst.msk [vmem:[#allocation2 + $0xd0] sm:$0xff] %vm204_vm2, %v1750_v36 }
 0x1dd   : > { %v1879_v45 = vld [vmem:[#allocation2 + $0xb8] sm:$0xff]  ;;  %v1708_v43 = vpop.xlane.xlu1 %1707 }
 0x1de   : > { %v1943_v50 = vmul.f32 0.00390625, %v1879_v45  ;;  %1814 = vst.msk [vmem:[#allocation2 + $0xc8] sm:$0xff] %vm204_vm2, %v1749_v7  ;;  %2008 = vst.msk [vmem:[%s2973_s4 + $0xc0] sm:$0xff] %vm204_vm2, %v1944_v5  ;;  %v1782_v16 = vadd.f32 %v1708_v43, %v1526_v11 }
 0x1df   : > { %v1705_v9 = vpop.xlane.xlu0 %1704  ;;  %v1912_v17 = vld [vmem:[#allocation2 + $0x1c0] sm:$0xff] }
 0x1e0   : > { %2007 = vst.msk [vmem:[%s2973_s4 + $0xb8] sm:$0xff] %vm204_vm2, %v1943_v50  ;;  %v1781_v10 = vadd.f32 %v1705_v9, %v1525_v4  ;;  %v1976_v18 = vmul.f32 0.00390625, %v1912_v17  ;;  %1847 = vst.msk [vmem:[#allocation2 + $0x1d0] sm:$0xff] %vm204_vm2, %v1782_v16 }
 0x1e1   : > { %v1911_v13 = vld [vmem:[#allocation2 + $0x1b8] sm:$0xff]  ;;  %v1618_v49 = vpop.xlane.xlu1 %1617 }
 0x1e2   : > { %v1975_v14 = vmul.f32 0.00390625, %v1911_v13  ;;  %1846 = vst.msk [vmem:[#allocation2 + $0x1c8] sm:$0xff] %vm204_vm2, %v1781_v10  ;;  %2040 = vst.msk [vmem:[%s2973_s4 + $0x1c0] sm:$0xff] %vm204_vm2, %v1976_v18  ;;  %v1752_v20 = vadd.f32 %v1618_v49, %v1496_v0 }
 0x1e3   : > { %v1615_v15 = vpop.xlane.xlu0 %1614  ;;  %v1882_v23 = vld [vmem:[#allocation2 + $0xd0] sm:$0xff] }
 0x1e4   : > { %2039 = vst.msk [vmem:[%s2973_s4 + $0x1b8] sm:$0xff] %vm204_vm2, %v1975_v14  ;;  %v1751_v60 = vadd.f32 %v1615_v15, %v1495_v56  ;;  %v1946_v25 = vmul.f32 0.00390625, %v1882_v23  ;;  %1817 = vst.msk [vmem:[#allocation2 + $0xe0] sm:$0xff] %vm204_vm2, %v1752_v20 }
 0x1e5   : > { %v1881_v53 = vld [vmem:[#allocation2 + $0xc8] sm:$0xff]  ;;  %v1714_v42 = vpop.xlane.xlu1 %1713 }
 0x1e6   : > { %v1945_v19 = vmul.f32 0.00390625, %v1881_v53  ;;  %1816 = vst.msk [vmem:[#allocation2 + $0xd8] sm:$0xff] %vm204_vm2, %v1751_v60  ;;  %2010 = vst.msk [vmem:[%s2973_s4 + $0xd0] sm:$0xff] %vm204_vm2, %v1946_v25  ;;  %v1784_v61 = vadd.f32 %v1714_v42, %v1528_v22 }
 0x1e7   : > { %v1711_v48 = vpop.xlane.xlu0 %1710  ;;  %v1914_v54 = vld [vmem:[#allocation2 + $0x1d0] sm:$0xff] }
 0x1e8   : > { %2009 = vst.msk [vmem:[%s2973_s4 + $0xc8] sm:$0xff] %vm204_vm2, %v1945_v19  ;;  %v1783_v21 = vadd.f32 %v1711_v48, %v1527_v2  ;;  %v1978_v46 = vmul.f32 0.00390625, %v1914_v54  ;;  %1849 = vst.msk [vmem:[#allocation2 + $0x1e0] sm:$0xff] %vm204_vm2, %v1784_v61 }
 0x1e9   : > { %v1913_v24 = vld [vmem:[#allocation2 + $0x1c8] sm:$0xff]  ;;  %v1624_v31 = vpop.xlane.xlu1 %1623 }
 0x1ea   : > { %v1977_v26 = vmul.f32 0.00390625, %v1913_v24  ;;  %1848 = vst.msk [vmem:[#allocation2 + $0x1d8] sm:$0xff] %vm204_vm2, %v1783_v21  ;;  %2042 = vst.msk [vmem:[%s2973_s4 + $0x1d0] sm:$0xff] %vm204_vm2, %v1978_v46  ;;  %v1754_v58 = vadd.f32 %v1624_v31, %v1498_v28 }
 0x1eb   : > { %v1621_v1 = vpop.xlane.xlu0 %1620  ;;  %v1884_v33 = vld [vmem:[#allocation2 + $0xe0] sm:$0xff] }
 0x1ec   : > { %2041 = vst.msk [vmem:[%s2973_s4 + $0x1c8] sm:$0xff] %vm204_vm2, %v1977_v26  ;;  %v1753_v27 = vadd.f32 %v1621_v1, %v1497_v57  ;;  %v1948_v35 = vmul.f32 0.00390625, %v1884_v33  ;;  %1819 = vst.msk [vmem:[#allocation2 + $0xf0] sm:$0xff] %vm204_vm2, %v1754_v58 }
 0x1ed   : > { %v1883_v29 = vld [vmem:[#allocation2 + $0xd8] sm:$0xff]  ;;  %v1720_v38 = vpop.xlane.xlu1 %1719 }
 0x1ee   : > { %v1947_v51 = vmul.f32 0.00390625, %v1883_v29  ;;  %1818 = vst.msk [vmem:[#allocation2 + $0xe8] sm:$0xff] %vm204_vm2, %v1753_v27  ;;  %2012 = vst.msk [vmem:[%s2973_s4 + $0xe0] sm:$0xff] %vm204_vm2, %v1948_v35  ;;  %v1786_v39 = vadd.f32 %v1720_v38, %v1530_v3 }
 0x1ef   : > { %v1717_v47 = vpop.xlane.xlu0 %1716  ;;  %v1916_v55 = vld [vmem:[#allocation2 + $0x1e0] sm:$0xff] }
 0x1f0   : > { %2011 = vst.msk [vmem:[%s2973_s4 + $0xd8] sm:$0xff] %vm204_vm2, %v1947_v51  ;;  %v1785_v32 = vadd.f32 %v1717_v47, %v1529_v30  ;;  %v1980_v7 = vmul.f32 0.00390625, %v1916_v55  ;;  %1851 = vst.msk [vmem:[#allocation2 + $0x1f0] sm:$0xff] %vm204_vm2, %v1786_v39 }
 0x1f1   : > { %v1915_v62 = vld [vmem:[#allocation2 + $0x1d8] sm:$0xff] }
 0x1f2   : > { %v1979_v37 = vmul.f32 0.00390625, %v1915_v62  ;;  %1850 = vst.msk [vmem:[#allocation2 + $0x1e8] sm:$0xff] %vm204_vm2, %v1785_v32  ;;  %2044 = vst.msk [vmem:[%s2973_s4 + $0x1e0] sm:$0xff] %vm204_vm2, %v1980_v7 }
 0x1f3   : > { %v1627_v40 = vpop.xlane.xlu0 %1626  ;;  %v1886_v4 = vld [vmem:[#allocation2 + $0xf0] sm:$0xff] }
 0x1f4   : > { %2043 = vst.msk [vmem:[%s2973_s4 + $0x1d8] sm:$0xff] %vm204_vm2, %v1979_v37  ;;  %v1755_v41 = vadd.f32 %v1627_v40, %v1499_v34  ;;  %v1950_v50 = vmul.f32 0.00390625, %v1886_v4 }
 0x1f5   : > { %v1885_v44 = vld [vmem:[#allocation2 + $0xe8] sm:$0xff] }
 0x1f6   : > { %v1949_v52 = vmul.f32 0.00390625, %v1885_v44  ;;  %1820 = vst.msk [vmem:[#allocation2 + $0xf8] sm:$0xff] %vm204_vm2, %v1755_v41  ;;  %2014 = vst.msk [vmem:[%s2973_s4 + $0xf0] sm:$0xff] %vm204_vm2, %v1950_v50 }
 0x1f7   : > { %v1723_v8 = vpop.xlane.xlu0 %1722  ;;  %v1918_v9 = vld [vmem:[#allocation2 + $0x1f0] sm:$0xff] }
 0x1f8   : > { %2013 = vst.msk [vmem:[%s2973_s4 + $0xe8] sm:$0xff] %vm204_vm2, %v1949_v52  ;;  %v1787_v45 = vadd.f32 %v1723_v8, %v1531_v6  ;;  %v1982_v10 = vmul.f32 0.00390625, %v1918_v9 }
 0x1f9   : > { %v1917_v59 = vld [vmem:[#allocation2 + $0x1e8] sm:$0xff] }
 0x1fa   : > { %v1981_v63 = vmul.f32 0.00390625, %v1917_v59  ;;  %1852 = vst.msk [vmem:[#allocation2 + $0x1f8] sm:$0xff] %vm204_vm2, %v1787_v45  ;;  %2046 = vst.msk [vmem:[%s2973_s4 + $0x1f0] sm:$0xff] %vm204_vm2, %v1982_v10 }
 0x1fc   : > { %2045 = vst.msk [vmem:[%s2973_s4 + $0x1e8] sm:$0xff] %vm204_vm2, %v1981_v63 }
 0x1fd   : > { %v1887_v36 = vld [vmem:[#allocation2 + $0xf8] sm:$0xff] }
 0x1fe   : > { %v1951_v11 = vmul.f32 0.00390625, %v1887_v36 }
 0x200   : > { %2015 = vst.msk [vmem:[%s2973_s4 + $0xf8] sm:$0xff] %vm204_vm2, %v1951_v11 }
 0x201   : > { %v1919_v12 = vld [vmem:[#allocation2 + $0x1f8] sm:$0xff] }
 0x202   : > { %v1983_v13 = vmul.f32 0.00390625, %v1919_v12 }
 0x204   : > { %2047 = vst.msk [vmem:[%s2973_s4 + $0x1f8] sm:$0xff] %vm204_vm2, %v1983_v13 }
 0x205 PF: > { %s13_s14 = sadd.s32 1, %s2283_s14   ;;  %s3176_s12 = smov %s2279_s13 }
 0x206   : > { %p10_p5 = scmp.ge.s32.totalorder %s13_s14, 4   ;;  %s3177_s13 = smov %s3179_s15 }
 0x208   :  { %12 = sbr.rel (!%p10_p5) target bundleno = 2 (0x2), region = 70 }

// kernel: brain_age_forward.3
= control target key start
LH: loop header
LB: loop body
LE: loop exit
PB: predicated region body
PF: predicated region fallthrough
CT: control target
= control target key end

     0   :  { %s3825_s12 = smov 0   ;;  %s3827_s13 = smov 0   ;;  %s6036_s0 = inlined_call_operand.vmem [shape: bf16[2,3,6,64], index: 0, kind: input, shape index: {}]   ;;  %s6037_s1 = inlined_call_operand.vmem [shape: bf16[512,6], index: 1, kind: input, shape index: {}]   ;;  %s6038_s2 = inlined_call_operand.vmem [shape: f32[512,1], index: 2, kind: input, shape index: {}]   ;;  %s6039_s3 = inlined_call_operand.vmem [shape: f32[2,512,1], index: 3, kind: output, shape index: {}]  }
   0x1   :  { %s3829_s14 = smov 0  }
   0x2 LB: > { %s25_s15 = sadd.s32 1, %s3797_s13  ;;  %p3278_p0 = scmp.ge.s32.totalorder %s3801_s14, 1  ;;  %s3801_s14 = sphi %s3829_s14, %s13_s14   ;;  %s3797_s13 = sphi %s3827_s13, %s6450_s13   ;;  %s3793_s12 = sphi %s3825_s12, %s6449_s12  }
   0x3   : > { %p27_p1 = scmp.ge.s32.totalorder %s25_s15, 2  ;;  %p156_p2 = scmp.lt.s32.totalorder %s3801_s14, 3 }
   0x5   : > { %s6452_s15 = smov (%p27_p1, %s25_s15), 0  ;;  %p157_p3 = pnand %p3278_p0, %p156_p2 }
   0x7   : > { %160 = sbr.rel (%p157_p3) target bundleno = 773 (0x305), region = 32 }
   0xc   : > { %v335_v0 = vld [vmem:[%s6038_s2 + $0x10] sm:$0xff]  ;;  %v333_v1 = vld [vmem:[%s6038_s2] sm:$0xff]  ;;  %p185_p4 = scmp.lt.s32.totalorder %s3793_s12, 1  ;;  %v3803_v2 = vmov 0   ;;  %v336_v3 = vld [vmem:[%s6038_s2 + $0x18] sm:$0xff]  ;;  %vm878_vm0 = vcmask 48128  }
   0xd   : > { %3746 = vset.pattern.permute.xlu1 %v3803_v2  ;;  %3745 = vset.pattern.permute.xlu0 %v3803_v2  ;;  %v334_v4 = vld [vmem:[%s6038_s2 + $0x8] sm:$0xff]  ;;  %v3860_v5 = vld [vmem:[%s6037_s1] sm:$0xff]   ;;  %vm975_vm1 = vcmask 1042432   ;;  %v3900_v13 = vld [vmem:[%s6037_s1 + $0x10] sm:$0xff]   ;;  %vm1332_vm2 = vcmask 523264   ;;  %vm204_vm3 = vcmask 7168  }
   0xe   : > { %410 = vperm.xlu1 %3746, %v335_v0   ;;  %400 = vperm.xlu0 %3745, %v333_v1   ;;  %s6454_s12 = smov (!%p185_p4, %s3793_s12), 1  ;;  %v3865_v6 = vld [vmem:[%s6037_s1 + $0x80] sm:$0xff]   ;;  %v338_v7 = vld [vmem:[%s6038_s2 + $0x28] sm:$0xff]  ;;  %v3905_v14 = vld [vmem:[%s6037_s1 + $0x90] sm:$0xff]  }
   0xf   : > { %s3718_s28 = smul.u32 12, %s6454_s12  ;;  %3516 = vmatprep.mubr.msk.bf16.mxu0 %vm878_vm0, %v3860_v5  ;;  %3548 = vmatprep.mubr.msk.bf16.mxu1 %vm878_vm0, %v3865_v6  ;;  %v337_v8 = vld [vmem:[%s6038_s2 + $0x20] sm:$0xff]  ;;  %v3887_v10 = vld [vmem:[%s6037_s1 + $0x8] sm:$0xff]   ;;  %v340_v15 = vld [vmem:[%s6038_s2 + $0x38] sm:$0xff]  ;;  %s3414_s30 = sshll.u32 %s6454_s12, 9 }
  0x10   : > { %v3892_v11 = vld [vmem:[%s6037_s1 + $0x88] sm:$0xff]   ;;  %v339_v16 = vld [vmem:[%s6038_s2 + $0x30] sm:$0xff]  ;;  %v341_v18 = vld [vmem:[%s6038_s2 + $0x40] sm:$0xff]  ;;  %s5719_s7 = scalar_lea.vmem %s6039_s3, %s3414_s30 }
  0x11   : > { %s3875_s4 = scalar_lea.vmem %s6036_s0, %s3718_s28  ;;  %v342_v17 = vld [vmem:[%s6038_s2 + $0x48] sm:$0xff]  ;;  %v3930_v19 = vld [vmem:[%s6037_s1 + $0x18] sm:$0xff]   ;;  %v3940_v21 = vld [vmem:[%s6037_s1 + $0x20] sm:$0xff]  }
  0x12   : > { %415 = vperm.xlu1 %3746, %v336_v3   ;;  %405 = vperm.xlu0 %3745, %v334_v4   ;;  %v397_v9 = vld [vmem:[%s3875_s4] sm:$0x7]  ;;  %v3935_v20 = vld [vmem:[%s6037_s1 + $0x98] sm:$0xff]   ;;  %v343_v24 = vld [vmem:[%s6038_s2 + $0x50] sm:$0xff] }
  0x13   : > { %3714 = vmatprep.subr.msk.bf16.mxu0 %vm975_vm1, %v397_v9  ;;  %3715 = vmatprep.subr.msk.bf16.mxu1 %vm975_vm1, %v397_v9  ;;  %v977_v12 = vsel %vm975_vm1, %v397_v9, 0  ;;  %v3945_v22 = vld [vmem:[%s6037_s1 + $0xa0] sm:$0xff]   ;;  %v344_v23 = vld [vmem:[%s6038_s2 + $0x58] sm:$0xff]  ;;  %v346_v25 = vld [vmem:[%s6038_s2 + $0x68] sm:$0xff] }
  0x14   : > { %3515 = vmatpush3.bf16.msra.mxu0 %v977_v12  ;;  %3713 = vmatpush3.bf16.msra.mxu1 %v977_v12  ;;  %v345_v26 = vld [vmem:[%s6038_s2 + $0x60] sm:$0xff]  ;;  %v3970_v27 = vld [vmem:[%s6037_s1 + $0x28] sm:$0xff]   ;;  %v3980_v29 = vld [vmem:[%s6037_s1 + $0x30] sm:$0xff]  }
  0x15   : > { %v3975_v28 = vld [vmem:[%s6037_s1 + $0xa8] sm:$0xff]   ;;  %v3985_v30 = vld [vmem:[%s6037_s1 + $0xb0] sm:$0xff]   ;;  %v348_v31 = vld [vmem:[%s6038_s2 + $0x78] sm:$0xff] }
  0x16   : > { %425 = vperm.xlu1 %3746, %v338_v7   ;;  %420 = vperm.xlu0 %3745, %v337_v8   ;;  %v347_v32 = vld [vmem:[%s6038_s2 + $0x70] sm:$0xff]  ;;  %v350_v33 = vld [vmem:[%s6038_s2 + $0x88] sm:$0xff]  ;;  %v349_v34 = vld [vmem:[%s6038_s2 + $0x80] sm:$0xff] }
  0x17   : > { %3517 = vmatmul.mubr.msk.bf16.vlgmr.msra.gmra.mxu0 %vm878_vm0, %v3887_v10  ;;  %3549 = vmatmul.mubr.msk.bf16.vlgmr.msra.gmra.mxu1 %vm878_vm0, %v3892_v11  ;;  %v4010_v35 = vld [vmem:[%s6037_s1 + $0x38] sm:$0xff]   ;;  %v4020_v37 = vld [vmem:[%s6037_s1 + $0x40] sm:$0xff]   ;;  %v351_v40 = vld [vmem:[%s6038_s2 + $0x90] sm:$0xff] }
  0x18   : > { %3520 = vmatprep.mubr.msk.bf16.mxu0 %vm878_vm0, %v3900_v13  ;;  %3552 = vmatprep.mubr.msk.bf16.mxu1 %vm878_vm0, %v3905_v14  ;;  %v4015_v36 = vld [vmem:[%s6037_s1 + $0xb8] sm:$0xff]   ;;  %v4025_v38 = vld [vmem:[%s6037_s1 + $0xc0] sm:$0xff]   ;;  %v354_v41 = vld [vmem:[%s6038_s2 + $0xa8] sm:$0xff] }
  0x19   : > { %v352_v39 = vld [vmem:[%s6038_s2 + $0x98] sm:$0xff]  ;;  %v353_v42 = vld [vmem:[%s6038_s2 + $0xa0] sm:$0xff]  ;;  %v4050_v43 = vld [vmem:[%s6037_s1 + $0x48] sm:$0xff]  }
  0x1a   : > { %435 = vperm.xlu1 %3746, %v340_v15   ;;  %430 = vperm.xlu0 %3745, %v339_v16   ;;  %v4055_v44 = vld [vmem:[%s6037_s1 + $0xc8] sm:$0xff]   ;;  %v4060_v45 = vld [vmem:[%s6037_s1 + $0x50] sm:$0xff]   ;;  %v356_v47 = vld [vmem:[%s6038_s2 + $0xb8] sm:$0xff] }
  0x1b   : > { %v4065_v46 = vld [vmem:[%s6037_s1 + $0xd0] sm:$0xff]   ;;  %v3346_v49 = vld [vmem:[%s3875_s4 + $0x4] sm:$0x7]  ;;  %v3379_v50 = vld [vmem:[%s3875_s4 + $0x8] sm:$0x7] }
  0x1c   : > { %v355_v48 = vld [vmem:[%s6038_s2 + $0xb0] sm:$0xff]  ;;  %v1592_v51 = vsel %vm975_vm1, %v3346_v49, 0  ;;  %v2206_v52 = vsel %vm975_vm1, %v3379_v50, 0  ;;  %v358_v53 = vld [vmem:[%s6038_s2 + $0xc8] sm:$0xff]  ;;  %v357_v54 = vld [vmem:[%s6038_s2 + $0xc0] sm:$0xff]  ;;  %3716 = vmatprep.subr.msk.bf16.mxu1 %vm975_vm1, %v3346_v49  ;;  %3717 = vmatprep.subr.msk.bf16.mxu0 %vm975_vm1, %v3379_v50 }
  0x1d   : > { %v4096_v55 = vld [vmem:[%s6037_s1 + $0x58] sm:$0xff]   ;;  %3581 = vmatpush3.bf16.msra.mxu1 %v1592_v51  ;;  %3647 = vmatpush3.bf16.msra.mxu0 %v2206_v52  ;;  %v4106_v57 = vld [vmem:[%s6037_s1 + $0x60] sm:$0xff]   ;;  %v359_v60 = vld [vmem:[%s6038_s2 + $0xd0] sm:$0xff] }
  0x1e   : > { %445 = vperm.xlu1 %3746, %v342_v17   ;;  %440 = vperm.xlu0 %3745, %v341_v18   ;;  %v4101_v56 = vld [vmem:[%s6037_s1 + $0xd8] sm:$0xff]   ;;  %v4111_v58 = vld [vmem:[%s6037_s1 + $0xe0] sm:$0xff]   ;;  %v362_v61 = vld [vmem:[%s6038_s2 + $0xe8] sm:$0xff] }
  0x1f   : > { %3521 = vmatmul.mubr.msk.bf16.gmra.mxu0 %vm878_vm0, %v3930_v19  ;;  %3553 = vmatmul.mubr.msk.bf16.gmra.mxu1 %vm878_vm0, %v3935_v20  ;;  %v360_v59 = vld [vmem:[%s6038_s2 + $0xd8] sm:$0xff]  ;;  %v361_v62 = vld [vmem:[%s6038_s2 + $0xe0] sm:$0xff]  ;;  %v4136_v63 = vld [vmem:[%s6037_s1 + $0x68] sm:$0xff]  }
  0x20   : > { %3524 = vmatprep.mubr.msk.bf16.mxu0 %vm878_vm0, %v3940_v21  ;;  %3556 = vmatprep.mubr.msk.bf16.mxu1 %vm878_vm0, %v3945_v22  ;;  %v4141_v0 = vld [vmem:[%s6037_s1 + $0xe8] sm:$0xff]   ;;  %v4146_v1 = vld [vmem:[%s6037_s1 + $0x70] sm:$0xff]   ;;  %v364_v3 = vld [vmem:[%s6038_s2 + $0xf8] sm:$0xff] }
  0x21   : > { %v4151_v2 = vld [vmem:[%s6037_s1 + $0xf0] sm:$0xff]   ;;  %v366_v7 = vld [vmem:[%s6038_s2 + $0x108] sm:$0xff]  ;;  %v365_v8 = vld [vmem:[%s6038_s2 + $0x100] sm:$0xff] }
  0x22   : > { %455 = vperm.xlu1 %3746, %v344_v23   ;;  %450 = vperm.xlu0 %3745, %v343_v24   ;;  %v363_v4 = vld [vmem:[%s6038_s2 + $0xf0] sm:$0xff]  ;;  %v4176_v9 = vld [vmem:[%s6037_s1 + $0x78] sm:$0xff]   ;;  %v370_v17 = vld [vmem:[%s6038_s2 + $0x128] sm:$0xff] }
  0x23   : > { %v4181_v12 = vld [vmem:[%s6037_s1 + $0xf8] sm:$0xff]   ;;  %v367_v16 = vld [vmem:[%s6038_s2 + $0x110] sm:$0xff]  ;;  %v369_v18 = vld [vmem:[%s6038_s2 + $0x120] sm:$0xff] }
  0x24   : > { %v368_v15 = vld [vmem:[%s6038_s2 + $0x118] sm:$0xff]  ;;  %v374_v24 = vld [vmem:[%s6038_s2 + $0x148] sm:$0xff]  ;;  %v395_v49 = vld [vmem:[%s6038_s2 + $0x1f0] sm:$0xff] }
  0x25   : > { %v372_v23 = vld [vmem:[%s6038_s2 + $0x138] sm:$0xff] }
  0x26   : > { %465 = vperm.xlu1 %3746, %v346_v25   ;;  %460 = vperm.xlu0 %3745, %v345_v26   ;;  %v373_v25 = vld [vmem:[%s6038_s2 + $0x140] sm:$0xff]  ;;  %v378_v26 = vld [vmem:[%s6038_s2 + $0x168] sm:$0xff] }
  0x27   : > { %3525 = vmatmul.mubr.msk.bf16.gmra.mxu0 %vm878_vm0, %v3970_v27  ;;  %3557 = vmatmul.mubr.msk.bf16.gmra.mxu1 %vm878_vm0, %v3975_v28 }
  0x28   : > { %3528 = vmatprep.mubr.msk.bf16.mxu0 %vm878_vm0, %v3980_v29  ;;  %3560 = vmatprep.mubr.msk.bf16.mxu1 %vm878_vm0, %v3985_v30 }
  0x2a   : > { %475 = vperm.xlu1 %3746, %v348_v31   ;;  %470 = vperm.xlu0 %3745, %v347_v32   ;;  %v377_v31 = vld [vmem:[%s6038_s2 + $0x160] sm:$0xff]  ;;  %v382_v32 = vld [vmem:[%s6038_s2 + $0x188] sm:$0xff] }
  0x2e   : > { %485 = vperm.xlu1 %3746, %v350_v33   ;;  %480 = vperm.xlu0 %3745, %v349_v34   ;;  %v381_v33 = vld [vmem:[%s6038_s2 + $0x180] sm:$0xff]  ;;  %v386_v34 = vld [vmem:[%s6038_s2 + $0x1a8] sm:$0xff] }
  0x2f   : > { %3529 = vmatmul.mubr.msk.bf16.gmra.mxu0 %vm878_vm0, %v4010_v35  ;;  %3561 = vmatmul.mubr.msk.bf16.gmra.mxu1 %vm878_vm0, %v4015_v36 }
  0x30   : > { %3532 = vmatprep.mubr.msk.bf16.mxu0 %vm878_vm0, %v4020_v37  ;;  %3564 = vmatprep.mubr.msk.bf16.mxu1 %vm878_vm0, %v4025_v38 }
  0x32   : > { %495 = vperm.xlu1 %3746, %v352_v39   ;;  %490 = vperm.xlu0 %3745, %v351_v40   ;;  %v385_v39 = vld [vmem:[%s6038_s2 + $0x1a0] sm:$0xff]  ;;  %v390_v40 = vld [vmem:[%s6038_s2 + $0x1c8] sm:$0xff] }
  0x36   : > { %505 = vperm.xlu1 %3746, %v354_v41   ;;  %500 = vperm.xlu0 %3745, %v353_v42   ;;  %v389_v41 = vld [vmem:[%s6038_s2 + $0x1c0] sm:$0xff]  ;;  %v392_v42 = vld [vmem:[%s6038_s2 + $0x1d8] sm:$0xff] }
  0x37   : > { %3533 = vmatmul.mubr.msk.bf16.gmra.mxu0 %vm878_vm0, %v4050_v43  ;;  %3565 = vmatmul.mubr.msk.bf16.gmra.mxu1 %vm878_vm0, %v4055_v44 }
  0x38   : > { %3536 = vmatprep.mubr.msk.bf16.mxu0 %vm878_vm0, %v4060_v45  ;;  %3568 = vmatprep.mubr.msk.bf16.mxu1 %vm878_vm0, %v4065_v46 }
  0x3a   : > { %515 = vperm.xlu1 %3746, %v356_v47   ;;  %510 = vperm.xlu0 %3745, %v355_v48   ;;  %v393_v47 = vld [vmem:[%s6038_s2 + $0x1e0] sm:$0xff]  ;;  %v396_v48 = vld [vmem:[%s6038_s2 + $0x1f8] sm:$0xff] }
  0x3e   : > { %525 = vperm.xlu1 %3746, %v358_v53   ;;  %520 = vperm.xlu0 %3745, %v357_v54  }
  0x3f   : > { %3537 = vmatmul.mubr.msk.bf16.gmra.mxu0 %vm878_vm0, %v4096_v55  ;;  %3569 = vmatmul.mubr.msk.bf16.gmra.mxu1 %vm878_vm0, %v4101_v56 }
  0x40   : > { %3540 = vmatprep.mubr.msk.bf16.mxu0 %vm878_vm0, %v4106_v57  ;;  %3572 = vmatprep.mubr.msk.bf16.mxu1 %vm878_vm0, %v4111_v58 }
  0x42   : > { %535 = vperm.xlu1 %3746, %v360_v59   ;;  %530 = vperm.xlu0 %3745, %v359_v60  }
  0x46   : > { %545 = vperm.xlu1 %3746, %v362_v61   ;;  %540 = vperm.xlu0 %3745, %v361_v62  }
  0x47   : > { %3541 = vmatmul.mubr.msk.bf16.gmra.mxu0 %vm878_vm0, %v4136_v63  ;;  %3573 = vmatmul.mubr.msk.bf16.gmra.mxu1 %vm878_vm0, %v4141_v0 }
  0x48   : > { %3544 = vmatprep.mubr.msk.bf16.mxu0 %vm878_vm0, %v4146_v1  ;;  %3576 = vmatprep.mubr.msk.bf16.mxu1 %vm878_vm0, %v4151_v2 }
  0x4a   : > { %555 = vperm.xlu1 %3746, %v364_v3   ;;  %550 = vperm.xlu0 %3745, %v363_v4  }
  0x4e   : > { %565 = vperm.xlu1 %3746, %v366_v7   ;;  %560 = vperm.xlu0 %3745, %v365_v8  }
  0x4f   : > { %3545 = vmatmul.mubr.msk.bf16.gmra.mxu0 %vm878_vm0, %v4176_v9  ;;  %3577 = vmatmul.mubr.msk.bf16.gmra.mxu1 %vm878_vm0, %v4181_v12 }
  0x50   : > { %3582 = vmatprep.mubr.msk.bf16.mxu1 %vm878_vm0, %v3860_v5  ;;  %3648 = vmatprep.mubr.msk.bf16.mxu0 %vm878_vm0, %v3860_v5  ;;  %v371_v5 = vld [vmem:[%s6038_s2 + $0x130] sm:$0xff] }
  0x52   : > { %575 = vperm.xlu1 %3746, %v368_v15   ;;  %570 = vperm.xlu0 %3745, %v367_v16  }
  0x56   : > { %585 = vperm.xlu1 %3746, %v370_v17   ;;  %580 = vperm.xlu0 %3745, %v369_v18  }
  0x57   : > { %3583 = vmatmul.mubr.msk.bf16.vlgmr.msra.gmra.mxu1 %vm878_vm0, %v3887_v10  ;;  %3649 = vmatmul.mubr.msk.bf16.vlgmr.msra.gmra.mxu0 %vm878_vm0, %v3887_v10  ;;  %v376_v10 = vld [vmem:[%s6038_s2 + $0x158] sm:$0xff] }
  0x58   : > { %3586 = vmatprep.mubr.msk.bf16.mxu1 %vm878_vm0, %v3900_v13  ;;  %3652 = vmatprep.mubr.msk.bf16.mxu0 %vm878_vm0, %v3900_v13  ;;  %v375_v13 = vld [vmem:[%s6038_s2 + $0x150] sm:$0xff] }
  0x5a   : > { %595 = vperm.xlu1 %3746, %v372_v23   ;;  %590 = vperm.xlu0 %3745, %v371_v5  }
  0x5e   : > { %605 = vperm.xlu1 %3746, %v374_v24   ;;  %600 = vperm.xlu0 %3745, %v373_v25  }
  0x5f   : > { %3587 = vmatmul.mubr.msk.bf16.gmra.mxu1 %vm878_vm0, %v3930_v19  ;;  %3653 = vmatmul.mubr.msk.bf16.gmra.mxu0 %vm878_vm0, %v3930_v19  ;;  %v380_v19 = vld [vmem:[%s6038_s2 + $0x178] sm:$0xff] }
  0x60   : > { %3590 = vmatprep.mubr.msk.bf16.mxu1 %vm878_vm0, %v3940_v21  ;;  %3656 = vmatprep.mubr.msk.bf16.mxu0 %vm878_vm0, %v3940_v21  ;;  %v379_v21 = vld [vmem:[%s6038_s2 + $0x170] sm:$0xff] }
  0x62   : > { %615 = vperm.xlu1 %3746, %v376_v10   ;;  %610 = vperm.xlu0 %3745, %v375_v13  }
  0x66   : > { %625 = vperm.xlu1 %3746, %v378_v26   ;;  %620 = vperm.xlu0 %3745, %v377_v31  }
  0x67   : > { %3591 = vmatmul.mubr.msk.bf16.gmra.mxu1 %vm878_vm0, %v3970_v27  ;;  %3657 = vmatmul.mubr.msk.bf16.gmra.mxu0 %vm878_vm0, %v3970_v27  ;;  %v384_v27 = vld [vmem:[%s6038_s2 + $0x198] sm:$0xff] }
  0x68   : > { %3594 = vmatprep.mubr.msk.bf16.mxu1 %vm878_vm0, %v3980_v29  ;;  %3660 = vmatprep.mubr.msk.bf16.mxu0 %vm878_vm0, %v3980_v29  ;;  %v383_v29 = vld [vmem:[%s6038_s2 + $0x190] sm:$0xff] }
  0x6a   : > { %635 = vperm.xlu1 %3746, %v380_v19   ;;  %630 = vperm.xlu0 %3745, %v379_v21  }
  0x6e   : > { %645 = vperm.xlu1 %3746, %v382_v32   ;;  %640 = vperm.xlu0 %3745, %v381_v33  }
  0x6f   : > { %3595 = vmatmul.mubr.msk.bf16.gmra.mxu1 %vm878_vm0, %v4010_v35  ;;  %3661 = vmatmul.mubr.msk.bf16.gmra.mxu0 %vm878_vm0, %v4010_v35  ;;  %v388_v35 = vld [vmem:[%s6038_s2 + $0x1b8] sm:$0xff] }
  0x70   : > { %3598 = vmatprep.mubr.msk.bf16.mxu1 %vm878_vm0, %v4020_v37  ;;  %3664 = vmatprep.mubr.msk.bf16.mxu0 %vm878_vm0, %v4020_v37  ;;  %v387_v37 = vld [vmem:[%s6038_s2 + $0x1b0] sm:$0xff] }
  0x72   : > { %655 = vperm.xlu1 %3746, %v384_v27   ;;  %650 = vperm.xlu0 %3745, %v383_v29  }
  0x76   : > { %665 = vperm.xlu1 %3746, %v386_v34   ;;  %660 = vperm.xlu0 %3745, %v385_v39  }
  0x77   : > { %3599 = vmatmul.mubr.msk.bf16.gmra.mxu1 %vm878_vm0, %v4050_v43  ;;  %3665 = vmatmul.mubr.msk.bf16.gmra.mxu0 %vm878_vm0, %v4050_v43  ;;  %v391_v43 = vld [vmem:[%s6038_s2 + $0x1d0] sm:$0xff] }
  0x78   : > { %3602 = vmatprep.mubr.msk.bf16.mxu1 %vm878_vm0, %v4060_v45  ;;  %3668 = vmatprep.mubr.msk.bf16.mxu0 %vm878_vm0, %v4060_v45  ;;  %v394_v45 = vld [vmem:[%s6038_s2 + $0x1e8] sm:$0xff] }
  0x7a   : > { %675 = vperm.xlu1 %3746, %v388_v35   ;;  %670 = vperm.xlu0 %3745, %v387_v37  }
  0x7e   : > { %685 = vperm.xlu1 %3746, %v390_v40   ;;  %680 = vperm.xlu0 %3745, %v389_v41  }
  0x7f   : > { %3603 = vmatmul.mubr.msk.bf16.gmra.mxu1 %vm878_vm0, %v4096_v55  ;;  %3669 = vmatmul.mubr.msk.bf16.gmra.mxu0 %vm878_vm0, %v4096_v55 }
  0x80   : > { %3606 = vmatprep.mubr.msk.bf16.mxu1 %vm878_vm0, %v4106_v57  ;;  %3672 = vmatprep.mubr.msk.bf16.mxu0 %vm878_vm0, %v4106_v57 }
  0x82   : > { %695 = vperm.xlu1 %3746, %v392_v42   ;;  %690 = vperm.xlu0 %3745, %v391_v43  }
  0x86   : > { %705 = vperm.xlu1 %3746, %v394_v45   ;;  %700 = vperm.xlu0 %3745, %v393_v47  }
  0x87   : > { %3607 = vmatmul.mubr.msk.bf16.gmra.mxu1 %vm878_vm0, %v4136_v63  ;;  %3673 = vmatmul.mubr.msk.bf16.gmra.mxu0 %vm878_vm0, %v4136_v63 }
  0x88   : > { %3610 = vmatprep.mubr.msk.bf16.mxu1 %vm878_vm0, %v4146_v1  ;;  %3676 = vmatprep.mubr.msk.bf16.mxu0 %vm878_vm0, %v4146_v1 }
  0x89   : > { %v4333_v50 = vpop.permute.xlu1 %410  ;;  %v4335_v51 = vpop.permute.xlu0 %400 }
  0x8a   : > { %715 = vperm.xlu1 %3746, %v396_v48   ;;  %710 = vperm.xlu0 %3745, %v395_v49  }
  0x8d   : > { %v4341_v52 = vpop.permute.xlu1 %415  ;;  %v4343_v53 = vpop.permute.xlu0 %405 }
  0x8f   : > { %3611 = vmatmul.mubr.msk.bf16.gmra.mxu1 %vm878_vm0, %v4176_v9  ;;  %3677 = vmatmul.mubr.msk.bf16.gmra.mxu0 %vm878_vm0, %v4176_v9 }
  0x90   : > { %3614 = vmatprep.mubr.msk.bf16.mxu1 %vm878_vm0, %v3865_v6  ;;  %3680 = vmatprep.mubr.msk.bf16.mxu0 %vm878_vm0, %v3865_v6 }
  0x91   : > { %v4349_v54 = vpop.permute.xlu1 %425  ;;  %v4351_v55 = vpop.permute.xlu0 %420 }
  0x92   : > { %6139 = vst [vmem:[#allocation3_spill] sm:$0xff] %v4351_v55 }
  0x95   : > { %v4357_v57 = vpop.permute.xlu1 %435  ;;  %v4359_v59 = vpop.permute.xlu0 %430 }
  0x96   : > { %6140 = vst [vmem:[#allocation4_spill] sm:$0xff] %v4357_v57 }
  0x97   : > { %3615 = vmatmul.mubr.msk.bf16.gmra.mxu1 %vm878_vm0, %v3892_v11  ;;  %3681 = vmatmul.mubr.msk.bf16.gmra.mxu0 %vm878_vm0, %v3892_v11 }
  0x98   : > { %3618 = vmatprep.mubr.msk.bf16.mxu1 %vm878_vm0, %v3905_v14  ;;  %3684 = vmatprep.mubr.msk.bf16.mxu0 %vm878_vm0, %v3905_v14 }
  0x99   : > { %v4365_v60 = vpop.permute.xlu1 %445  ;;  %v4367_v61 = vpop.permute.xlu0 %440 }
  0x9d   : > { %v4373_v6 = vpop.permute.xlu1 %455  ;;  %v4375_v62 = vpop.permute.xlu0 %450 }
  0x9e   : > { %6141 = vst [vmem:[#allocation5_spill] sm:$0xff] %v4373_v6 }
  0x9f   : > { %3619 = vmatmul.mubr.msk.bf16.gmra.mxu1 %vm878_vm0, %v3935_v20  ;;  %3685 = vmatmul.mubr.msk.bf16.gmra.mxu0 %vm878_vm0, %v3935_v20 }
  0xa0   : > { %3622 = vmatprep.mubr.msk.bf16.mxu1 %vm878_vm0, %v3945_v22  ;;  %3688 = vmatprep.mubr.msk.bf16.mxu0 %vm878_vm0, %v3945_v22 }
  0xa1   : > { %v4381_v11 = vpop.permute.xlu1 %465  ;;  %v4383_v63 = vpop.permute.xlu0 %460 }
  0xa2   : > { %6142 = vst [vmem:[#allocation6_spill] sm:$0xff] %v4381_v11  ;;  %6143 = vst [vmem:[#allocation7_spill] sm:$0xff] %v4383_v63 }
  0xa5   : > { %v4389_v14 = vpop.permute.xlu1 %475  ;;  %v4391_v1 = vpop.permute.xlu0 %470 }
  0xa6   : > { %6144 = vst [vmem:[#allocation8_spill] sm:$0xff] %v4389_v14  ;;  %6145 = vst [vmem:[#allocation9_spill] sm:$0xff] %v4391_v1 }
  0xa7   : > { %3623 = vmatmul.mubr.msk.bf16.gmra.mxu1 %vm878_vm0, %v3975_v28  ;;  %3689 = vmatmul.mubr.msk.bf16.gmra.mxu0 %vm878_vm0, %v3975_v28 }
  0xa8   : > { %3626 = vmatprep.mubr.msk.bf16.mxu1 %vm878_vm0, %v3985_v30  ;;  %3692 = vmatprep.mubr.msk.bf16.mxu0 %vm878_vm0, %v3985_v30 }
  0xa9   : > { %v4397_v20 = vpop.permute.xlu1 %485  ;;  %v4399_v3 = vpop.permute.xlu0 %480 }
  0xaa   : > { %6146 = vst [vmem:[#allocation10_spill] sm:$0xff] %v4397_v20  ;;  %6147 = vst [vmem:[#allocation11_spill] sm:$0xff] %v4399_v3 }
  0xad   : > { %v4405_v22 = vpop.permute.xlu0 %490  ;;  %v4407_v4 = vpop.permute.xlu1 %495 }
  0xae   : > { %6148 = vst [vmem:[#allocation12_spill] sm:$0xff] %v4405_v22  ;;  %6149 = vst [vmem:[#allocation13_spill] sm:$0xff] %v4407_v4 }
  0xaf   : > { %3627 = vmatmul.mubr.msk.bf16.gmra.mxu1 %vm878_vm0, %v4015_v36  ;;  %3693 = vmatmul.mubr.msk.bf16.gmra.mxu0 %vm878_vm0, %v4015_v36 }
  0xb0   : > { %3630 = vmatprep.mubr.msk.bf16.mxu1 %vm878_vm0, %v4025_v38  ;;  %3696 = vmatprep.mubr.msk.bf16.mxu0 %vm878_vm0, %v4025_v38 }
  0xb1   : > { %v4413_v28 = vpop.permute.xlu0 %500  ;;  %v4419_v7 = vpop.permute.xlu1 %505 }
  0xb2   : > { %6150 = vst [vmem:[#allocation14_spill] sm:$0xff] %v4413_v28  ;;  %6151 = vst [vmem:[#allocation15_spill] sm:$0xff] %v4419_v7 }
  0xb5   : > { %v4421_v30 = vpop.permute.xlu0 %510  ;;  %v4433_v36 = vpop.permute.xlu1 %515 }
  0xb6   : > { %6152 = vst [vmem:[#allocation16_spill] sm:$0xff] %v4421_v30  ;;  %6154 = vst [vmem:[#allocation18_spill] sm:$0xff] %v4433_v36 }
  0xb7   : > { %3631 = vmatmul.mubr.msk.bf16.gmra.mxu1 %vm878_vm0, %v4055_v44  ;;  %3697 = vmatmul.mubr.msk.bf16.gmra.mxu0 %vm878_vm0, %v4055_v44 }
  0xb8   : > { %3634 = vmatprep.mubr.msk.bf16.mxu1 %vm878_vm0, %v4065_v46  ;;  %3700 = vmatprep.mubr.msk.bf16.mxu0 %vm878_vm0, %v4065_v46 }
  0xb9   : > { %v4427_v8 = vpop.permute.xlu0 %520  ;;  %v4441_v9 = vpop.permute.xlu1 %525 }
  0xba   : > { %6153 = vst [vmem:[#allocation17_spill] sm:$0xff] %v4427_v8  ;;  %6156 = vst [vmem:[#allocation20_spill] sm:$0xff] %v4441_v9 }
  0xbd   : > { %v4435_v38 = vpop.permute.xlu0 %530  ;;  %v4449_v46 = vpop.permute.xlu1 %535 }
  0xbe   : > { %6155 = vst [vmem:[#allocation19_spill] sm:$0xff] %v4435_v38  ;;  %6158 = vst [vmem:[#allocation22_spill] sm:$0xff] %v4449_v46 }
  0xbf   : > { %3635 = vmatmul.mubr.msk.bf16.gmra.mxu1 %vm878_vm0, %v4101_v56  ;;  %3701 = vmatmul.mubr.msk.bf16.gmra.mxu0 %vm878_vm0, %v4101_v56 }
  0xc0   : > { %3638 = vmatprep.mubr.msk.bf16.mxu1 %vm878_vm0, %v4111_v58  ;;  %3704 = vmatprep.mubr.msk.bf16.mxu0 %vm878_vm0, %v4111_v58 }
  0xc1   : > { %v4447_v44 = vpop.permute.xlu0 %540  ;;  %v4461_v15 = vpop.permute.xlu1 %545 }
  0xc2   : > { %6157 = vst [vmem:[#allocation21_spill] sm:$0xff] %v4447_v44  ;;  %6160 = vst [vmem:[#allocation24_spill] sm:$0xff] %v4461_v15 }
  0xc5   : > { %v4459_v56 = vpop.permute.xlu0 %550  ;;  %v4469_v16 = vpop.permute.xlu1 %555 }
  0xc6   : > { %6159 = vst [vmem:[#allocation23_spill] sm:$0xff] %v4459_v56  ;;  %6162 = vst [vmem:[#allocation26_spill] sm:$0xff] %v4469_v16 }
  0xc7   : > { %3639 = vmatmul.mubr.msk.bf16.gmra.mxu1 %vm878_vm0, %v4141_v0  ;;  %3705 = vmatmul.mubr.msk.bf16.gmra.mxu0 %vm878_vm0, %v4141_v0 }
  0xc8   : > { %3642 = vmatprep.mubr.msk.bf16.mxu1 %vm878_vm0, %v4151_v2  ;;  %3708 = vmatprep.mubr.msk.bf16.mxu0 %vm878_vm0, %v4151_v2 }
  0xc9   : > { %v4467_v58 = vpop.permute.xlu0 %560  ;;  %v4473_v23 = vpop.permute.xlu1 %565 }
  0xca   : > { %6161 = vst [vmem:[#allocation25_spill] sm:$0xff] %v4467_v58  ;;  %6164 = vst [vmem:[#allocation28_spill] sm:$0xff] %v4473_v23 }
  0xcd   : > { %v4471_v0 = vpop.permute.xlu0 %570  ;;  %v4482_v35 = vpop.permute.xlu1 %575 }
  0xce   : > { %6163 = vst [vmem:[#allocation27_spill] sm:$0xff] %v4471_v0  ;;  %6165 = vst [vmem:[#allocation29_spill] sm:$0xff] %v4482_v35 }
  0xcf   : > { %3643 = vmatmul.mubr.msk.bf16.gmra.mxu1 %vm878_vm0, %v4181_v12  ;;  %3709 = vmatmul.mubr.msk.bf16.gmra.mxu0 %vm878_vm0, %v4181_v12 }
  0xd1   : > { %v4484_v37 = vpop.permute.xlu0 %580 }
  0xd2   : > { %6166 = vst [vmem:[#allocation30_spill] sm:$0xff] %v4484_v37 }
  0xd7   : > { %v3518_v17 = vpop.f32.mrf.mxu0  ;;  %v3550_v18 = vpop.f32.mrf.mxu1 }
  0xd8   : > { %v1022_v2 = vadd.f32 %v3518_v17, %v4333_v50  ;;  %v1150_v5 = vadd.f32 %v3550_v18, %v4471_v0 }
  0xd9   : > { %v1013_v24 = vpop.f32.mrf.mxu0  ;;  %v1141_v25 = vpop.f32.mrf.mxu1 }
  0xda   : > { %v1270_v10 = vmax.f32 %v1022_v2, 0.0  ;;  %v1302_v13 = vmax.f32 %v1150_v5, 0.0  ;;  %v1014_v12 = vadd.f32 %v1013_v24, %v4335_v51  ;;  %v1142_v26 = vadd.f32 %v1141_v25, %v4467_v58  ;;  %v4491_v25 = vpop.permute.xlu0 %590 }
  0xdb   : > { %v3519_v31 = vpop.f32.mrf.mxu0  ;;  %v3551_v19 = vpop.f32.mrf.mxu1  ;;  %6167 = vst [vmem:[#allocation31_spill] sm:$0xff] %v4491_v25 }
  0xdc   : > { %v1025_v21 = vadd.f32 %v3519_v31, %v4341_v52  ;;  %v1268_v32 = vmax.f32 %v1014_v12, 0.0  ;;  %v1300_v33 = vmax.f32 %v1142_v26, 0.0  ;;  %v1435_v27 = vsel %vm1332_vm2, %v1302_v13, 0.0  ;;  %v4494_v12 = vpop.permute.xlu1 %585 }
  0xdd   : > { %v1144_v29 = vpop.f32.mrf.mxu1  ;;  %v1339_v34 = vsel %vm1332_vm2, %v1270_v10, 0.0  ;;  %v1016_v39 = vpop.f32.mrf.mxu0  ;;  %1436 = vadd.xlane.f32.xlu1 %v1435_v27  ;;  %v1153_v45 = vadd.f32 %v3551_v19, %v4482_v35  ;;  %6168 = vst [vmem:[#allocation32_spill] sm:$0xff] %v4494_v12 }
  0xde   : > { %1340 = vadd.xlane.f32.xlu0 %v1339_v34  ;;  %v1017_v40 = vadd.f32 %v1016_v39, %v4343_v53  ;;  %v1271_v43 = vmax.f32 %v1025_v21, 0.0  ;;  %v1429_v17 = vsel %vm1332_vm2, %v1300_v33, 0.0  ;;  %v1333_v2 = vsel %vm1332_vm2, %v1268_v32, 0.0 }
  0xdf   : > { %v3522_v41 = vpop.f32.mrf.mxu0  ;;  %v3554_v42 = vpop.f32.mrf.mxu1  ;;  %v1303_v10 = vmax.f32 %v1153_v45, 0.0  ;;  %v1145_v13 = vadd.f32 %v1144_v29, %v4473_v23 }
  0xe0   : > { %v1269_v47 = vmax.f32 %v1017_v40, 0.0  ;;  %v1038_v48 = vadd.f32 %v3522_v41, %v4359_v59  ;;  %v1166_v31 = vadd.f32 %v3554_v42, %v4491_v25  ;;  %v1342_v33 = vsel %vm1332_vm2, %v1271_v43, 0.0 }
  0xe1   : > { %v1157_v49 = vpop.f32.mrf.mxu1  ;;  %v1029_v18 = vpop.f32.mrf.mxu0  ;;  %1430 = vadd.xlane.f32.xlu1 %v1429_v17  ;;  %v1301_v34 = vmax.f32 %v1145_v13, 0.0  ;;  %v1438_v39 = vsel %vm1332_vm2, %v1303_v10, 0.0 }
  0xe2   : > { %1334 = vadd.xlane.f32.xlu0 %v1333_v2  ;;  %v1274_v26 = vmax.f32 %v1038_v48, 0.0  ;;  %v1336_v21 = vsel %vm1332_vm2, %v1269_v47, 0.0  ;;  %v1306_v40 = vmax.f32 %v1166_v31, 0.0  ;;  %v1030_v29 = vadd.f32 %v1029_v18, %v4351_v55  ;;  %v4503_v47 = vpop.permute.xlu1 %595  ;;  %v4507_v13 = vpop.permute.xlu0 %600 }
  0xe3   : > { %v3523_v5 = vpop.f32.mrf.mxu0  ;;  %v3555_v24 = vpop.f32.mrf.mxu1  ;;  %6169 = vst [vmem:[#allocation33_spill] sm:$0xff] %v4503_v47  ;;  %v1158_v17 = vadd.f32 %v1157_v49, %v4484_v37  ;;  %6170 = vst [vmem:[#allocation34_spill] sm:$0xff] %v4507_v13 }
  0xe4   : > { %v1041_v41 = vadd.f32 %v3523_v5, %v4357_v57  ;;  %v1351_v42 = vsel %vm1332_vm2, %v1274_v26, 0.0  ;;  %v1169_v2 = vadd.f32 %v3555_v24, %v4503_v47  ;;  %v1272_v10 = vmax.f32 %v1030_v29, 0.0 }
  0xe5   : > { %v1160_v19 = vpop.f32.mrf.mxu1  ;;  %v1032_v32 = vpop.f32.mrf.mxu0  ;;  %1337 = vadd.xlane.f32.xlu1 %v1336_v21  ;;  %v1447_v5 = vsel %vm1332_vm2, %v1306_v40, 0.0  ;;  %v1432_v26 = vsel %vm1332_vm2, %v1301_v34, 0.0 }
  0xe6   : > { %1343 = vadd.xlane.f32.xlu0 %v1342_v33  ;;  %v1275_v31 = vmax.f32 %v1041_v41, 0.0  ;;  %v1033_v49 = vadd.f32 %v1032_v32, %v4349_v54  ;;  %v1345_v29 = vsel %vm1332_vm2, %v1272_v10, 0.0  ;;  %v4519_v34 = vpop.permute.xlu0 %610  ;;  %v4525_v32 = vpop.permute.xlu1 %605 }
  0xe7   : > { %v3558_v27 = vpop.f32.mrf.mxu1  ;;  %v3526_v48 = vpop.f32.mrf.mxu0  ;;  %6171 = vst [vmem:[#allocation35_spill] sm:$0xff] %v4519_v34  ;;  %6172 = vst [vmem:[#allocation36_spill] sm:$0xff] %v4525_v32 }
  0xe8   : > { %v1054_v24 = vadd.f32 %v3526_v48, %v4375_v62  ;;  %v1354_v41 = vsel %vm1332_vm2, %v1275_v31, 0.0  ;;  %v1273_v48 = vmax.f32 %v1033_v49, 0.0 }
  0xe9   : > { %v1173_v45 = vpop.f32.mrf.mxu1  ;;  %1352 = vadd.xlane.f32.xlu1 %v1351_v42  ;;  %v1045_v21 = vpop.f32.mrf.mxu0  ;;  %v1307_v42 = vmax.f32 %v1169_v2, 0.0  ;;  %v1182_v2 = vadd.f32 %v3558_v27, %v4519_v34 }
  0xea   : > { %1439 = vadd.xlane.f32.xlu0 %v1438_v39  ;;  %v1304_v39 = vmax.f32 %v1158_v17, 0.0  ;;  %v1161_v17 = vadd.f32 %v1160_v19, %v4494_v12  ;;  %v1046_v19 = vadd.f32 %v1045_v21, %v4367_v61  ;;  %v4545_v21 = vpop.permute.xlu0 %620 }
  0xeb   : > { %v3559_v43 = vpop.f32.mrf.mxu1  ;;  %v3527_v25 = vpop.f32.mrf.mxu0  ;;  %v1450_v31 = vsel %vm1332_vm2, %v1307_v42, 0.0  ;;  %v1310_v37 = vmax.f32 %v1182_v2, 0.0  ;;  %6174 = vst [vmem:[#allocation38_spill] sm:$0xff] %v4545_v21 }
  0xec   : > { %v1441_v10 = vsel %vm1332_vm2, %v1304_v39, 0.0  ;;  %v1305_v35 = vmax.f32 %v1161_v17, 0.0  ;;  %v1057_v27 = vadd.f32 %v3527_v25, %v4373_v6  ;;  %v4539_v42 = vpop.permute.xlu1 %615  ;;  %v1174_v17 = vadd.f32 %v1173_v45, %v4507_v13 }
  0xed   : > { %v4509_v18 = vpop.f32.mrf.mxu1  ;;  %1448 = vadd.xlane.f32.xlu1 %v1447_v5  ;;  %v1278_v5 = vmax.f32 %v1054_v24, 0.0  ;;  %v1348_v24 = vsel %vm1332_vm2, %v1273_v48, 0.0  ;;  %6173 = vst [vmem:[#allocation37_spill] sm:$0xff] %v4539_v42  ;;  %v1185_v2 = vadd.f32 %v3559_v43, %v4539_v42  ;;  %v1276_v25 = vmax.f32 %v1046_v19, 0.0 }
  0xee   : > { %1433 = vadd.xlane.f32.xlu0 %v1432_v26  ;;  %v1444_v48 = vsel %vm1332_vm2, %v1305_v35, 0.0  ;;  %v1308_v23 = vmax.f32 %v1174_v17, 0.0  ;;  %v4559_v35 = vpop.permute.xlu0 %630  ;;  %v1177_v17 = vadd.f32 %v4509_v18, %v4525_v32 }
  0xef   : > { %v3562_v33 = vpop.f32.mrf.mxu1  ;;  %v1363_v49 = vsel %vm1332_vm2, %v1278_v5, 0.0  ;;  %v1459_v5 = vsel %vm1332_vm2, %v1310_v37, 0.0  ;;  %v1311_v0 = vmax.f32 %v1185_v2, 0.0  ;;  %v1357_v19 = vsel %vm1332_vm2, %v1276_v25, 0.0  ;;  %6175 = vst [vmem:[#allocation39_spill] sm:$0xff] %v4559_v35 }
  0xf0   : > { %v4566_v2 = vpop.permute.xlu1 %625  ;;  %v1453_v25 = vsel %vm1332_vm2, %v1308_v23, 0.0  ;;  %v1309_v58 = vmax.f32 %v1177_v17, 0.0 }
  0xf1   : > { %v4515_v47 = vpop.f32.mrf.mxu1  ;;  %1346 = vadd.xlane.f32.xlu1 %v1345_v29  ;;  %v1048_v29 = vpop.f32.mrf.mxu0  ;;  %6176 = vst [vmem:[#allocation40_spill] sm:$0xff] %v4566_v2 }
  0xf2   : > { %1355 = vadd.xlane.f32.xlu0 %v1354_v41  ;;  %v1049_v45 = vadd.f32 %v1048_v29, %v4365_v60  ;;  %v1198_v29 = vadd.f32 %v3562_v33, %v4559_v35  ;;  %v1190_v17 = vadd.f32 %v4515_v47, %v4545_v21 }
  0xf3   : > { %v4521_v40 = vpop.f32.mrf.mxu1  ;;  %v3530_v39 = vpop.f32.mrf.mxu0 }
  0xf4   : > { %v1070_v43 = vadd.f32 %v3530_v39, %v4391_v1  ;;  %v1277_v39 = vmax.f32 %v1049_v45, 0.0  ;;  %v1314_v1 = vmax.f32 %v1198_v29, 0.0 }
  0xf5   : > { %v4527_v26 = vpop.f32.mrf.mxu1  ;;  %1442 = vadd.xlane.f32.xlu1 %v1441_v10 }
  0xf6   : > { %1451 = vadd.xlane.f32.xlu0 %v1450_v31  ;;  %v1279_v31 = vmax.f32 %v1057_v27, 0.0 }
  0xf7   : > { %v4531_v41 = vpop.f32.mrf.mxu1 }
  0xf8   : > { %v1366_v27 = vsel %vm1332_vm2, %v1279_v31, 0.0  ;;  %v1462_v31 = vsel %vm1332_vm2, %v1311_v0, 0.0  ;;  %v4580_v0 = vpop.permute.xlu1 %635 }
  0xf9   : > { %v4535_v34 = vpop.f32.mrf.mxu1  ;;  %1364 = vadd.xlane.f32.xlu1 %v1363_v49  ;;  %v1061_v49 = vpop.f32.mrf.mxu0  ;;  %6177 = vst [vmem:[#allocation41_spill] sm:$0xff] %v4580_v0 }
  0xfa   : > { %1349 = vadd.xlane.f32.xlu0 %v1348_v24  ;;  %v1062_v18 = vadd.f32 %v1061_v49, %v4383_v63  ;;  %v1201_v49 = vadd.f32 %v4521_v40, %v4580_v0 }
  0xfb   : > { %v4541_v10 = vpop.f32.mrf.mxu1  ;;  %v3531_v37 = vpop.f32.mrf.mxu0 }
  0xfc   : > { %v1073_v33 = vadd.f32 %v3531_v37, %v4389_v14  ;;  %v4588_v37 = vpop.permute.xlu0 %640  ;;  %v1280_v29 = vmax.f32 %v1062_v18, 0.0  ;;  %v1312_v14 = vmax.f32 %v1190_v17, 0.0  ;;  %v1315_v47 = vmax.f32 %v1201_v49, 0.0 }
  0xfd   : > { %v4547_v12 = vpop.f32.mrf.mxu1  ;;  %1460 = vadd.xlane.f32.xlu1 %v1459_v5  ;;  %6178 = vst [vmem:[#allocation42_spill] sm:$0xff] %v4588_v37  ;;  %v1193_v17 = vadd.f32 %v4527_v26, %v4566_v2 }
  0xfe   : > { %1445 = vadd.xlane.f32.xlu0 %v1444_v48  ;;  %v1282_v48 = vmax.f32 %v1070_v43, 0.0  ;;  %v1360_v43 = vsel %vm1332_vm2, %v1277_v39, 0.0  ;;  %v1471_v39 = vsel %vm1332_vm2, %v1314_v1, 0.0  ;;  %v1369_v18 = vsel %vm1332_vm2, %v1280_v29, 0.0 }
  0xff   : > { %v4551_v24 = vpop.f32.mrf.mxu1 }
 0x100   : > { %v1375_v45 = vsel %vm1332_vm2, %v1282_v48, 0.0 }
 0x101   : > { %v4555_v42 = vpop.f32.mrf.mxu1  ;;  %1358 = vadd.xlane.f32.xlu1 %v1357_v19  ;;  %v1064_v19 = vpop.f32.mrf.mxu0 }
 0x102   : > { %1367 = vadd.xlane.f32.xlu0 %v1366_v27  ;;  %v1065_v21 = vadd.f32 %v1064_v19, %v4381_v11  ;;  %v1313_v11 = vmax.f32 %v1193_v17, 0.0  ;;  %v1206_v17 = vadd.f32 %v4535_v34, %v4588_v37 }
 0x103   : > { %v4561_v5 = vpop.f32.mrf.mxu1  ;;  %v3534_v23 = vpop.f32.mrf.mxu0 }
 0x104   : > { %v1086_v40 = vadd.f32 %v3534_v23, %v4405_v22  ;;  %v4610_v23 = vpop.permute.xlu1 %645  ;;  %v1281_v49 = vmax.f32 %v1065_v21, 0.0 }
 0x105   : > { %v4568_v13 = vpop.f32.mrf.mxu1  ;;  %1454 = vadd.xlane.f32.xlu1 %v1453_v25  ;;  %6180 = vst [vmem:[#allocation44_spill] sm:$0xff] %v4610_v23 }
 0x106   : > { %1463 = vadd.xlane.f32.xlu0 %v1462_v31  ;;  %v1283_v31 = vmax.f32 %v1073_v33, 0.0 }
 0x107   : > { %v4572_v27 = vpop.f32.mrf.mxu1 }
 0x108   : > { %v1378_v33 = vsel %vm1332_vm2, %v1283_v31, 0.0  ;;  %v1465_v31 = vsel %vm1332_vm2, %v1312_v14, 0.0 }
 0x109   : > { %v4576_v35 = vpop.f32.mrf.mxu1  ;;  %1376 = vadd.xlane.f32.xlu1 %v1375_v45  ;;  %v1456_v45 = vsel %vm1332_vm2, %v1309_v58, 0.0  ;;  %v4602_v58 = vpop.permute.xlu0 %650 }
 0x10a   : > { %1361 = vadd.xlane.f32.xlu0 %v1360_v43  ;;  %v1077_v43 = vpop.f32.mrf.mxu0  ;;  %6179 = vst [vmem:[#allocation43_spill] sm:$0xff] %v4602_v58  ;;  %v1214_v19 = vadd.f32 %v4531_v41, %v4602_v58 }
 0x10b   : > { %v4582_v25 = vpop.f32.mrf.mxu1  ;;  %v1078_v2 = vadd.f32 %v1077_v43, %v4399_v3  ;;  %v1316_v3 = vmax.f32 %v1206_v17, 0.0  ;;  %v1209_v17 = vadd.f32 %v4547_v12, %v4610_v23 }
 0x10c   : > { %v3535_v1 = vpop.f32.mrf.mxu0  ;;  %v1318_v26 = vmax.f32 %v1214_v19, 0.0 }
 0x10d   : > { %v4590_v48 = vpop.f32.mrf.mxu1  ;;  %1472 = vadd.xlane.f32.xlu1 %v1471_v39  ;;  %v1089_v41 = vadd.f32 %v3535_v1, %v4407_v4  ;;  %v4632_v1 = vpop.permute.xlu0 %660  ;;  %v1284_v19 = vmax.f32 %v1078_v2, 0.0 }
 0x10e   : > { %1457 = vadd.xlane.f32.xlu0 %v1456_v45  ;;  %v1286_v45 = vmax.f32 %v1086_v40, 0.0  ;;  %v1372_v40 = vsel %vm1332_vm2, %v1281_v49, 0.0  ;;  %6182 = vst [vmem:[#allocation46_spill] sm:$0xff] %v4632_v1  ;;  %v1483_v49 = vsel %vm1332_vm2, %v1318_v26, 0.0 }
 0x10f   : > { %v4594_v32 = vpop.f32.mrf.mxu1  ;;  %v1381_v2 = vsel %vm1332_vm2, %v1284_v19, 0.0 }
 0x110   : > { %v1387_v21 = vsel %vm1332_vm2, %v1286_v45, 0.0 }
 0x111   : > { %v4598_v0 = vpop.f32.mrf.mxu1  ;;  %1370 = vadd.xlane.f32.xlu1 %v1369_v18  ;;  %v1474_v18 = vsel %vm1332_vm2, %v1315_v47, 0.0  ;;  %v4624_v47 = vpop.permute.xlu1 %655 }
 0x112   : > { %1379 = vadd.xlane.f32.xlu0 %v1378_v33  ;;  %v1080_v33 = vpop.f32.mrf.mxu0  ;;  %6181 = vst [vmem:[#allocation45_spill] sm:$0xff] %v4624_v47  ;;  %v1217_v43 = vadd.f32 %v4541_v10, %v4624_v47 }
 0x113   : > { %v4604_v39 = vpop.f32.mrf.mxu1  ;;  %v1081_v37 = vadd.f32 %v1080_v33, %v4397_v20  ;;  %v1317_v20 = vmax.f32 %v1209_v17, 0.0  ;;  %v1222_v17 = vadd.f32 %v4555_v42, %v4632_v1 }
 0x114   : > { %v3538_v14 = vpop.f32.mrf.mxu0  ;;  %v1319_v34 = vmax.f32 %v1217_v43, 0.0 }
 0x115   : > { %v4612_v29 = vpop.f32.mrf.mxu1  ;;  %1466 = vadd.xlane.f32.xlu1 %v1465_v31  ;;  %v1102_v10 = vadd.f32 %v3538_v14, %v4421_v30  ;;  %v4654_v14 = vpop.permute.xlu1 %665  ;;  %v1285_v43 = vmax.f32 %v1081_v37, 0.0 }
 0x116   : > { %1475 = vadd.xlane.f32.xlu0 %v1474_v18  ;;  %v1287_v18 = vmax.f32 %v1089_v41, 0.0  ;;  %6184 = vst [vmem:[#allocation48_spill] sm:$0xff] %v4654_v14 }
 0x117   : > { %v4616_v22 = vpop.f32.mrf.mxu1 }
 0x118   : > { %v1390_v41 = vsel %vm1332_vm2, %v1287_v18, 0.0  ;;  %v1477_v18 = vsel %vm1332_vm2, %v1316_v3, 0.0 }
 0x119   : > { %v4620_v58 = vpop.f32.mrf.mxu1  ;;  %1388 = vadd.xlane.f32.xlu1 %v1387_v21  ;;  %v1468_v21 = vsel %vm1332_vm2, %v1313_v11, 0.0  ;;  %v4646_v11 = vpop.permute.xlu0 %670 }
 0x11a   : > { %1373 = vadd.xlane.f32.xlu0 %v1372_v40  ;;  %v1093_v40 = vpop.f32.mrf.mxu0  ;;  %6183 = vst [vmem:[#allocation47_spill] sm:$0xff] %v4646_v11  ;;  %v1230_v33 = vadd.f32 %v4551_v24, %v4646_v11 }
 0x11b   : > { %v4626_v31 = vpop.f32.mrf.mxu1  ;;  %v1094_v23 = vadd.f32 %v1093_v40, %v4413_v28 }
 0x11c   : > { %v3539_v26 = vpop.f32.mrf.mxu0  ;;  %v1322_v12 = vmax.f32 %v1230_v33, 0.0 }
 0x11d   : > { %v4634_v45 = vpop.f32.mrf.mxu1  ;;  %1484 = vadd.xlane.f32.xlu1 %v1483_v49  ;;  %v1105_v24 = vadd.f32 %v3539_v26, %v4433_v36  ;;  %v1288_v26 = vmax.f32 %v1094_v23, 0.0  ;;  %v1320_v36 = vmax.f32 %v1222_v17, 0.0 }
 0x11e   : > { %1469 = vadd.xlane.f32.xlu0 %v1468_v21  ;;  %v1290_v21 = vmax.f32 %v1102_v10, 0.0  ;;  %v1384_v10 = vsel %vm1332_vm2, %v1285_v43, 0.0  ;;  %v1480_v43 = vsel %vm1332_vm2, %v1317_v20, 0.0 }
 0x11f   : > { %v4638_v4 = vpop.f32.mrf.mxu1  ;;  %v1291_v33 = vmax.f32 %v1105_v24, 0.0  ;;  %v1393_v23 = vsel %vm1332_vm2, %v1288_v26, 0.0  ;;  %v1489_v17 = vsel %vm1332_vm2, %v1320_v36, 0.0 }
 0x120   : > { %v1399_v37 = vsel %vm1332_vm2, %v1290_v21, 0.0  ;;  %v1495_v21 = vsel %vm1332_vm2, %v1322_v12, 0.0 }
 0x121   : > { %v4642_v47 = vpop.f32.mrf.mxu1  ;;  %1382 = vadd.xlane.f32.xlu1 %v1381_v2  ;;  %v1486_v2 = vsel %vm1332_vm2, %v1319_v34, 0.0  ;;  %v4668_v34 = vpop.permute.xlu1 %675  ;;  %v1402_v24 = vsel %vm1332_vm2, %v1291_v33, 0.0 }
 0x122   : > { %1391 = vadd.xlane.f32.xlu0 %v1390_v41  ;;  %v1096_v41 = vpop.f32.mrf.mxu0  ;;  %6185 = vst [vmem:[#allocation49_spill] sm:$0xff] %v4668_v34  ;;  %v1233_v40 = vadd.f32 %v4561_v5, %v4668_v34  ;;  %v4697_v33 = vpop.permute.xlu0 %680 }
 0x123   : > { %v4648_v49 = vpop.f32.mrf.mxu1  ;;  %v1097_v42 = vadd.f32 %v1096_v41, %v4419_v7  ;;  %6186 = vst [vmem:[#allocation50_spill] sm:$0xff] %v4697_v33 }
 0x124   : > { %v3542_v3 = vpop.f32.mrf.mxu0  ;;  %v1323_v28 = vmax.f32 %v1233_v40, 0.0 }
 0x125   : > { %v4656_v19 = vpop.f32.mrf.mxu1  ;;  %1478 = vadd.xlane.f32.xlu1 %v1477_v18  ;;  %v1118_v1 = vadd.f32 %v3542_v3, %v4435_v38  ;;  %v1289_v40 = vmax.f32 %v1097_v42, 0.0 }
 0x126   : > { %1487 = vadd.xlane.f32.xlu0 %v1486_v2  ;;  %v1498_v26 = vsel %vm1332_vm2, %v1323_v28, 0.0 }
 0x127   : > { %v4660_v30 = vpop.f32.mrf.mxu1  ;;  %v1294_v41 = vmax.f32 %v1118_v1, 0.0  ;;  %v1396_v28 = vsel %vm1332_vm2, %v1289_v40, 0.0 }
 0x129   : > { %v4664_v11 = vpop.f32.mrf.mxu1  ;;  %1400 = vadd.xlane.f32.xlu1 %v1399_v37  ;;  %v1109_v37 = vpop.f32.mrf.mxu0 }
 0x12a   : > { %1385 = vadd.xlane.f32.xlu0 %v1384_v10  ;;  %v1110_v3 = vadd.f32 %v1109_v37, %v4427_v8  ;;  %v1411_v37 = vsel %vm1332_vm2, %v1294_v41, 0.0  ;;  %v4716_v41 = vpop.permute.xlu1 %685 }
 0x12b   : > { %v4670_v18 = vpop.f32.mrf.mxu1  ;;  %v3543_v12 = vpop.f32.mrf.mxu0  ;;  %6187 = vst [vmem:[#allocation51_spill] sm:$0xff] %v4716_v41 }
 0x12c   : > { %v1292_v36 = vmax.f32 %v1110_v3, 0.0  ;;  %v1121_v1 = vadd.f32 %v3543_v12, %v4449_v46 }
 0x12d   : > { %v4676_v2 = vpop.f32.mrf.mxu1  ;;  %1496 = vadd.xlane.f32.xlu1 %v1495_v21  ;;  %v1225_v21 = vadd.f32 %v4568_v13, %v4654_v14  ;;  %v1112_v34 = vpop.f32.mrf.mxu0  ;;  %v1238_v13 = vadd.f32 %v4576_v35, %v4697_v33 }
 0x12e   : > { %1481 = vadd.xlane.f32.xlu0 %v1480_v43  ;;  %v1295_v38 = vmax.f32 %v1121_v1, 0.0  ;;  %v1113_v35 = vadd.f32 %v1112_v34, %v4441_v9  ;;  %v1405_v33 = vsel %vm1332_vm2, %v1292_v36, 0.0 }
 0x12f   : > { %v4680_v10 = vpop.f32.mrf.mxu1  ;;  %v3546_v14 = vpop.f32.mrf.mxu0 }
 0x130   : > { %v1134_v3 = vadd.f32 %v3546_v14, %v4459_v56  ;;  %v1414_v36 = vsel %vm1332_vm2, %v1295_v38, 0.0 }
 0x131   : > { %v4684_v5 = vpop.f32.mrf.mxu1  ;;  %1394 = vadd.xlane.f32.xlu1 %v1393_v23  ;;  %v1125_v40 = vpop.f32.mrf.mxu0 }
 0x132   : > { %1403 = vadd.xlane.f32.xlu0 %v1402_v24  ;;  %v1321_v24 = vmax.f32 %v1225_v21, 0.0  ;;  %v1298_v14 = vmax.f32 %v1134_v3, 0.0  ;;  %v1126_v1 = vadd.f32 %v1125_v40, %v4447_v44 }
 0x133   : > { %v4688_v20 = vpop.f32.mrf.mxu1  ;;  %v3547_v46 = vpop.f32.mrf.mxu0 }
 0x134   : > { %v1492_v21 = vsel %vm1332_vm2, %v1321_v24, 0.0  ;;  %v1241_v24 = vadd.f32 %v4590_v48, %v4716_v41  ;;  %v1423_v40 = vsel %vm1332_vm2, %v1298_v14, 0.0 }
 0x135   : > { %v4694_v43 = vpop.f32.mrf.mxu1  ;;  %1490 = vadd.xlane.f32.xlu1 %v1489_v17  ;;  %v1128_v41 = vpop.f32.mrf.mxu0 }
 0x136   : > { %1499 = vadd.xlane.f32.xlu0 %v1498_v26  ;;  %v1324_v26 = vmax.f32 %v1238_v13, 0.0  ;;  %v1293_v13 = vmax.f32 %v1113_v35, 0.0  ;;  %v1325_v9 = vmax.f32 %v1241_v24, 0.0  ;;  %v1137_v35 = vadd.f32 %v3547_v46, %v4469_v16 }
 0x137   : > { %v4699_v23 = vpop.f32.mrf.mxu1  ;;  %v1129_v46 = vadd.f32 %v1128_v41, %v4461_v15 }
 0x138   : > { %v1501_v34 = vsel %vm1332_vm2, %v1324_v26, 0.0  ;;  %v1296_v26 = vmax.f32 %v1126_v1, 0.0  ;;  %v1408_v38 = vsel %vm1332_vm2, %v1293_v13, 0.0  ;;  %v1299_v1 = vmax.f32 %v1137_v35, 0.0 }
 0x139   : > { %v4704_v42 = vpop.f32.mrf.mxu1  ;;  %1412 = vadd.xlane.f32.xlu1 %v1411_v37  ;;  %v4718_v37 = vpop.permute.xlu0 %690  ;;  %v1504_v13 = vsel %vm1332_vm2, %v1325_v9, 0.0 }
 0x13a   : > { %1397 = vadd.xlane.f32.xlu0 %v1396_v28  ;;  %6188 = vst [vmem:[#allocation52_spill] sm:$0xff] %v4718_v37  ;;  %v1417_v14 = vsel %vm1332_vm2, %v1296_v26, 0.0  ;;  %v1426_v26 = vsel %vm1332_vm2, %v1299_v1, 0.0 }
 0x13b   : > { %v4708_v17 = vpop.f32.mrf.mxu1 }
 0x13d   : > { %v4713_v12 = vpop.f32.mrf.mxu1  ;;  %1406 = vadd.xlane.f32.xlu1 %v1405_v33  ;;  %v4733_v48 = vpop.permute.xlu0 %700 }
 0x13e   : > { %1493 = vadd.xlane.f32.xlu0 %v1492_v21  ;;  %v1246_v21 = vadd.f32 %v4572_v27, %v4718_v37  ;;  %6189 = vst [vmem:[#allocation53_spill] sm:$0xff] %v4733_v48  ;;  %v1254_v24 = vadd.f32 %v4598_v0, %v4733_v48  ;;  %v1297_v48 = vmax.f32 %v1129_v46, 0.0 }
 0x13f   : > { %v4720_v28 = vpop.f32.mrf.mxu1 }
 0x140   : > { %v1326_v27 = vmax.f32 %v1246_v21, 0.0  ;;  %v1328_v41 = vmax.f32 %v1254_v24, 0.0 }
 0x141   : > { %v4726_v56 = vpop.f32.mrf.mxu1  ;;  %1502 = vadd.xlane.f32.xlu1 %v1501_v34  ;;  %v4740_v34 = vpop.permute.xlu1 %695 }
 0x142   : > { %1415 = vadd.xlane.f32.xlu0 %v1414_v36  ;;  %v1249_v21 = vadd.f32 %v4582_v25, %v4740_v34  ;;  %v1507_v9 = vsel %vm1332_vm2, %v1326_v27, 0.0  ;;  %v1513_v46 = vsel %vm1332_vm2, %v1328_v41, 0.0  ;;  %v1420_v27 = vsel %vm1332_vm2, %v1297_v48, 0.0 }
 0x143   : > { %v4729_v33 = vpop.f32.mrf.mxu1 }
 0x145   : > { %v4736_v3 = vpop.f32.mrf.mxu1  ;;  %1424 = vadd.xlane.f32.xlu1 %v1423_v40  ;;  %v4751_v40 = vpop.permute.xlu0 %710 }
 0x146   : > { %1409 = vadd.xlane.f32.xlu0 %v1408_v38  ;;  %6190 = vst [vmem:[#allocation54_spill] sm:$0xff] %v4751_v40  ;;  %v1262_v0 = vadd.f32 %v4594_v32, %v4751_v40  ;;  %v4759_v35 = vpop.permute.xlu1 %705  ;;  %v1629_v32 = vadd.f32 %v4620_v58, %v4335_v51  ;;  %v4775_v40 = vpop.f32.mrf.mxu0  ;;  %v1637_v58 = vadd.f32 %v4616_v22, %v4333_v50 }
 0x147   : > { %v4742_v36 = vpop.f32.mrf.mxu1  ;;  %6191 = vst [vmem:[#allocation55_spill] sm:$0xff] %v4759_v35  ;;  %v1257_v25 = vadd.f32 %v4612_v29, %v4759_v35  ;;  %6192 = vst [vmem:[#allocation56_spill] sm:$0xff] %v4775_v40  ;;  %v1645_v22 = vadd.f32 %v4642_v47, %v4351_v55 }
 0x148   : > { %v1330_v15 = vmax.f32 %v1262_v0, 0.0  ;;  %v1885_v35 = vmax.f32 %v1637_v58, 0.0 }
 0x149   : > { %v4747_v37 = vpop.f32.mrf.mxu1  ;;  %1418 = vadd.xlane.f32.xlu1 %v1417_v14  ;;  %v1329_v0 = vmax.f32 %v1257_v25, 0.0  ;;  %v1887_v47 = vmax.f32 %v1645_v22, 0.0 }
 0x14a   : > { %1505 = vadd.xlane.f32.xlu0 %v1504_v13  ;;  %v1327_v13 = vmax.f32 %v1249_v21, 0.0  ;;  %v4777_v1 = vpop.permute.xlu1 %715  ;;  %v1519_v48 = vsel %vm1332_vm2, %v1330_v15, 0.0 }
 0x14b   : > { %v4753_v38 = vpop.f32.mrf.mxu1  ;;  %v1265_v29 = vadd.f32 %v4604_v39, %v4777_v1  ;;  %v1632_v39 = vadd.f32 %v4634_v45, %v4343_v53  ;;  %v1653_v45 = vadd.f32 %v4638_v4, %v4359_v59  ;;  %v1661_v4 = vadd.f32 %v4664_v11, %v4367_v61 }
 0x14c   : > { %v1510_v41 = vsel %vm1332_vm2, %v1327_v13, 0.0  ;;  %v1516_v13 = vsel %vm1332_vm2, %v1329_v0, 0.0 }
 0x14d   : > { %v4761_v16 = vpop.f32.mrf.mxu1  ;;  %1508 = vadd.xlane.f32.xlu1 %v1507_v9  ;;  %v1883_v9 = vmax.f32 %v1629_v32, 0.0  ;;  %v1331_v40 = vmax.f32 %v1265_v29, 0.0  ;;  %v1640_v29 = vadd.f32 %v4626_v31, %v4341_v52  ;;  %v1884_v58 = vmax.f32 %v1632_v39, 0.0 }
 0x14e   : > { %1427 = vadd.xlane.f32.xlu0 %v1426_v26  ;;  %v1648_v31 = vadd.f32 %v4656_v19, %v4349_v54  ;;  %v1959_v39 = vsel %vm1332_vm2, %v1887_v47, 0.0 }
 0x14f   : > { %v4765_v14 = vpop.f32.mrf.mxu1  ;;  %v1947_v15 = vsel %vm1332_vm2, %v1883_v9, 0.0  ;;  %v1522_v9 = vsel %vm1332_vm2, %v1331_v40, 0.0 }
 0x150   : > { %v1888_v19 = vmax.f32 %v1648_v31, 0.0 }
 0x151   : > { %v4771_v24 = vpop.f32.mrf.mxu1  ;;  %1514 = vadd.xlane.f32.xlu1 %v1513_v46  ;;  %v4789_v46 = vpop.f32.mrf.mxu0 }
 0x152   : > { %1421 = vadd.xlane.f32.xlu0 %v1420_v27  ;;  %v1962_v31 = vsel %vm1332_vm2, %v1888_v19, 0.0 }
 0x153   : > { %v4779_v21 = vpop.f32.mrf.mxu1  ;;  %v4801_v32 = vpop.f32.mrf.mxu0 }
 0x155   : > { %v4785_v26 = vpop.f32.mrf.mxu1  ;;  %1520 = vadd.xlane.f32.xlu1 %v1519_v48  ;;  %v4811_v55 = vpop.f32.mrf.mxu0 }
 0x156   : > { %1511 = vadd.xlane.f32.xlu0 %v1510_v41  ;;  %v1953_v41 = vsel %vm1332_vm2, %v1885_v35, 0.0  ;;  %v1950_v35 = vsel %vm1332_vm2, %v1884_v58, 0.0 }
 0x157   : > { %v4791_v27 = vpop.f32.mrf.mxu1  ;;  %v4821_v22 = vpop.f32.mrf.mxu0 }
 0x159   : > { %v4797_v25 = vpop.f32.mrf.mxu1  ;;  %1948 = vadd.xlane.f32.xlu1 %v1947_v15  ;;  %v1886_v15 = vmax.f32 %v1640_v29, 0.0  ;;  %v1656_v29 = vadd.f32 %v4648_v49, %v4357_v57 }
 0x15a   : > { %1517 = vadd.xlane.f32.xlu0 %v1516_v13  ;;  %v1889_v13 = vmax.f32 %v1653_v45, 0.0  ;;  %v1669_v45 = vadd.f32 %v4660_v30, %v4375_v62  ;;  %v1664_v30 = vadd.f32 %v4676_v2, %v4365_v60  ;;  %v1672_v2 = vadd.f32 %v4670_v18, %v4373_v6  ;;  %v6200_v6 = vld [vmem:[#allocation6_spill] sm:$0xff] }
 0x15b   : > { %v4803_v48 = vpop.f32.mrf.mxu1  ;;  %v1956_v47 = vsel %vm1332_vm2, %v1886_v15, 0.0  ;;  %v1890_v49 = vmax.f32 %v1656_v29, 0.0 }
 0x15c   : > { %v1965_v11 = vsel %vm1332_vm2, %v1889_v13, 0.0  ;;  %v1893_v57 = vmax.f32 %v1669_v45, 0.0  ;;  %v1677_v13 = vadd.f32 %v4684_v5, %v4383_v63  ;;  %v6197_v45 = vld [vmem:[#allocation9_spill] sm:$0xff]  ;;  %v1894_v18 = vmax.f32 %v1672_v2, 0.0 }
 0x15d   : > { %v4813_v0 = vpop.f32.mrf.mxu1  ;;  %1954 = vadd.xlane.f32.xlu1 %v1953_v41  ;;  %v1891_v41 = vmax.f32 %v1661_v4, 0.0  ;;  %v1685_v5 = vadd.f32 %v4680_v10, %v6197_v45  ;;  %v1680_v10 = vadd.f32 %v4694_v43, %v6200_v6 }
 0x15e   : > { %1523 = vadd.xlane.f32.xlu0 %v1522_v9  ;;  %v4831_v9 = vpop.f32.mrf.mxu0  ;;  %v1977_v19 = vsel %vm1332_vm2, %v1893_v57, 0.0 }
 0x15f   : > { %v4823_v40 = vpop.f32.mrf.mxu1  ;;  %v1971_v15 = vsel %vm1332_vm2, %v1891_v41, 0.0  ;;  %v1895_v41 = vmax.f32 %v1677_v13, 0.0 }
 0x160   : > { %v4845_v4 = vpop.f32.mrf.mxu0 }
 0x161   : > { %1960 = vadd.xlane.f32.xlu1 %v1959_v39  ;;  %v4833_v58 = vpop.f32.mrf.mxu1 }
 0x162   : > { %1951 = vadd.xlane.f32.xlu0 %v1950_v35  ;;  %v4859_v63 = vpop.f32.mrf.mxu0 }
 0x164   : > { %v4873_v45 = vpop.f32.mrf.mxu0 }
 0x165   : > { %1966 = vadd.xlane.f32.xlu1 %v1965_v11  ;;  %v4847_v11 = vpop.f32.mrf.mxu1 }
 0x166   : > { %1957 = vadd.xlane.f32.xlu0 %v1956_v47  ;;  %v4835_v39 = vpop.xlane.xlu1 %1436  ;;  %v4887_v6 = vpop.f32.mrf.mxu0 }
 0x167   : > { %6193 = vst [vmem:[#allocation57_spill] sm:$0xff] %v4835_v39  ;;  %v4837_v35 = vpop.xlane.xlu0 %1340  ;;  %v1892_v39 = vmax.f32 %v1664_v30, 0.0  ;;  %v6201_v30 = vld [vmem:[#allocation11_spill] sm:$0xff] }
 0x168   : > { %6194 = vst [vmem:[#allocation58_spill] sm:$0xff] %v4837_v35  ;;  %v1968_v35 = vsel %vm1332_vm2, %v1890_v49, 0.0  ;;  %v1693_v57 = vadd.f32 %v4704_v42, %v6201_v30  ;;  %v1983_v49 = vsel %vm1332_vm2, %v1895_v41, 0.0  ;;  %v1980_v30 = vsel %vm1332_vm2, %v1894_v18, 0.0 }
 0x169   : > { %1972 = vadd.xlane.f32.xlu1 %v1971_v15  ;;  %v4861_v15 = vpop.f32.mrf.mxu1  ;;  %v1974_v13 = vsel %vm1332_vm2, %v1892_v39, 0.0 }
 0x16a   : > { %1963 = vadd.xlane.f32.xlu0 %v1962_v31  ;;  %v4849_v47 = vpop.xlane.xlu1 %1430  ;;  %v1899_v41 = vmax.f32 %v1693_v57, 0.0 }
 0x16b   : > { %6195 = vst [vmem:[#allocation59_spill] sm:$0xff] %v4849_v47  ;;  %v4851_v29 = vpop.xlane.xlu0 %1334 }
 0x16c   : > { %6196 = vst [vmem:[#allocation60_spill] sm:$0xff] %v4851_v29  ;;  %v1897_v29 = vmax.f32 %v1685_v5, 0.0  ;;  %v6204_v5 = vld [vmem:[#allocation8_spill] sm:$0xff]  ;;  %v1995_v18 = vsel %vm1332_vm2, %v1899_v41, 0.0 }
 0x16d   : > { %1978 = vadd.xlane.f32.xlu1 %v1977_v19  ;;  %v4875_v19 = vpop.f32.mrf.mxu1  ;;  %v1688_v43 = vadd.f32 %v4688_v20, %v6204_v5  ;;  %v6208_v5 = vld [vmem:[#allocation10_spill] sm:$0xff] }
 0x16e   : > { %1969 = vadd.xlane.f32.xlu0 %v1968_v35  ;;  %v4863_v31 = vpop.xlane.xlu1 %1337  ;;  %v1989_v39 = vsel %vm1332_vm2, %v1897_v29, 0.0 }
 0x16f   : > { %6198 = vst [vmem:[#allocation61_spill] sm:$0xff] %v4863_v31  ;;  %v4865_v47 = vpop.xlane.xlu0 %1343  ;;  %v1896_v31 = vmax.f32 %v1680_v10, 0.0  ;;  %v1898_v20 = vmax.f32 %v1688_v43, 0.0  ;;  %v6209_v10 = vld [vmem:[#allocation14_spill] sm:$0xff] }
 0x170   : > { %6199 = vst [vmem:[#allocation62_spill] sm:$0xff] %v4865_v47  ;;  %v6205_v47 = vld [vmem:[#allocation12_spill] sm:$0xff]  ;;  %v1709_v29 = vadd.f32 %v4726_v56, %v6209_v10 }
 0x171   : > { %1984 = vadd.xlane.f32.xlu1 %v1983_v49  ;;  %v1701_v42 = vadd.f32 %v4699_v23, %v6205_v47  ;;  %v4889_v49 = vpop.f32.mrf.mxu1  ;;  %v1696_v23 = vadd.f32 %v4713_v12, %v6208_v5  ;;  %v1986_v57 = vsel %vm1332_vm2, %v1896_v31, 0.0  ;;  %v4901_v47 = vpop.f32.mrf.mxu0  ;;  %v1992_v10 = vsel %vm1332_vm2, %v1898_v20, 0.0 }
 0x172   : > { %1975 = vadd.xlane.f32.xlu0 %v1974_v13  ;;  %v4877_v35 = vpop.xlane.xlu1 %1352  ;;  %v1903_v41 = vmax.f32 %v1709_v29, 0.0 }
 0x173   : > { %6202 = vst [vmem:[#allocation63_spill] sm:$0xff] %v4877_v35  ;;  %v4879_v2 = vpop.xlane.xlu0 %1439  ;;  %v1901_v35 = vmax.f32 %v1701_v42, 0.0  ;;  %v6212_v42 = vld [vmem:[#allocation13_spill] sm:$0xff]  ;;  %v4915_v5 = vpop.f32.mrf.mxu0 }
 0x174   : > { %6203 = vst [vmem:[#allocation64_spill] sm:$0xff] %v4879_v2  ;;  %v1704_v12 = vadd.f32 %v4708_v17, %v6212_v42  ;;  %v2007_v20 = vsel %vm1332_vm2, %v1903_v41, 0.0 }
 0x175   : > { %1990 = vadd.xlane.f32.xlu1 %v1989_v39  ;;  %v4903_v39 = vpop.f32.mrf.mxu1  ;;  %v2001_v31 = vsel %vm1332_vm2, %v1901_v35, 0.0  ;;  %v1725_v35 = vadd.f32 %v4747_v37, %v4427_v8  ;;  %v4929_v29 = vpop.f32.mrf.mxu0 }
 0x176   : > { %1981 = vadd.xlane.f32.xlu0 %v1980_v30  ;;  %v4891_v13 = vpop.xlane.xlu1 %1448  ;;  %v1902_v17 = vmax.f32 %v1704_v12, 0.0 }
 0x177   : > { %6206 = vst [vmem:[#allocation65_spill] sm:$0xff] %v4891_v13  ;;  %v4893_v2 = vpop.xlane.xlu0 %1433  ;;  %v6213_v13 = vld [vmem:[#allocation16_spill] sm:$0xff]  ;;  %v1907_v41 = vmax.f32 %v1725_v35, 0.0 }
 0x178   : > { %6207 = vst [vmem:[#allocation66_spill] sm:$0xff] %v4893_v2  ;;  %v1717_v56 = vadd.f32 %v4720_v28, %v6213_v13  ;;  %v1900_v2 = vmax.f32 %v1696_v23, 0.0  ;;  %v1712_v28 = vadd.f32 %v4736_v3, %v4419_v7  ;;  %v2004_v8 = vsel %vm1332_vm2, %v1902_v17, 0.0  ;;  %v4943_v7 = vpop.f32.mrf.mxu0 }
 0x179   : > { %1996 = vadd.xlane.f32.xlu1 %v1995_v18  ;;  %v4917_v18 = vpop.f32.mrf.mxu1  ;;  %v2019_v17 = vsel %vm1332_vm2, %v1907_v41, 0.0 }
 0x17a   : > { %1987 = vadd.xlane.f32.xlu0 %v1986_v57  ;;  %v4905_v30 = vpop.xlane.xlu1 %1346  ;;  %v1998_v23 = vsel %vm1332_vm2, %v1900_v2, 0.0  ;;  %v4957_v35 = vpop.f32.mrf.mxu0 }
 0x17b   : > { %6210 = vst [vmem:[#allocation67_spill] sm:$0xff] %v4905_v30  ;;  %v4907_v43 = vpop.xlane.xlu0 %1355  ;;  %v1905_v30 = vmax.f32 %v1717_v56, 0.0  ;;  %v6218_v56 = vld [vmem:[#allocation18_spill] sm:$0xff] }
 0x17c   : > { %6211 = vst [vmem:[#allocation68_spill] sm:$0xff] %v4907_v43  ;;  %v1720_v3 = vadd.f32 %v4729_v33, %v6218_v56  ;;  %v6222_v56 = vld [vmem:[#allocation20_spill] sm:$0xff] }
 0x17d   : > { %2002 = vadd.xlane.f32.xlu1 %v2001_v31  ;;  %v4931_v31 = vpop.f32.mrf.mxu1  ;;  %v2013_v2 = vsel %vm1332_vm2, %v1905_v30, 0.0  ;;  %v1741_v30 = vadd.f32 %v4771_v24, %v4447_v44 }
 0x17e   : > { %1993 = vadd.xlane.f32.xlu0 %v1992_v10  ;;  %v4919_v57 = vpop.xlane.xlu1 %1442  ;;  %v1906_v33 = vmax.f32 %v1720_v3, 0.0 }
 0x17f   : > { %6214 = vst [vmem:[#allocation13_spill] sm:$0xff] %v4919_v57  ;;  %v4921_v43 = vpop.xlane.xlu0 %1451  ;;  %v1904_v57 = vmax.f32 %v1712_v28, 0.0  ;;  %v1911_v41 = vmax.f32 %v1741_v30, 0.0 }
 0x180   : > { %6215 = vst [vmem:[#allocation16_spill] sm:$0xff] %v4921_v43  ;;  %v6219_v43 = vld [vmem:[#allocation19_spill] sm:$0xff]  ;;  %v2016_v44 = vsel %vm1332_vm2, %v1906_v33, 0.0 }
 0x181   : > { %2008 = vadd.xlane.f32.xlu1 %v2007_v20  ;;  %v1733_v37 = vadd.f32 %v4742_v36, %v6219_v43  ;;  %v4945_v20 = vpop.f32.mrf.mxu1  ;;  %v1728_v36 = vadd.f32 %v4761_v16, %v6222_v56  ;;  %v2010_v28 = vsel %vm1332_vm2, %v1904_v57, 0.0  ;;  %v4971_v56 = vpop.f32.mrf.mxu0  ;;  %v2031_v33 = vsel %vm1332_vm2, %v1911_v41, 0.0 }
 0x182   : > { %1999 = vadd.xlane.f32.xlu0 %v1998_v23  ;;  %v4933_v10 = vpop.xlane.xlu1 %1364 }
 0x183   : > { %6216 = vst [vmem:[#allocation69_spill] sm:$0xff] %v4933_v10  ;;  %v4935_v12 = vpop.xlane.xlu0 %1349 }
 0x184   : > { %6217 = vst [vmem:[#allocation70_spill] sm:$0xff] %v4935_v12  ;;  %v1909_v12 = vmax.f32 %v1733_v37, 0.0  ;;  %v6225_v37 = vld [vmem:[#allocation22_spill] sm:$0xff] }
 0x185   : > { %2014 = vadd.xlane.f32.xlu1 %v2013_v2  ;;  %v4959_v2 = vpop.f32.mrf.mxu1  ;;  %v1736_v16 = vadd.f32 %v4753_v38, %v6225_v37  ;;  %v6229_v37 = vld [vmem:[#allocation24_spill] sm:$0xff] }
 0x186   : > { %2005 = vadd.xlane.f32.xlu0 %v2004_v8  ;;  %v4947_v23 = vpop.xlane.xlu1 %1460  ;;  %v2025_v57 = vsel %vm1332_vm2, %v1909_v12, 0.0 }
 0x187   : > { %6220 = vst [vmem:[#allocation19_spill] sm:$0xff] %v4947_v23  ;;  %v4949_v10 = vpop.xlane.xlu0 %1445  ;;  %v6226_v23 = vld [vmem:[#allocation23_spill] sm:$0xff]  ;;  %v1910_v38 = vmax.f32 %v1736_v16, 0.0 }
 0x188   : > { %6221 = vst [vmem:[#allocation71_spill] sm:$0xff] %v4949_v10  ;;  %v1749_v24 = vadd.f32 %v4765_v14, %v6226_v23  ;;  %v1908_v10 = vmax.f32 %v1728_v36, 0.0  ;;  %v1744_v14 = vadd.f32 %v4785_v26, %v6229_v37  ;;  %v6230_v36 = vld [vmem:[#allocation25_spill] sm:$0xff]  ;;  %v4985_v23 = vpop.f32.mrf.mxu0 }
 0x189   : > { %2020 = vadd.xlane.f32.xlu1 %v2019_v17  ;;  %v4973_v17 = vpop.f32.mrf.mxu1  ;;  %v1757_v12 = vadd.f32 %v4797_v25, %v6230_v36  ;;  %v2028_v36 = vsel %vm1332_vm2, %v1910_v38, 0.0 }
 0x18a   : > { %2011 = vadd.xlane.f32.xlu0 %v2010_v28  ;;  %v4961_v8 = vpop.xlane.xlu1 %1358  ;;  %v2022_v30 = vsel %vm1332_vm2, %v1908_v10, 0.0  ;;  %v4999_v37 = vpop.f32.mrf.mxu0 }
 0x18b   : > { %6223 = vst [vmem:[#allocation72_spill] sm:$0xff] %v4961_v8  ;;  %v4963_v3 = vpop.xlane.xlu0 %1367  ;;  %v1913_v8 = vmax.f32 %v1749_v24, 0.0  ;;  %v6233_v24 = vld [vmem:[#allocation26_spill] sm:$0xff]  ;;  %v1915_v41 = vmax.f32 %v1757_v12, 0.0 }
 0x18c   : > { %6224 = vst [vmem:[#allocation73_spill] sm:$0xff] %v4963_v3  ;;  %v1752_v26 = vadd.f32 %v4779_v21, %v6233_v24  ;;  %v6237_v24 = vld [vmem:[#allocation28_spill] sm:$0xff] }
 0x18d   : > { %2026 = vadd.xlane.f32.xlu1 %v2025_v57  ;;  %v4987_v57 = vpop.f32.mrf.mxu1  ;;  %v2037_v10 = vsel %vm1332_vm2, %v1913_v8, 0.0  ;;  %v2043_v38 = vsel %vm1332_vm2, %v1915_v41, 0.0 }
 0x18e   : > { %2017 = vadd.xlane.f32.xlu0 %v2016_v44  ;;  %v4975_v28 = vpop.xlane.xlu1 %1454  ;;  %v1914_v21 = vmax.f32 %v1752_v26, 0.0 }
 0x18f   : > { %6227 = vst [vmem:[#allocation74_spill] sm:$0xff] %v4975_v28  ;;  %v4977_v3 = vpop.xlane.xlu0 %1463  ;;  %v1912_v28 = vmax.f32 %v1744_v14, 0.0  ;;  %v6238_v14 = vld [vmem:[#allocation30_spill] sm:$0xff] }
 0x190   : > { %6228 = vst [vmem:[#allocation75_spill] sm:$0xff] %v4977_v3  ;;  %v6234_v3 = vld [vmem:[#allocation27_spill] sm:$0xff]  ;;  %v1773_v8 = vadd.f32 %v4833_v58, %v6238_v14 }
 0x191   : > { %2032 = vadd.xlane.f32.xlu1 %v2031_v33  ;;  %v1765_v25 = vadd.f32 %v4791_v27, %v6234_v3  ;;  %v5001_v33 = vpop.f32.mrf.mxu1  ;;  %v1760_v27 = vadd.f32 %v4813_v0, %v6237_v24  ;;  %v2034_v12 = vsel %vm1332_vm2, %v1912_v28, 0.0  ;;  %v5013_v3 = vpop.f32.mrf.mxu0 }
 0x192   : > { %2023 = vadd.xlane.f32.xlu0 %v2022_v30  ;;  %v4989_v44 = vpop.xlane.xlu1 %1376  ;;  %v1919_v28 = vmax.f32 %v1773_v8, 0.0 }
 0x193   : > { %6231 = vst [vmem:[#allocation76_spill] sm:$0xff] %v4989_v44  ;;  %v4991_v16 = vpop.xlane.xlu0 %1361  ;;  %v1916_v58 = vmax.f32 %v1760_v27, 0.0  ;;  %v5027_v24 = vpop.f32.mrf.mxu0 }
 0x194   : > { %6232 = vst [vmem:[#allocation77_spill] sm:$0xff] %v4991_v16  ;;  %v1917_v16 = vmax.f32 %v1765_v25, 0.0  ;;  %v6241_v25 = vld [vmem:[#allocation29_spill] sm:$0xff] }
 0x195   : > { %2038 = vadd.xlane.f32.xlu1 %v2037_v10  ;;  %v5015_v10 = vpop.f32.mrf.mxu1  ;;  %v1768_v0 = vadd.f32 %v4803_v48, %v6241_v25  ;;  %v6246_v25 = vld [vmem:[#allocation34_spill] sm:$0xff]  ;;  %v2046_v8 = vsel %vm1332_vm2, %v1916_v58, 0.0 }
 0x196   : > { %2029 = vadd.xlane.f32.xlu0 %v2028_v36  ;;  %v5003_v30 = vpop.xlane.xlu1 %1472  ;;  %v2049_v14 = vsel %vm1332_vm2, %v1917_v16, 0.0  ;;  %v2055_v16 = vsel %vm1332_vm2, %v1919_v28, 0.0 }
 0x197   : > { %6235 = vst [vmem:[#allocation78_spill] sm:$0xff] %v5003_v30  ;;  %v5005_v44 = vpop.xlane.xlu0 %1457  ;;  %v2040_v30 = vsel %vm1332_vm2, %v1914_v21, 0.0  ;;  %v1918_v48 = vmax.f32 %v1768_v0, 0.0 }
 0x198   : > { %6236 = vst [vmem:[#allocation79_spill] sm:$0xff] %v5005_v44  ;;  %v6242_v44 = vld [vmem:[#allocation31_spill] sm:$0xff] }
 0x199   : > { %2044 = vadd.xlane.f32.xlu1 %v2043_v38  ;;  %v1781_v41 = vadd.f32 %v4823_v40, %v6242_v44  ;;  %v5029_v38 = vpop.f32.mrf.mxu1  ;;  %v1789_v40 = vadd.f32 %v4889_v49, %v6246_v25  ;;  %v5041_v44 = vpop.f32.mrf.mxu0  ;;  %v2052_v25 = vsel %vm1332_vm2, %v1918_v48, 0.0 }
 0x19a   : > { %2035 = vadd.xlane.f32.xlu0 %v2034_v12  ;;  %v5017_v36 = vpop.xlane.xlu1 %1370 }
 0x19b   : > { %6239 = vst [vmem:[#allocation80_spill] sm:$0xff] %v5017_v36  ;;  %v5019_v26 = vpop.xlane.xlu0 %1379  ;;  %v6245_v36 = vld [vmem:[#allocation32_spill] sm:$0xff]  ;;  %v1921_v27 = vmax.f32 %v1781_v41, 0.0  ;;  %v1923_v28 = vmax.f32 %v1789_v40, 0.0  ;;  %v6254_v40 = vld [vmem:[#allocation38_spill] sm:$0xff] }
 0x19c   : > { %6240 = vst [vmem:[#allocation81_spill] sm:$0xff] %v5019_v26  ;;  %v1776_v21 = vadd.f32 %v4861_v15, %v6245_v36  ;;  %v5055_v36 = vpop.f32.mrf.mxu0 }
 0x19d   : > { %2050 = vadd.xlane.f32.xlu1 %v2049_v14  ;;  %v5043_v14 = vpop.f32.mrf.mxu1  ;;  %v2061_v58 = vsel %vm1332_vm2, %v1921_v27, 0.0  ;;  %v1805_v27 = vadd.f32 %v4945_v20, %v6254_v40  ;;  %v2067_v48 = vsel %vm1332_vm2, %v1923_v28, 0.0 }
 0x19e   : > { %2041 = vadd.xlane.f32.xlu0 %v2040_v30  ;;  %v5031_v12 = vpop.xlane.xlu1 %1466  ;;  %v1920_v41 = vmax.f32 %v1776_v21, 0.0 }
 0x19f   : > { %6243 = vst [vmem:[#allocation82_spill] sm:$0xff] %v5031_v12  ;;  %v5033_v26 = vpop.xlane.xlu0 %1475  ;;  %v6250_v12 = vld [vmem:[#allocation35_spill] sm:$0xff]  ;;  %v1927_v20 = vmax.f32 %v1805_v27, 0.0 }
 0x1a0   : > { %6244 = vst [vmem:[#allocation83_spill] sm:$0xff] %v5033_v26  ;;  %v6249_v26 = vld [vmem:[#allocation33_spill] sm:$0xff]  ;;  %v1797_v49 = vadd.f32 %v4875_v19, %v6250_v12  ;;  %v5067_v12 = vpop.f32.mrf.mxu0 }
 0x1a1   : > { %2056 = vadd.xlane.f32.xlu1 %v2055_v16  ;;  %v1784_v15 = vadd.f32 %v4847_v11, %v6249_v26  ;;  %v1836_v16 = vpop.f32.mrf.mxu1  ;;  %v2058_v11 = vsel %vm1332_vm2, %v1920_v41, 0.0  ;;  %v6253_v26 = vld [vmem:[#allocation36_spill] sm:$0xff]  ;;  %v6257_v41 = vld [vmem:[#allocation37_spill] sm:$0xff] }
 0x1a2   : > { %2047 = vadd.xlane.f32.xlu0 %v2046_v8  ;;  %v5045_v30 = vpop.xlane.xlu1 %1388  ;;  %v1925_v21 = vmax.f32 %v1797_v49, 0.0  ;;  %v1792_v19 = vadd.f32 %v4917_v18, %v6253_v26  ;;  %v1800_v49 = vadd.f32 %v4903_v39, %v6257_v41  ;;  %v5081_v26 = vpop.f32.mrf.mxu0  ;;  %v6261_v41 = vld [vmem:[#allocation40_spill] sm:$0xff] }
 0x1a3   : > { %6247 = vst [vmem:[#allocation84_spill] sm:$0xff] %v5045_v30  ;;  %v5047_v0 = vpop.xlane.xlu0 %1373 }
 0x1a4   : > { %6248 = vst [vmem:[#allocation85_spill] sm:$0xff] %v5047_v0  ;;  %v1922_v0 = vmax.f32 %v1784_v15, 0.0  ;;  %v2073_v28 = vsel %vm1332_vm2, %v1925_v21, 0.0  ;;  %v2079_v21 = vsel %vm1332_vm2, %v1927_v20, 0.0 }
 0x1a5   : > { %2062 = vadd.xlane.f32.xlu1 %v2061_v58  ;;  %v5069_v58 = vpop.f32.mrf.mxu1 }
 0x1a6   : > { %2053 = vadd.xlane.f32.xlu0 %v2052_v25  ;;  %v5057_v8 = vpop.xlane.xlu1 %1484  ;;  %v2064_v40 = vsel %vm1332_vm2, %v1922_v0, 0.0 }
 0x1a7   : > { %6251 = vst [vmem:[#allocation86_spill] sm:$0xff] %v5057_v8  ;;  %v5059_v30 = vpop.xlane.xlu0 %1469  ;;  %v6258_v8 = vld [vmem:[#allocation39_spill] sm:$0xff] }
 0x1a8   : > { %6252 = vst [vmem:[#allocation87_spill] sm:$0xff] %v5059_v30  ;;  %v1813_v18 = vadd.f32 %v4931_v31, %v6258_v8  ;;  %v1924_v30 = vmax.f32 %v1792_v19, 0.0  ;;  %v1808_v31 = vadd.f32 %v4973_v17, %v6261_v41  ;;  %v6262_v19 = vld [vmem:[#allocation42_spill] sm:$0xff]  ;;  %v5093_v8 = vpop.f32.mrf.mxu0  ;;  %v6267_v17 = vld [vmem:[#allocation43_spill] sm:$0xff] }
 0x1a9   : > { %2068 = vadd.xlane.f32.xlu1 %v2067_v48  ;;  %v1839_v48 = vpop.f32.mrf.mxu1  ;;  %v1821_v27 = vadd.f32 %v5001_v33, %v6262_v19  ;;  %6263 = vst [vmem:[#allocation92_spill] sm:$0xff] %v5093_v8 }
 0x1aa   : > { %2059 = vadd.xlane.f32.xlu0 %v2058_v11  ;;  %v5071_v25 = vpop.xlane.xlu1 %1382  ;;  %v1929_v39 = vmax.f32 %v1813_v18, 0.0  ;;  %v2070_v0 = vsel %vm1332_vm2, %v1924_v30, 0.0  ;;  %v1928_v33 = vmax.f32 %v1808_v31, 0.0  ;;  %v5105_v41 = vpop.f32.mrf.mxu0  ;;  %v6271_v31 = vld [vmem:[#allocation46_spill] sm:$0xff] }
 0x1ab   : > { %6255 = vst [vmem:[#allocation88_spill] sm:$0xff] %v5071_v25  ;;  %v5073_v15 = vpop.xlane.xlu0 %1391  ;;  %v1926_v25 = vmax.f32 %v1800_v49, 0.0  ;;  %v6266_v49 = vld [vmem:[#allocation41_spill] sm:$0xff]  ;;  %v1931_v19 = vmax.f32 %v1821_v27, 0.0  ;;  %v1837_v27 = vadd.f32 %v1836_v16, %v6271_v31 }
 0x1ac   : > { %6256 = vst [vmem:[#allocation89_spill] sm:$0xff] %v5073_v15  ;;  %v1816_v18 = vadd.f32 %v4959_v2, %v6266_v49  ;;  %v2085_v20 = vsel %vm1332_vm2, %v1929_v39, 0.0  ;;  %v6270_v49 = vld [vmem:[#allocation44_spill] sm:$0xff] }
 0x1ad   : > { %2074 = vadd.xlane.f32.xlu1 %v2073_v28  ;;  %v3640_v28 = vpop.f32.mrf.mxu1  ;;  %v2076_v30 = vsel %vm1332_vm2, %v1926_v25, 0.0  ;;  %v2091_v39 = vsel %vm1332_vm2, %v1931_v19, 0.0  ;;  %v2082_v25 = vsel %vm1332_vm2, %v1928_v33, 0.0 }
 0x1ae   : > { %2065 = vadd.xlane.f32.xlu0 %v2064_v40  ;;  %v5083_v11 = vpop.xlane.xlu1 %1478 }
 0x1af   : > { %6259 = vst [vmem:[#allocation90_spill] sm:$0xff] %v5083_v11  ;;  %v5085_v15 = vpop.xlane.xlu0 %1487  ;;  %v1829_v11 = vadd.f32 %v4987_v57, %v6267_v17  ;;  %v1824_v57 = vadd.f32 %v5029_v38, %v6270_v49  ;;  %v5116_v17 = vpop.f32.mrf.mxu0 }
 0x1b0   : > { %6260 = vst [vmem:[#allocation91_spill] sm:$0xff] %v5085_v15 }
 0x1b1   : > { %2080 = vadd.xlane.f32.xlu1 %v2079_v21  ;;  %v1852_v21 = vpop.f32.mrf.mxu1  ;;  %v1933_v2 = vmax.f32 %v1829_v11, 0.0  ;;  %v1932_v16 = vmax.f32 %v1824_v57, 0.0  ;;  %v5128_v31 = vpop.f32.mrf.mxu0 }
 0x1b2   : > { %2071 = vadd.xlane.f32.xlu0 %v2070_v0  ;;  %v5095_v40 = vpop.xlane.xlu1 %1400 }
 0x1b3   : > { %6264 = vst [vmem:[#allocation93_spill] sm:$0xff] %v5095_v40  ;;  %v5097_v15 = vpop.xlane.xlu0 %1385  ;;  %v3641_v8 = vpop.f32.mrf.mxu1  ;;  %v2097_v19 = vsel %vm1332_vm2, %v1933_v2, 0.0  ;;  %v2094_v2 = vsel %vm1332_vm2, %v1932_v16, 0.0 }
 0x1b4   : > { %6265 = vst [vmem:[#allocation94_spill] sm:$0xff] %v5097_v15  ;;  %v1930_v15 = vmax.f32 %v1816_v18, 0.0  ;;  %v6274_v18 = vld [vmem:[#allocation45_spill] sm:$0xff] }
 0x1b5   : > { %2086 = vadd.xlane.f32.xlu1 %v2085_v20  ;;  %v1832_v11 = vadd.f32 %v5015_v10, %v6274_v18  ;;  %v6278_v18 = vld [vmem:[#allocation48_spill] sm:$0xff] }
 0x1b6   : > { %2077 = vadd.xlane.f32.xlu0 %v2076_v30  ;;  %v5107_v0 = vpop.xlane.xlu1 %1496  ;;  %v2088_v33 = vsel %vm1332_vm2, %v1930_v15, 0.0  ;;  %v1840_v49 = vadd.f32 %v1839_v48, %v6278_v18  ;;  %v5138_v15 = vpop.f32.mrf.mxu0 }
 0x1b7   : > { %6268 = vst [vmem:[#allocation95_spill] sm:$0xff] %v5107_v0  ;;  %v5109_v40 = vpop.xlane.xlu0 %1481  ;;  %v6275_v0 = vld [vmem:[#allocation47_spill] sm:$0xff] }
 0x1b8   : > { %6269 = vst [vmem:[#allocation96_spill] sm:$0xff] %v5109_v40  ;;  %v1845_v38 = vadd.f32 %v5043_v14, %v6275_v0  ;;  %v1935_v40 = vmax.f32 %v1837_v27, 0.0  ;;  %v6279_v14 = vld [vmem:[#allocation50_spill] sm:$0xff] }
 0x1b9   : > { %2092 = vadd.xlane.f32.xlu1 %v2091_v39  ;;  %v1855_v39 = vpop.f32.mrf.mxu1  ;;  %v1853_v57 = vadd.f32 %v1852_v21, %v6279_v14  ;;  %v5149_v14 = vpop.f32.mrf.mxu0 }
 0x1ba   : > { %2083 = vadd.xlane.f32.xlu0 %v2082_v25  ;;  %v5118_v20 = vpop.xlane.xlu1 %1394  ;;  %v1937_v10 = vmax.f32 %v1845_v38, 0.0  ;;  %v2103_v27 = vsel %vm1332_vm2, %v1935_v40, 0.0  ;;  %v6283_v38 = vld [vmem:[#allocation52_spill] sm:$0xff] }
 0x1bb   : > { %6272 = vst [vmem:[#allocation97_spill] sm:$0xff] %v5118_v20  ;;  %v5120_v30 = vpop.xlane.xlu0 %1403  ;;  %v1934_v20 = vmax.f32 %v1832_v11, 0.0  ;;  %v3644_v0 = vpop.f32.mrf.mxu1  ;;  %v1861_v48 = vadd.f32 %v3640_v28, %v6283_v38  ;;  %v1939_v21 = vmax.f32 %v1853_v57, 0.0  ;;  %v6287_v28 = vld [vmem:[#allocation53_spill] sm:$0xff] }
 0x1bc   : > { %6273 = vst [vmem:[#allocation98_spill] sm:$0xff] %v5120_v30  ;;  %v2109_v40 = vsel %vm1332_vm2, %v1937_v10, 0.0 }
 0x1bd   : > { %2098 = vadd.xlane.f32.xlu1 %v2097_v19  ;;  %v2100_v16 = vsel %vm1332_vm2, %v1934_v20, 0.0  ;;  %v1868_v18 = vpop.f32.mrf.mxu1  ;;  %v2115_v57 = vsel %vm1332_vm2, %v1939_v21, 0.0  ;;  %v5159_v20 = vpop.f32.mrf.mxu0 }
 0x1be   : > { %2089 = vadd.xlane.f32.xlu0 %v2088_v33  ;;  %v5130_v25 = vpop.xlane.xlu1 %1490 }
 0x1bf   : > { %6276 = vst [vmem:[#allocation99_spill] sm:$0xff] %v5130_v25  ;;  %v5132_v30 = vpop.xlane.xlu0 %1499  ;;  %v1936_v25 = vmax.f32 %v1840_v49, 0.0  ;;  %v1869_v49 = vadd.f32 %v1868_v18, %v6287_v28  ;;  %v3645_v38 = vpop.f32.mrf.mxu1 }
 0x1c0   : > { %6277 = vst [vmem:[#allocation100_spill] sm:$0xff] %v5132_v30  ;;  %v6282_v30 = vld [vmem:[#allocation49_spill] sm:$0xff] }
 0x1c1   : > { %2104 = vadd.xlane.f32.xlu1 %v2103_v27  ;;  %v1848_v11 = vadd.f32 %v5069_v58, %v6282_v30  ;;  %v6286_v58 = vld [vmem:[#allocation51_spill] sm:$0xff]  ;;  %v2106_v10 = vsel %vm1332_vm2, %v1936_v25, 0.0  ;;  %v5169_v25 = vpop.f32.mrf.mxu0  ;;  %v1871_v28 = vpop.f32.mrf.mxu1 }
 0x1c2   : > { %2095 = vadd.xlane.f32.xlu0 %v2094_v2  ;;  %v5140_v19 = vpop.xlane.xlu1 %1412  ;;  %v1856_v30 = vadd.f32 %v1855_v39, %v6286_v58 }
 0x1c3   : > { %6280 = vst [vmem:[#allocation101_spill] sm:$0xff] %v5140_v19  ;;  %v5142_v33 = vpop.xlane.xlu0 %1397  ;;  %v1938_v19 = vmax.f32 %v1848_v11, 0.0  ;;  %v1864_v11 = vadd.f32 %v3641_v8, %v4740_v34  ;;  %v2243_v8 = vadd.f32 %v4789_v46, %v4335_v51  ;;  %v1880_v46 = vadd.f32 %v3645_v38, %v4777_v1 }
 0x1c4   : > { %6281 = vst [vmem:[#allocation102_spill] sm:$0xff] %v5142_v33  ;;  %v1941_v33 = vmax.f32 %v1861_v48, 0.0  ;;  %v1940_v39 = vmax.f32 %v1856_v30, 0.0  ;;  %v6293_v30 = vld [vmem:[#allocation55_spill] sm:$0xff] }
 0x1c5   : > { %2110 = vadd.xlane.f32.xlu1 %v2109_v40  ;;  %v2112_v48 = vsel %vm1332_vm2, %v1938_v19, 0.0  ;;  %v2497_v51 = vmax.f32 %v2243_v8, 0.0 }
 0x1c6   : > { %2101 = vadd.xlane.f32.xlu0 %v2100_v16  ;;  %v5151_v27 = vpop.xlane.xlu1 %1406  ;;  %v2121_v21 = vsel %vm1332_vm2, %v1941_v33, 0.0  ;;  %v2118_v33 = vsel %vm1332_vm2, %v1940_v39, 0.0 }
 0x1c7   : > { %6284 = vst [vmem:[#allocation103_spill] sm:$0xff] %v5151_v27  ;;  %v5153_v2 = vpop.xlane.xlu0 %1493  ;;  %v1943_v27 = vmax.f32 %v1869_v49, 0.0  ;;  %v5180_v49 = vpop.f32.mrf.mxu0 }
 0x1c8   : > { %6285 = vst [vmem:[#allocation104_spill] sm:$0xff] %v5153_v2  ;;  %v6290_v2 = vld [vmem:[#allocation54_spill] sm:$0xff] }
 0x1c9   : > { %2116 = vadd.xlane.f32.xlu1 %v2115_v57  ;;  %v1877_v18 = vadd.f32 %v3644_v0, %v6290_v2  ;;  %v2127_v0 = vsel %vm1332_vm2, %v1943_v27, 0.0  ;;  %v5191_v39 = vpop.f32.mrf.mxu0 }
 0x1ca   : > { %2107 = vadd.xlane.f32.xlu0 %v2106_v10  ;;  %v5161_v40 = vpop.xlane.xlu1 %1502 }
 0x1cb   : > { %6288 = vst [vmem:[#allocation51_spill] sm:$0xff] %v5161_v40  ;;  %v5163_v16 = vpop.xlane.xlu0 %1415  ;;  %v1942_v40 = vmax.f32 %v1864_v11, 0.0  ;;  %v1945_v19 = vmax.f32 %v1877_v18, 0.0 }
 0x1cc   : > { %6289 = vst [vmem:[#allocation105_spill] sm:$0xff] %v5163_v16  ;;  %v1872_v16 = vadd.f32 %v1871_v28, %v6293_v30 }
 0x1cd   : > { %2122 = vadd.xlane.f32.xlu1 %v2121_v21  ;;  %v2133_v28 = vsel %vm1332_vm2, %v1945_v19, 0.0  ;;  %v2124_v27 = vsel %vm1332_vm2, %v1942_v40, 0.0  ;;  %v2561_v40 = vsel %vm1332_vm2, %v2497_v51, 0.0  ;;  %v5207_v19 = vpop.f32.mrf.mxu0 }
 0x1ce   : > { %2113 = vadd.xlane.f32.xlu0 %v2112_v48  ;;  %v5171_v57 = vpop.xlane.xlu1 %1424  ;;  %v1944_v11 = vmax.f32 %v1872_v16, 0.0  ;;  %v1946_v16 = vmax.f32 %v1880_v46, 0.0 }
 0x1cf   : > { %6291 = vst [vmem:[#allocation54_spill] sm:$0xff] %v5171_v57  ;;  %v5173_v10 = vpop.xlane.xlu0 %1409  ;;  %v6295_v57 = vld [vmem:[#allocation56_spill] sm:$0xff] }
 0x1d0   : > { %6292 = vst [vmem:[#allocation106_spill] sm:$0xff] %v5173_v10  ;;  %v2251_v10 = vadd.f32 %v6295_v57, %v4333_v50  ;;  %v5199_v50 = vadd.f32 %v4811_v55, %v4343_v53  ;;  %v6298_v57 = vld [vmem:[#allocation3_spill] sm:$0xff]  ;;  %v2130_v8 = vsel %vm1332_vm2, %v1944_v11, 0.0  ;;  %v5215_v53 = vadd.f32 %v4801_v32, %v4341_v52 }
 0x1d1   : > { %2128 = vadd.xlane.f32.xlu1 %v2127_v0  ;;  %v5203_v38 = vadd.f32 %v4831_v9, %v6298_v57  ;;  %v5219_v55 = vadd.f32 %v4821_v22, %v4359_v59  ;;  %v2136_v11 = vsel %vm1332_vm2, %v1946_v16, 0.0  ;;  %v3804_v32 = vmov 0.0  }
 0x1d2   : > { %2119 = vadd.xlane.f32.xlu0 %v2118_v33  ;;  %v5182_v48 = vpop.xlane.xlu1 %1418  ;;  %v2499_v33 = vmax.f32 %v2251_v10, 0.0  ;;  %v2498_v9 = vmax.f32 %v5199_v50, 0.0  ;;  %205 = vst.msk [vmem:[#allocation2] sm:$0xff] %vm204_vm3, %v3804_v32  ;;  %206 = vst.msk [vmem:[#allocation2 + $0x8] sm:$0xff] %vm204_vm3, %v3804_v32  ;;  %v2500_v59 = vmax.f32 %v5215_v53, 0.0  ;;  %v2275_v16 = vadd.f32 %v4887_v6, %v4367_v61 }
 0x1d3   : > { %v5184_v21 = vpop.xlane.xlu0 %1505  ;;  %v2501_v51 = vmax.f32 %v5203_v38, 0.0  ;;  %207 = vst.msk [vmem:[#allocation2 + $0x10] sm:$0xff] %vm204_vm3, %v3804_v32  ;;  %208 = vst.msk [vmem:[#allocation2 + $0x18] sm:$0xff] %vm204_vm3, %v3804_v32  ;;  %v2503_v22 = vmax.f32 %v5219_v55, 0.0  ;;  %v2283_v61 = vadd.f32 %v4873_v45, %v4375_v62  ;;  %v6306_v62 = vld [vmem:[#allocation7_spill] sm:$0xff] }
 0x1d4   : > { %6294 = vst [vmem:[#allocation55_spill] sm:$0xff] %v5184_v21  ;;  %v2567_v46 = vsel %vm1332_vm2, %v2499_v33, 0.0  ;;  %209 = vst.msk [vmem:[#allocation2 + $0x20] sm:$0xff] %vm204_vm3, %v3804_v32  ;;  %v2262_v33 = vadd.f32 %v4859_v63, %v4349_v54  ;;  %v6304_v54 = vld [vmem:[#allocation4_spill] sm:$0xff]  ;;  %v2505_v38 = vmax.f32 %v2275_v16, 0.0  ;;  %v2291_v45 = vadd.f32 %v4943_v7, %v6306_v62 }
 0x1d5   : > { %2134 = vadd.xlane.f32.xlu1 %v2133_v28  ;;  %210 = vst.msk [vmem:[#allocation2 + $0x28] sm:$0xff] %vm204_vm3, %v3804_v32  ;;  %211 = vst.msk [vmem:[#allocation2 + $0x30] sm:$0xff] %vm204_vm3, %v3804_v32  ;;  %v2270_v63 = vadd.f32 %v4845_v4, %v6304_v54  ;;  %v2579_v50 = vsel %vm1332_vm2, %v2503_v22, 0.0  ;;  %v2278_v4 = vadd.f32 %v4915_v5, %v4365_v60 }
 0x1d6   : > { %2125 = vadd.xlane.f32.xlu0 %v2124_v27  ;;  %v5193_v18 = vpop.xlane.xlu1 %1508  ;;  %v5225_v27 = vpop.f32.mrf.mxu0  ;;  %212 = vst.msk [vmem:[#allocation2 + $0x38] sm:$0xff] %vm204_vm3, %v3804_v32  ;;  %213 = vst.msk [vmem:[#allocation2 + $0x40] sm:$0xff] %vm204_vm3, %v3804_v32  ;;  %v2502_v6 = vmax.f32 %v2262_v33, 0.0  ;;  %v2585_v22 = vsel %vm1332_vm2, %v2505_v38, 0.0  ;;  %v2509_v7 = vmax.f32 %v2291_v45, 0.0 }
 0x1d7   : > { %6296 = vst [vmem:[#allocation56_spill] sm:$0xff] %v5193_v18  ;;  %v5195_v0 = vpop.xlane.xlu0 %1427  ;;  %214 = vst.msk [vmem:[#allocation2 + $0x48] sm:$0xff] %vm204_vm3, %v3804_v32  ;;  %v2506_v5 = vmax.f32 %v2278_v4, 0.0 }
 0x1d8   : > { %6297 = vst [vmem:[#allocation107_spill] sm:$0xff] %v5195_v0  ;;  %215 = vst.msk [vmem:[#allocation2 + $0x50] sm:$0xff] %vm204_vm3, %v3804_v32 }
 0x1d9   : > { %2562 = vadd.xlane.f32.xlu1 %v2561_v40  ;;  %216 = vst.msk [vmem:[#allocation2 + $0x58] sm:$0xff] %vm204_vm3, %v3804_v32  ;;  %217 = vst.msk [vmem:[#allocation2 + $0x60] sm:$0xff] %vm204_vm3, %v3804_v32  ;;  %v2573_v40 = vsel %vm1332_vm2, %v2501_v51, 0.0 }
 0x1da   : > { %2131 = vadd.xlane.f32.xlu0 %v2130_v8  ;;  %v5209_v28 = vpop.xlane.xlu1 %1514  ;;  %218 = vst.msk [vmem:[#allocation2 + $0x68] sm:$0xff] %vm204_vm3, %v3804_v32  ;;  %219 = vst.msk [vmem:[#allocation2 + $0x70] sm:$0xff] %vm204_vm3, %v3804_v32  ;;  %v2564_v8 = vsel %vm1332_vm2, %v2498_v9, 0.0  ;;  %v2570_v9 = vsel %vm1332_vm2, %v2500_v59, 0.0  ;;  %v2576_v59 = vsel %vm1332_vm2, %v2502_v6, 0.0 }
 0x1db   : > { %6299 = vst [vmem:[#allocation3_spill] sm:$0xff] %v5209_v28  ;;  %v5211_v10 = vpop.xlane.xlu0 %1421  ;;  %220 = vst.msk [vmem:[#allocation2 + $0x78] sm:$0xff] %vm204_vm3, %v3804_v32 }
 0x1dc   : > { %6300 = vst [vmem:[#allocation108_spill] sm:$0xff] %v5211_v10  ;;  %221 = vst.msk [vmem:[#allocation2 + $0x80] sm:$0xff] %vm204_vm3, %v3804_v32 }
 0x1dd   : > { %2568 = vadd.xlane.f32.xlu1 %v2567_v46  ;;  %222 = vst.msk [vmem:[#allocation2 + $0x88] sm:$0xff] %vm204_vm3, %v3804_v32  ;;  %223 = vst.msk [vmem:[#allocation2 + $0x90] sm:$0xff] %vm204_vm3, %v3804_v32  ;;  %v5371_v46 = vpop.f32.mrf.mxu0 }
 0x1de   : > { %2137 = vadd.xlane.f32.xlu0 %v2136_v11  ;;  %v5227_v57 = vpop.xlane.xlu1 %1520  ;;  %224 = vst.msk [vmem:[#allocation2 + $0x98] sm:$0xff] %vm204_vm3, %v3804_v32  ;;  %225 = vst.msk [vmem:[#allocation2 + $0xa0] sm:$0xff] %vm204_vm3, %v3804_v32 }
 0x1df   : > { %6301 = vst [vmem:[#allocation109_spill] sm:$0xff] %v5227_v57  ;;  %v5229_v52 = vpop.xlane.xlu0 %1511  ;;  %226 = vst.msk [vmem:[#allocation2 + $0xa8] sm:$0xff] %vm204_vm3, %v3804_v32  ;;  %v5383_v51 = vpop.f32.mrf.mxu0 }
 0x1e0   : > { %6302 = vst [vmem:[#allocation110_spill] sm:$0xff] %v5229_v52  ;;  %227 = vst.msk [vmem:[#allocation2 + $0xb0] sm:$0xff] %vm204_vm3, %v3804_v32 }
 0x1e1   : > { %228 = vst.msk [vmem:[#allocation2 + $0xb8] sm:$0xff] %vm204_vm3, %v3804_v32  ;;  %229 = vst.msk [vmem:[#allocation2 + $0xc0] sm:$0xff] %vm204_vm3, %v3804_v32  ;;  %2574 = vadd.xlane.f32.xlu1 %v2573_v40  ;;  %v2504_v40 = vmax.f32 %v2270_v63, 0.0  ;;  %v5395_v33 = vpop.f32.mrf.mxu0  ;;  %v6307_v63 = vld [vmem:[#allocation5_spill] sm:$0xff] }
 0x1e2   : > { %230 = vst.msk [vmem:[#allocation2 + $0xc8] sm:$0xff] %vm204_vm3, %v3804_v32  ;;  %231 = vst.msk [vmem:[#allocation2 + $0xd0] sm:$0xff] %vm204_vm3, %v3804_v32  ;;  %2565 = vadd.xlane.f32.xlu0 %v2564_v8  ;;  %v5373_v53 = vpop.xlane.xlu1 %1948  ;;  %v2507_v8 = vmax.f32 %v2283_v61, 0.0  ;;  %v2286_v61 = vadd.f32 %v4901_v47, %v6307_v63  ;;  %v6309_v47 = vld [vmem:[#allocation6_spill] sm:$0xff] }
 0x1e3   : > { %232 = vst.msk [vmem:[#allocation2 + $0xd8] sm:$0xff] %vm204_vm3, %v3804_v32  ;;  %233 = vst.msk [vmem:[#allocation2 + $0xe0] sm:$0xff] %vm204_vm3, %v3804_v32  ;;  %v5375_v55 = vpop.xlane.xlu0 %1517  ;;  %v2582_v6 = vsel %vm1332_vm2, %v2504_v40, 0.0  ;;  %v2294_v63 = vadd.f32 %v4971_v56, %v6309_v47  ;;  %v2588_v40 = vsel %vm1332_vm2, %v2506_v5, 0.0 }
 0x1e4   : > { %234 = vst.msk [vmem:[#allocation2 + $0xe8] sm:$0xff] %vm204_vm3, %v3804_v32  ;;  %235 = vst.msk [vmem:[#allocation2 + $0xf0] sm:$0xff] %vm204_vm3, %v3804_v32  ;;  %v2591_v38 = vsel %vm1332_vm2, %v2507_v8, 0.0  ;;  %v2597_v8 = vsel %vm1332_vm2, %v2509_v7, 0.0 }
 0x1e5   : > { %236 = vst.msk [vmem:[#allocation2 + $0xf8] sm:$0xff] %vm204_vm3, %v3804_v32  ;;  %237 = vst.msk [vmem:[#allocation2 + $0x100] sm:$0xff] %vm204_vm3, %v3804_v32  ;;  %2580 = vadd.xlane.f32.xlu1 %v2579_v50  ;;  %v6308_v50 = vld [vmem:[#allocation9_spill] sm:$0xff]  ;;  %v2510_v47 = vmax.f32 %v2294_v63, 0.0 }
 0x1e6   : > { %238 = vst.msk [vmem:[#allocation2 + $0x108] sm:$0xff] %vm204_vm3, %v3804_v32  ;;  %239 = vst.msk [vmem:[#allocation2 + $0x110] sm:$0xff] %vm204_vm3, %v3804_v32  ;;  %2571 = vadd.xlane.f32.xlu0 %v2570_v9  ;;  %v5385_v11 = vpop.xlane.xlu1 %1954  ;;  %v2299_v60 = vadd.f32 %v4929_v29, %v6308_v50  ;;  %v5407_v9 = vpop.f32.mrf.mxu0  ;;  %v6310_v29 = vld [vmem:[#allocation11_spill] sm:$0xff] }
 0x1e7   : > { %240 = vst.msk [vmem:[#allocation2 + $0x118] sm:$0xff] %vm204_vm3, %v3804_v32  ;;  %241 = vst.msk [vmem:[#allocation2 + $0x120] sm:$0xff] %vm204_vm3, %v3804_v32  ;;  %v2307_v4 = vadd.f32 %v4999_v37, %v6310_v29 }
 0x1e8   : > { %242 = vst.msk [vmem:[#allocation2 + $0x128] sm:$0xff] %vm204_vm3, %v3804_v32  ;;  %243 = vst.msk [vmem:[#allocation2 + $0x130] sm:$0xff] %vm204_vm3, %v3804_v32  ;;  %v5419_v45 = vpop.f32.mrf.mxu0 }
 0x1e9   : > { %244 = vst.msk [vmem:[#allocation2 + $0x138] sm:$0xff] %vm204_vm3, %v3804_v32  ;;  %245 = vst.msk [vmem:[#allocation2 + $0x140] sm:$0xff] %vm204_vm3, %v3804_v32  ;;  %2586 = vadd.xlane.f32.xlu1 %v2585_v22  ;;  %v2513_v37 = vmax.f32 %v2307_v4, 0.0 }
 0x1ea   : > { %246 = vst.msk [vmem:[#allocation2 + $0x148] sm:$0xff] %vm204_vm3, %v3804_v32  ;;  %247 = vst.msk [vmem:[#allocation2 + $0x150] sm:$0xff] %vm204_vm3, %v3804_v32  ;;  %2577 = vadd.xlane.f32.xlu0 %v2576_v59  ;;  %v5397_v16 = vpop.xlane.xlu1 %1960  ;;  %v2508_v59 = vmax.f32 %v2286_v61, 0.0  ;;  %v6311_v61 = vld [vmem:[#allocation8_spill] sm:$0xff]  ;;  %v5431_v29 = vpop.f32.mrf.mxu0 }
 0x1eb   : > { %248 = vst.msk [vmem:[#allocation2 + $0x158] sm:$0xff] %vm204_vm3, %v3804_v32  ;;  %249 = vst.msk [vmem:[#allocation2 + $0x160] sm:$0xff] %vm204_vm3, %v3804_v32 }
 0x1ec   : > { %250 = vst.msk [vmem:[#allocation2 + $0x168] sm:$0xff] %vm204_vm3, %v3804_v32  ;;  %251 = vst.msk [vmem:[#allocation2 + $0x170] sm:$0xff] %vm204_vm3, %v3804_v32  ;;  %v2594_v5 = vsel %vm1332_vm2, %v2508_v59, 0.0  ;;  %v2600_v59 = vsel %vm1332_vm2, %v2510_v47, 0.0  ;;  %v5443_v4 = vpop.f32.mrf.mxu0 }
 0x1ed   : > { %252 = vst.msk [vmem:[#allocation2 + $0x178] sm:$0xff] %vm204_vm3, %v3804_v32  ;;  %253 = vst.msk [vmem:[#allocation2 + $0x180] sm:$0xff] %vm204_vm3, %v3804_v32  ;;  %2592 = vadd.xlane.f32.xlu1 %v2591_v38 }
 0x1ee   : > { %254 = vst.msk [vmem:[#allocation2 + $0x188] sm:$0xff] %vm204_vm3, %v3804_v32  ;;  %255 = vst.msk [vmem:[#allocation2 + $0x190] sm:$0xff] %vm204_vm3, %v3804_v32  ;;  %2583 = vadd.xlane.f32.xlu0 %v2582_v6  ;;  %v5409_v62 = vpop.xlane.xlu1 %1966  ;;  %v6312_v6 = vld [vmem:[#allocation12_spill] sm:$0xff] }
 0x1ef   : > { %256 = vst.msk [vmem:[#allocation2 + $0x198] sm:$0xff] %vm204_vm3, %v3804_v32  ;;  %257 = vst.msk [vmem:[#allocation2 + $0x1a0] sm:$0xff] %vm204_vm3, %v3804_v32  ;;  %v2315_v56 = vadd.f32 %v4985_v23, %v6312_v6  ;;  %v6314_v23 = vld [vmem:[#allocation14_spill] sm:$0xff] }
 0x1f0   : > { %258 = vst.msk [vmem:[#allocation2 + $0x1a8] sm:$0xff] %vm204_vm3, %v3804_v32  ;;  %259 = vst.msk [vmem:[#allocation2 + $0x1b0] sm:$0xff] %vm204_vm3, %v3804_v32  ;;  %v2323_v63 = vadd.f32 %v5055_v36, %v6314_v23 }
 0x1f1   : > { %260 = vst.msk [vmem:[#allocation2 + $0x1b8] sm:$0xff] %vm204_vm3, %v3804_v32  ;;  %261 = vst.msk [vmem:[#allocation2 + $0x1c0] sm:$0xff] %vm204_vm3, %v3804_v32  ;;  %2598 = vadd.xlane.f32.xlu1 %v2597_v8  ;;  %v2515_v52 = vmax.f32 %v2315_v56, 0.0 }
 0x1f2   : > { %262 = vst.msk [vmem:[#allocation2 + $0x1c8] sm:$0xff] %vm204_vm3, %v3804_v32  ;;  %263 = vst.msk [vmem:[#allocation2 + $0x1d0] sm:$0xff] %vm204_vm3, %v3804_v32  ;;  %2589 = vadd.xlane.f32.xlu0 %v2588_v40  ;;  %v5421_v50 = vpop.xlane.xlu1 %1972  ;;  %v2517_v36 = vmax.f32 %v2323_v63, 0.0 }
 0x1f3   : > { %264 = vst.msk [vmem:[#allocation2 + $0x1d8] sm:$0xff] %vm204_vm3, %v3804_v32  ;;  %265 = vst.msk [vmem:[#allocation2 + $0x1e0] sm:$0xff] %vm204_vm3, %v3804_v32 }
 0x1f4   : > { %266 = vst.msk [vmem:[#allocation2 + $0x1e8] sm:$0xff] %vm204_vm3, %v3804_v32  ;;  %267 = vst.msk [vmem:[#allocation2 + $0x1f0] sm:$0xff] %vm204_vm3, %v3804_v32 }
 0x1f5   : > { %268 = vst.msk [vmem:[#allocation2 + $0x1f8] sm:$0xff] %vm204_vm3, %v3804_v32  ;;  %6303 = vst [vmem:[#allocation111_spill] sm:$0xff] %v5375_v55  ;;  %v5387_v32 = vpop.xlane.xlu0 %1523 }
 0x1f6   : > { %6305 = vst [vmem:[#allocation4_spill] sm:$0xff] %v5387_v32  ;;  %v2511_v32 = vmax.f32 %v2299_v60, 0.0  ;;  %v2302_v60 = vadd.f32 %v4957_v35, %v6311_v61  ;;  %2595 = vadd.xlane.f32.xlu0 %v2594_v5  ;;  %v5433_v8 = vpop.xlane.xlu1 %1978  ;;  %v6313_v35 = vld [vmem:[#allocation10_spill] sm:$0xff]  ;;  %v5455_v5 = vpop.f32.mrf.mxu0 }
 0x1f7   : > { %v2310_v61 = vadd.f32 %v5027_v24, %v6313_v35  ;;  %v2331_v24 = vadd.f32 %v5041_v44, %v6213_v13  ;;  %v6316_v13 = vld [vmem:[#allocation17_spill] sm:$0xff] }
 0x1f8   : > { %v2603_v7 = vsel %vm1332_vm2, %v2511_v32, 0.0  ;;  %v2512_v55 = vmax.f32 %v2302_v60, 0.0  ;;  %v2609_v32 = vsel %vm1332_vm2, %v2513_v37, 0.0  ;;  %v2318_v60 = vadd.f32 %v5013_v3, %v6212_v42  ;;  %v6315_v42 = vld [vmem:[#allocation15_spill] sm:$0xff] }
 0x1f9   : > { %v5399_v54 = vpop.xlane.xlu0 %1951  ;;  %2604 = vadd.xlane.f32.xlu1 %v2603_v7  ;;  %v2514_v56 = vmax.f32 %v2310_v61, 0.0  ;;  %v2615_v37 = vsel %vm1332_vm2, %v2515_v52, 0.0  ;;  %v2326_v3 = vadd.f32 %v5081_v26, %v6315_v42  ;;  %v2339_v44 = vadd.f32 %v5105_v41, %v6316_v13  ;;  %v5467_v61 = vpop.f32.mrf.mxu0  ;;  %v6318_v26 = vld [vmem:[#allocation92_spill] sm:$0xff] }
 0x1fa   : > { %2601 = vadd.xlane.f32.xlu0 %v2600_v59  ;;  %v5445_v6 = vpop.xlane.xlu1 %1984  ;;  %v2606_v47 = vsel %vm1332_vm2, %v2512_v55, 0.0  ;;  %v2519_v59 = vmax.f32 %v2331_v24, 0.0  ;;  %v2621_v52 = vsel %vm1332_vm2, %v2517_v36, 0.0 }
 0x1fb   : > { %v2612_v55 = vsel %vm1332_vm2, %v2514_v56, 0.0  ;;  %v2518_v42 = vmax.f32 %v2326_v3, 0.0  ;;  %v2521_v41 = vmax.f32 %v2339_v44, 0.0  ;;  %v5479_v13 = vpop.f32.mrf.mxu0 }
 0x1fc   : > { %v2627_v36 = vsel %vm1332_vm2, %v2519_v59, 0.0 }
 0x1fd   : > { %v5411_v22 = vpop.xlane.xlu0 %1957  ;;  %2610 = vadd.xlane.f32.xlu1 %v2609_v32  ;;  %v2516_v32 = vmax.f32 %v2318_v60, 0.0  ;;  %v6317_v60 = vld [vmem:[#allocation18_spill] sm:$0xff]  ;;  %v2633_v59 = vsel %vm1332_vm2, %v2521_v41, 0.0  ;;  %v5491_v44 = vpop.f32.mrf.mxu0 }
 0x1fe   : > { %2607 = vadd.xlane.f32.xlu0 %v2606_v47  ;;  %v5457_v35 = vpop.xlane.xlu1 %1990  ;;  %v2334_v24 = vadd.f32 %v5067_v12, %v6317_v60  ;;  %v2347_v47 = vadd.f32 %v6318_v26, %v6219_v43  ;;  %v6319_v12 = vld [vmem:[#allocation20_spill] sm:$0xff]  ;;  %v6320_v43 = vld [vmem:[#allocation21_spill] sm:$0xff] }
 0x1ff   : > { %v2618_v56 = vsel %vm1332_vm2, %v2516_v32, 0.0  ;;  %v2342_v60 = vadd.f32 %v5128_v31, %v6319_v12  ;;  %v2355_v3 = vadd.f32 %v5149_v14, %v6320_v43  ;;  %v2624_v32 = vsel %vm1332_vm2, %v2518_v42, 0.0  ;;  %v5503_v43 = vpop.f32.mrf.mxu0 }
 0x200   : > { %v2520_v57 = vmax.f32 %v2334_v24, 0.0  ;;  %v2523_v21 = vmax.f32 %v2347_v47, 0.0  ;;  %v6321_v24 = vld [vmem:[#allocation22_spill] sm:$0xff] }
 0x201   : > { %v5423_v38 = vpop.xlane.xlu0 %1963  ;;  %2616 = vadd.xlane.f32.xlu1 %v2615_v37  ;;  %v2350_v47 = vadd.f32 %v5116_v17, %v6321_v24  ;;  %v2522_v12 = vmax.f32 %v2342_v60, 0.0  ;;  %v2525_v14 = vmax.f32 %v2355_v3, 0.0  ;;  %v6323_v17 = vld [vmem:[#allocation24_spill] sm:$0xff]  ;;  %v5515_v3 = vpop.f32.mrf.mxu0 }
 0x202   : > { %2613 = vadd.xlane.f32.xlu0 %v2612_v55  ;;  %v5469_v63 = vpop.xlane.xlu1 %1996  ;;  %v2639_v41 = vsel %vm1332_vm2, %v2523_v21, 0.0  ;;  %v2630_v42 = vsel %vm1332_vm2, %v2520_v57, 0.0  ;;  %v2358_v24 = vadd.f32 %v5169_v25, %v6323_v17 }
 0x203   : > { %v2524_v28 = vmax.f32 %v2350_v47, 0.0  ;;  %v2645_v21 = vsel %vm1332_vm2, %v2525_v14, 0.0  ;;  %v2636_v57 = vsel %vm1332_vm2, %v2522_v12, 0.0  ;;  %v6325_v47 = vld [vmem:[#allocation26_spill] sm:$0xff] }
 0x204   : > { %v2526_v17 = vmax.f32 %v2358_v24, 0.0 }
 0x205   : > { %v5435_v40 = vpop.xlane.xlu0 %1969  ;;  %2622 = vadd.xlane.f32.xlu1 %v2621_v52  ;;  %v2642_v12 = vsel %vm1332_vm2, %v2524_v28, 0.0 }
 0x206   : > { %2619 = vadd.xlane.f32.xlu0 %v2618_v56  ;;  %v5481_v52 = vpop.xlane.xlu1 %2002  ;;  %v6322_v56 = vld [vmem:[#allocation23_spill] sm:$0xff]  ;;  %v2648_v28 = vsel %vm1332_vm2, %v2526_v17, 0.0 }
 0x207   : > { %v2363_v31 = vadd.f32 %v5138_v15, %v6322_v56  ;;  %v6324_v15 = vld [vmem:[#allocation25_spill] sm:$0xff] }
 0x208   : > { %v2371_v60 = vadd.f32 %v5191_v39, %v6324_v15  ;;  %v5527_v15 = vpop.f32.mrf.mxu0 }
 0x209   : > { %v5447_v7 = vpop.xlane.xlu0 %1975  ;;  %2628 = vadd.xlane.f32.xlu1 %v2627_v36  ;;  %v2527_v18 = vmax.f32 %v2363_v31, 0.0  ;;  %v2366_v31 = vadd.f32 %v5159_v20, %v6325_v47  ;;  %v6327_v20 = vld [vmem:[#allocation28_spill] sm:$0xff] }
 0x20a   : > { %2625 = vadd.xlane.f32.xlu0 %v2624_v32  ;;  %v5493_v26 = vpop.xlane.xlu1 %2008  ;;  %v2529_v39 = vmax.f32 %v2371_v60, 0.0  ;;  %v2374_v47 = vadd.f32 %v5225_v27, %v6327_v20  ;;  %v5539_v60 = vpop.f32.mrf.mxu0  ;;  %v6332_v20 = vld [vmem:[#allocation31_spill] sm:$0xff] }
 0x20b   : > { %v2651_v14 = vsel %vm1332_vm2, %v2527_v18, 0.0  ;;  %v2528_v0 = vmax.f32 %v2366_v31, 0.0  ;;  %v6331_v31 = vld [vmem:[#allocation29_spill] sm:$0xff] }
 0x20c   : > { %v2657_v18 = vsel %vm1332_vm2, %v2529_v39, 0.0 }
 0x20d   : > { %v5459_v23 = vpop.xlane.xlu0 %1981  ;;  %2634 = vadd.xlane.f32.xlu1 %v2633_v59  ;;  %v2654_v27 = vsel %vm1332_vm2, %v2528_v0, 0.0 }
 0x20e   : > { %2631 = vadd.xlane.f32.xlu0 %v2630_v42  ;;  %v5505_v59 = vpop.xlane.xlu1 %2014  ;;  %v6326_v42 = vld [vmem:[#allocation27_spill] sm:$0xff] }
 0x20f   : > { %v2379_v25 = vadd.f32 %v5180_v49, %v6326_v42  ;;  %v6328_v49 = vld [vmem:[#allocation30_spill] sm:$0xff] }
 0x210   : > { %v2387_v24 = vadd.f32 %v5383_v51, %v6328_v49  ;;  %v2395_v51 = vadd.f32 %v5371_v46, %v6332_v20  ;;  %v5551_v49 = vpop.f32.mrf.mxu0 }
 0x211   : > { %v5471_v37 = vpop.xlane.xlu0 %1987  ;;  %2640 = vadd.xlane.f32.xlu1 %v2639_v41  ;;  %v2531_v10 = vmax.f32 %v2379_v25, 0.0  ;;  %v2382_v25 = vadd.f32 %v5207_v19, %v6331_v31 }
 0x212   : > { %2637 = vadd.xlane.f32.xlu0 %v2636_v57  ;;  %v5517_v56 = vpop.xlane.xlu1 %2020  ;;  %v2533_v39 = vmax.f32 %v2387_v24, 0.0  ;;  %v2535_v0 = vmax.f32 %v2395_v51, 0.0  ;;  %v5563_v24 = vpop.f32.mrf.mxu0 }
 0x213   : > { %v2663_v17 = vsel %vm1332_vm2, %v2531_v10, 0.0 }
 0x214   : > { %v2669_v46 = vsel %vm1332_vm2, %v2533_v39, 0.0  ;;  %v2675_v39 = vsel %vm1332_vm2, %v2535_v0, 0.0 }
 0x215   : > { %v5483_v55 = vpop.xlane.xlu0 %1993  ;;  %2646 = vadd.xlane.f32.xlu1 %v2645_v21 }
 0x216   : > { %2643 = vadd.xlane.f32.xlu0 %v2642_v12  ;;  %v5529_v21 = vpop.xlane.xlu1 %2026  ;;  %v2530_v12 = vmax.f32 %v2374_v47, 0.0  ;;  %v6334_v47 = vld [vmem:[#allocation34_spill] sm:$0xff] }
 0x217   : > { %v2403_v31 = vadd.f32 %v5431_v29, %v6334_v47  ;;  %v2450_v47 = vpop.f32.mrf.mxu0 }
 0x218   : > { %v2660_v10 = vsel %vm1332_vm2, %v2530_v12, 0.0 }
 0x219   : > { %v5495_v36 = vpop.xlane.xlu0 %1999  ;;  %2652 = vadd.xlane.f32.xlu1 %v2651_v14  ;;  %v2537_v29 = vmax.f32 %v2403_v31, 0.0 }
 0x21a   : > { %2649 = vadd.xlane.f32.xlu0 %v2648_v28  ;;  %v5541_v42 = vpop.xlane.xlu1 %2032 }
 0x21b   : > { %6329 = vst [vmem:[#allocation7_spill] sm:$0xff] %v5541_v42  ;;  %v6333_v42 = vld [vmem:[#allocation32_spill] sm:$0xff]  ;;  %v2681_v0 = vsel %vm1332_vm2, %v2537_v29, 0.0 }
 0x21c   : > { %v2390_v19 = vadd.f32 %v5407_v9, %v6333_v42  ;;  %v6338_v42 = vld [vmem:[#allocation35_spill] sm:$0xff] }
 0x21d   : > { %v5507_v32 = vpop.xlane.xlu0 %2005  ;;  %2658 = vadd.xlane.f32.xlu1 %v2657_v18  ;;  %v2411_v51 = vadd.f32 %v5419_v45, %v6338_v42  ;;  %v6341_v45 = vld [vmem:[#allocation38_spill] sm:$0xff] }
 0x21e   : > { %2655 = vadd.xlane.f32.xlu0 %v2654_v27  ;;  %v5553_v18 = vpop.xlane.xlu1 %2038  ;;  %v2534_v9 = vmax.f32 %v2390_v19, 0.0  ;;  %v6340_v19 = vld [vmem:[#allocation36_spill] sm:$0xff]  ;;  %v2419_v31 = vadd.f32 %v5479_v13, %v6341_v45 }
 0x221   : > { %v5519_v41 = vpop.xlane.xlu0 %2011  ;;  %2664 = vadd.xlane.f32.xlu1 %v2663_v17 }
 0x222   : > { %2661 = vadd.xlane.f32.xlu0 %v2660_v10  ;;  %v5565_v27 = vpop.xlane.xlu1 %2044 }
 0x223   : > { %6335 = vst [vmem:[#allocation9_spill] sm:$0xff] %v5565_v27  ;;  %v2672_v27 = vsel %vm1332_vm2, %v2534_v9, 0.0 }
 0x225   : > { %v5531_v57 = vpop.xlane.xlu0 %2017  ;;  %2670 = vadd.xlane.f32.xlu1 %v2669_v46 }
 0x226   : > { %v5575_v46 = vpop.xlane.xlu1 %2050 }
 0x229   : > { %v5543_v14 = vpop.xlane.xlu0 %2023  ;;  %2676 = vadd.xlane.f32.xlu1 %v2675_v39 }
 0x22a   : > { %6330 = vst [vmem:[#allocation5_spill] sm:$0xff] %v5543_v14  ;;  %v2532_v14 = vmax.f32 %v2382_v25, 0.0  ;;  %v6337_v25 = vld [vmem:[#allocation33_spill] sm:$0xff]  ;;  %v5587_v42 = vpop.xlane.xlu1 %2056 }
 0x22b   : > { %v2398_v17 = vadd.f32 %v5395_v33, %v6337_v25  ;;  %v2539_v33 = vmax.f32 %v2411_v51, 0.0  ;;  %v2406_v25 = vadd.f32 %v5455_v5, %v6340_v19  ;;  %6342 = vst [vmem:[#allocation8_spill] sm:$0xff] %v5587_v42  ;;  %v6345_v51 = vld [vmem:[#allocation39_spill] sm:$0xff]  ;;  %v2541_v19 = vmax.f32 %v2419_v31, 0.0 }
 0x22c   : > { %v2666_v12 = vsel %vm1332_vm2, %v2532_v14, 0.0  ;;  %v5585_v14 = vpop.f32.mrf.mxu0 }
 0x22d   : > { %v5555_v28 = vpop.xlane.xlu0 %2029  ;;  %2667 = vadd.xlane.f32.xlu0 %v2666_v12  ;;  %2682 = vadd.xlane.f32.xlu1 %v2681_v0  ;;  %v2427_v12 = vadd.f32 %v5467_v61, %v6345_v51  ;;  %v2538_v5 = vmax.f32 %v2406_v25, 0.0  ;;  %v2687_v13 = vsel %vm1332_vm2, %v2539_v33, 0.0  ;;  %v2693_v25 = vsel %vm1332_vm2, %v2541_v19, 0.0 }
 0x22e   : > { %v2453_v45 = vpop.f32.mrf.mxu0 }
 0x22f   : > { %v2543_v42 = vmax.f32 %v2427_v12, 0.0  ;;  %v2684_v33 = vsel %vm1332_vm2, %v2538_v5, 0.0  ;;  %v6351_v12 = vld [vmem:[#allocation43_spill] sm:$0xff] }
 0x231   : > { %v5567_v20 = vpop.xlane.xlu0 %2035  ;;  %2673 = vadd.xlane.f32.xlu0 %v2672_v27  ;;  %2688 = vadd.xlane.f32.xlu1 %v2687_v13  ;;  %v5597_v27 = vpop.xlane.xlu1 %2062  ;;  %v6350_v13 = vld [vmem:[#allocation41_spill] sm:$0xff] }
 0x232   : > { %6336 = vst [vmem:[#allocation6_spill] sm:$0xff] %v5567_v20  ;;  %v2536_v20 = vmax.f32 %v2398_v17, 0.0  ;;  %v6344_v17 = vld [vmem:[#allocation37_spill] sm:$0xff] }
 0x233   : > { %v2414_v9 = vadd.f32 %v5443_v4, %v6344_v17  ;;  %v6347_v17 = vld [vmem:[#allocation42_spill] sm:$0xff] }
 0x234   : > { %v2678_v29 = vsel %vm1332_vm2, %v2536_v20, 0.0  ;;  %v2435_v61 = vadd.f32 %v5527_v15, %v6347_v17  ;;  %v3706_v20 = vpop.f32.mrf.mxu0  ;;  %v2699_v15 = vsel %vm1332_vm2, %v2543_v42, 0.0 }
 0x235   : > { %v5577_v10 = vpop.xlane.xlu0 %2041  ;;  %2679 = vadd.xlane.f32.xlu0 %v2678_v29  ;;  %2694 = vadd.xlane.f32.xlu1 %v2693_v25  ;;  %v5607_v31 = vpop.xlane.xlu1 %2068 }
 0x236   : > { %6339 = vst [vmem:[#allocation11_spill] sm:$0xff] %v5577_v10  ;;  %v6346_v10 = vld [vmem:[#allocation40_spill] sm:$0xff]  ;;  %6348 = vst [vmem:[#allocation10_spill] sm:$0xff] %v5607_v31  ;;  %v2545_v29 = vmax.f32 %v2435_v61, 0.0  ;;  %v2466_v5 = vpop.f32.mrf.mxu0 }
 0x237   : > { %v2422_v4 = vadd.f32 %v5503_v43, %v6346_v10  ;;  %v2443_v43 = vadd.f32 %v5515_v3, %v6351_v12  ;;  %v6353_v31 = vld [vmem:[#allocation44_spill] sm:$0xff] }
 0x238   : > { %v3707_v61 = vpop.f32.mrf.mxu0 }
 0x239   : > { %v5589_v39 = vpop.xlane.xlu0 %2047  ;;  %2685 = vadd.xlane.f32.xlu0 %v2684_v33  ;;  %v2542_v10 = vmax.f32 %v2422_v4, 0.0  ;;  %2700 = vadd.xlane.f32.xlu1 %v2699_v15  ;;  %v5617_v17 = vpop.xlane.xlu1 %2074  ;;  %v2705_v4 = vsel %vm1332_vm2, %v2545_v29, 0.0  ;;  %v6357_v15 = vld [vmem:[#allocation45_spill] sm:$0xff] }
 0x23a   : > { %6343 = vst [vmem:[#allocation12_spill] sm:$0xff] %v5589_v39  ;;  %v2540_v39 = vmax.f32 %v2414_v9, 0.0  ;;  %v2430_v9 = vadd.f32 %v5491_v44, %v6350_v13  ;;  %v2438_v44 = vadd.f32 %v5551_v49, %v6353_v31  ;;  %v6354_v13 = vld [vmem:[#allocation46_spill] sm:$0xff] }
 0x23b   : > { %v2451_v3 = vadd.f32 %v2450_v47, %v6354_v13  ;;  %v2696_v42 = vsel %vm1332_vm2, %v2542_v10, 0.0  ;;  %v2469_v10 = vpop.f32.mrf.mxu0 }
 0x23c   : > { %v2690_v19 = vsel %vm1332_vm2, %v2540_v39, 0.0  ;;  %v2544_v33 = vmax.f32 %v2430_v9, 0.0  ;;  %v2446_v9 = vadd.f32 %v5539_v60, %v6357_v15  ;;  %v2546_v49 = vmax.f32 %v2438_v44, 0.0  ;;  %v6360_v15 = vld [vmem:[#allocation50_spill] sm:$0xff] }
 0x23d   : > { %v5599_v0 = vpop.xlane.xlu0 %2053  ;;  %2691 = vadd.xlane.f32.xlu0 %v2690_v19  ;;  %2706 = vadd.xlane.f32.xlu1 %v2705_v4  ;;  %v5626_v39 = vpop.xlane.xlu1 %2080  ;;  %v2549_v31 = vmax.f32 %v2451_v3, 0.0 }
 0x23e   : > { %6355 = vst [vmem:[#allocation17_spill] sm:$0xff] %v5626_v39  ;;  %v2702_v29 = vsel %vm1332_vm2, %v2544_v33, 0.0  ;;  %v6359_v39 = vld [vmem:[#allocation48_spill] sm:$0xff]  ;;  %v2708_v44 = vsel %vm1332_vm2, %v2546_v49, 0.0 }
 0x23f   : > { %v2454_v60 = vadd.f32 %v2453_v45, %v6359_v39 }
 0x241   : > { %v5609_v51 = vpop.xlane.xlu0 %2059  ;;  %2697 = vadd.xlane.f32.xlu0 %v2696_v42  ;;  %v5636_v13 = vpop.xlane.xlu1 %2086  ;;  %v2548_v42 = vmax.f32 %v2446_v9, 0.0  ;;  %v6363_v9 = vld [vmem:[#allocation52_spill] sm:$0xff] }
 0x242   : > { %6349 = vst [vmem:[#allocation14_spill] sm:$0xff] %v5609_v51  ;;  %v2547_v51 = vmax.f32 %v2443_v43, 0.0  ;;  %v6358_v43 = vld [vmem:[#allocation47_spill] sm:$0xff] }
 0x243   : > { %v2459_v19 = vadd.f32 %v5563_v24, %v6358_v43  ;;  %v2717_v24 = vsel %vm1332_vm2, %v2549_v31, 0.0  ;;  %v6362_v43 = vld [vmem:[#allocation49_spill] sm:$0xff]  ;;  %v2714_v39 = vsel %vm1332_vm2, %v2548_v42, 0.0 }
 0x244   : > { %v2711_v47 = vsel %vm1332_vm2, %v2547_v51, 0.0  ;;  %v3710_v51 = vpop.f32.mrf.mxu0 }
 0x245   : > { %v5619_v25 = vpop.xlane.xlu0 %2065  ;;  %2712 = vadd.xlane.f32.xlu1 %v2711_v47  ;;  %2703 = vadd.xlane.f32.xlu0 %v2702_v29  ;;  %v5644_v33 = vpop.xlane.xlu1 %2092  ;;  %v2462_v47 = vadd.f32 %v5585_v14, %v6362_v43  ;;  %v2550_v29 = vmax.f32 %v2454_v60, 0.0  ;;  %v6364_v14 = vld [vmem:[#allocation53_spill] sm:$0xff] }
 0x246   : > { %6352 = vst [vmem:[#allocation15_spill] sm:$0xff] %v5619_v25  ;;  %v2467_v25 = vadd.f32 %v2466_v5, %v6360_v15  ;;  %v2482_v31 = vpop.f32.mrf.mxu0 }
 0x247   : > { %v2483_v43 = vadd.f32 %v2482_v31, %v6364_v14 }
 0x248   : > { %v2553_v45 = vmax.f32 %v2467_v25, 0.0  ;;  %v2720_v25 = vsel %vm1332_vm2, %v2550_v29, 0.0 }
 0x249   : > { %v5628_v12 = vpop.xlane.xlu0 %2071  ;;  %2718 = vadd.xlane.f32.xlu1 %v2717_v24  ;;  %2709 = vadd.xlane.f32.xlu0 %v2708_v44  ;;  %v5653_v49 = vpop.xlane.xlu1 %2098  ;;  %v2552_v24 = vmax.f32 %v2462_v47, 0.0 }
 0x24a   : > { %6356 = vst [vmem:[#allocation18_spill] sm:$0xff] %v5628_v12  ;;  %v2551_v12 = vmax.f32 %v2459_v19, 0.0  ;;  %v2475_v19 = vadd.f32 %v3706_v20, %v6363_v9  ;;  %v2729_v20 = vsel %vm1332_vm2, %v2553_v45, 0.0  ;;  %v2478_v9 = vadd.f32 %v3707_v61, %v4740_v34 }
 0x24b   : > { %v2726_v47 = vsel %vm1332_vm2, %v2552_v24, 0.0 }
 0x24c   : > { %v2723_v5 = vsel %vm1332_vm2, %v2551_v12, 0.0  ;;  %v2555_v44 = vmax.f32 %v2475_v19, 0.0  ;;  %v3711_v12 = vpop.f32.mrf.mxu0  ;;  %v2556_v31 = vmax.f32 %v2478_v9, 0.0 }
 0x24d   : > { %v5638_v4 = vpop.xlane.xlu0 %2077  ;;  %2724 = vadd.xlane.f32.xlu1 %v2723_v5  ;;  %2715 = vadd.xlane.f32.xlu0 %v2714_v39  ;;  %v5661_v42 = vpop.xlane.xlu1 %2104 }
 0x24e   : > { %v2735_v5 = vsel %vm1332_vm2, %v2555_v44, 0.0  ;;  %v2485_v45 = vpop.f32.mrf.mxu0 }
 0x251   : > { %v5646_v3 = vpop.xlane.xlu0 %2083  ;;  %2730 = vadd.xlane.f32.xlu1 %v2729_v20  ;;  %2721 = vadd.xlane.f32.xlu0 %v2720_v25  ;;  %v5669_v29 = vpop.xlane.xlu1 %2110  ;;  %v2486_v20 = vadd.f32 %v2485_v45, %v6293_v30 }
 0x252   : > { %6361 = vst [vmem:[#allocation92_spill] sm:$0xff] %v5646_v3  ;;  %v2470_v3 = vadd.f32 %v2469_v10, %v6286_v58  ;;  %v2491_v58 = vadd.f32 %v3710_v51, %v6290_v2  ;;  %v2557_v10 = vmax.f32 %v2483_v43, 0.0  ;;  %v2738_v43 = vsel %vm1332_vm2, %v2556_v31, 0.0  ;;  %v2817_v31 = vld [vmem:[#allocation2] sm:$0xff] }
 0x253   : > { %v2558_v24 = vmax.f32 %v2486_v20, 0.0 }
 0x254   : > { %v2554_v19 = vmax.f32 %v2470_v3, 0.0  ;;  %v2559_v14 = vmax.f32 %v2491_v58, 0.0  ;;  %v2741_v34 = vsel %vm1332_vm2, %v2557_v10, 0.0  ;;  %v2494_v3 = vadd.f32 %v3711_v12, %v4777_v1 }
 0x255   : > { %v5655_v15 = vpop.xlane.xlu0 %2089  ;;  %2736 = vadd.xlane.f32.xlu1 %v2735_v5  ;;  %2727 = vadd.xlane.f32.xlu0 %v2726_v47  ;;  %v5676_v2 = vpop.xlane.xlu1 %2116  ;;  %v2744_v47 = vsel %vm1332_vm2, %v2558_v24, 0.0  ;;  %v6368_v5 = vld [vmem:[#allocation60_spill] sm:$0xff] }
 0x256   : > { %v2732_v61 = vsel %vm1332_vm2, %v2554_v19, 0.0  ;;  %v2747_v44 = vsel %vm1332_vm2, %v2559_v14, 0.0  ;;  %v2560_v9 = vmax.f32 %v2494_v3, 0.0  ;;  %v2139_v45 = vadd.f32 %v5373_v53, %v6368_v5  ;;  %v6372_v5 = vld [vmem:[#allocation61_spill] sm:$0xff] }
 0x258   : > { %v2750_v1 = vsel %vm1332_vm2, %v2560_v9, 0.0 }
 0x259   : > { %v5663_v60 = vpop.xlane.xlu0 %2095  ;;  %2742 = vadd.xlane.f32.xlu1 %v2741_v34  ;;  %2733 = vadd.xlane.f32.xlu0 %v2732_v61  ;;  %v5683_v30 = vpop.xlane.xlu1 %2122  ;;  %v6370_v61 = vld [vmem:[#allocation58_spill] sm:$0xff] }
 0x25a   : > { %v2141_v3 = vadd.f32 %v5385_v11, %v6370_v61 }
 0x25d   : > { %v5671_v39 = vpop.xlane.xlu0 %2101  ;;  %2748 = vadd.xlane.f32.xlu1 %v2747_v44  ;;  %2739 = vadd.xlane.f32.xlu0 %v2738_v43  ;;  %v5688_v19 = vpop.xlane.xlu1 %2128  ;;  %v2819_v44 = vld [vmem:[#allocation2 + $0x10] sm:$0xff] }
 0x261   : > { %v5678_v51 = vpop.xlane.xlu0 %2107  ;;  %2745 = vadd.xlane.f32.xlu0 %v2744_v47  ;;  %v5693_v12 = vpop.xlane.xlu1 %2134 }
 0x262   : > { %6366 = vst [vmem:[#allocation21_spill] sm:$0xff] %v5693_v12  ;;  %v2821_v12 = vld [vmem:[#allocation2 + $0x20] sm:$0xff] }
 0x265   : > { %v5685_v25 = vpop.xlane.xlu0 %2113  ;;  %2751 = vadd.xlane.f32.xlu0 %v2750_v1  ;;  %v2563_v14 = vpop.xlane.xlu1 %2562  ;;  %v6371_v1 = vld [vmem:[#allocation67_spill] sm:$0xff] }
 0x266   : > { %v2753_v34 = vadd.f32 %v2563_v14, %v2139_v45  ;;  %v2143_v53 = vadd.f32 %v5397_v16, %v6371_v1  ;;  %v2818_v14 = vld [vmem:[#allocation2 + $0x8] sm:$0xff] }
 0x268   : > { %v2881_v24 = vadd.f32 %v2817_v31, %v2753_v34  ;;  %v6373_v34 = vld [vmem:[#allocation63_spill] sm:$0xff] }
 0x269   : > { %v5690_v58 = vpop.xlane.xlu0 %2119  ;;  %v2569_v43 = vpop.xlane.xlu1 %2568  ;;  %v2145_v61 = vadd.f32 %v5409_v62, %v6373_v34 }
 0x26a   : > { %6365 = vst [vmem:[#allocation20_spill] sm:$0xff] %v5690_v58  ;;  %2946 = vst.msk [vmem:[#allocation2] sm:$0xff] %vm204_vm3, %v2881_v24  ;;  %v2755_v47 = vadd.f32 %v2569_v43, %v2141_v3  ;;  %v6374_v3 = vld [vmem:[#allocation62_spill] sm:$0xff] }
 0x26b   : > { %v2142_v24 = vadd.f32 %v5411_v22, %v6374_v3  ;;  %v2822_v3 = vld [vmem:[#allocation2 + $0x28] sm:$0xff] }
 0x26d   : > { %v5695_v10 = vpop.xlane.xlu0 %2125  ;;  %v2575_v45 = vpop.xlane.xlu1 %2574 }
 0x26e   : > { %6367 = vst [vmem:[#allocation22_spill] sm:$0xff] %v5695_v10  ;;  %v2140_v10 = vadd.f32 %v5399_v54, %v6372_v5  ;;  %v2757_v11 = vadd.f32 %v2575_v45, %v2143_v53  ;;  %v6376_v53 = vld [vmem:[#allocation70_spill] sm:$0xff] }
 0x26f   : > { %v2144_v5 = vadd.f32 %v5423_v38, %v6376_v53 }
 0x270   : > { %v2885_v16 = vadd.f32 %v2821_v12, %v2757_v11  ;;  %v6375_v12 = vld [vmem:[#allocation72_spill] sm:$0xff] }
 0x271   : > { %v5699_v20 = vpop.xlane.xlu0 %2131  ;;  %v3013_v54 = vld [vmem:[#allocation2] sm:$0xff] }
 0x272   : > { %6369 = vst [vmem:[#allocation23_spill] sm:$0xff] %v5699_v20  ;;  %v2883_v20 = vadd.f32 %v2819_v44, %v2755_v47  ;;  %v2823_v44 = vld [vmem:[#allocation2 + $0x30] sm:$0xff]  ;;  %v2581_v47 = vpop.xlane.xlu1 %2580  ;;  %2950 = vst.msk [vmem:[#allocation2 + $0x20] sm:$0xff] %vm204_vm3, %v2885_v16 }
 0x273   : > { %v2759_v62 = vadd.f32 %v2581_v47, %v2145_v61 }
 0x274   : > { %2948 = vst.msk [vmem:[#allocation2 + $0x10] sm:$0xff] %vm204_vm3, %v2883_v20  ;;  %v2820_v20 = vld [vmem:[#allocation2 + $0x18] sm:$0xff] }
 0x275   : > { %v5703_v9 = vpop.xlane.xlu0 %2137  ;;  %v2887_v45 = vadd.f32 %v2823_v44, %v2759_v62 }
 0x276   : > { %v2587_v34 = vpop.xlane.xlu1 %2586 }
 0x277   : > { %2952 = vst.msk [vmem:[#allocation2 + $0x30] sm:$0xff] %vm204_vm3, %v2887_v45  ;;  %v6379_v45 = vld [vmem:[#allocation80_spill] sm:$0xff] }
 0x279   : > { %v2566_v58 = vpop.xlane.xlu0 %2565 }
 0x27a   : > { %v2754_v31 = vadd.f32 %v2566_v58, %v2140_v10  ;;  %v3077_v58 = vmul.f32 0.0052083335, %v3013_v54  ;;  %v2147_v10 = vadd.f32 %v5421_v50, %v6375_v12  ;;  %v2824_v12 = vld [vmem:[#allocation2 + $0x38] sm:$0xff] }
 0x27b   : > { %v3015_v11 = vld [vmem:[#allocation2 + $0x10] sm:$0xff] }
 0x27c   : > { %v2882_v43 = vadd.f32 %v2818_v14, %v2754_v31  ;;  %3141 = vst.msk [vmem:[%s5719_s7] sm:$0xff] %vm204_vm3, %v3077_v58  ;;  %v2825_v31 = vld [vmem:[#allocation2 + $0x40] sm:$0xff]  ;;  %v3079_v54 = vmul.f32 0.0052083335, %v3015_v11  ;;  %v2761_v61 = vadd.f32 %v2587_v34, %v2147_v10  ;;  %v6380_v11 = vld [vmem:[#allocation77_spill] sm:$0xff] }
 0x27d   : > { %v2572_v1 = vpop.xlane.xlu0 %2571  ;;  %v3017_v58 = vld [vmem:[#allocation2 + $0x20] sm:$0xff] }
 0x27e   : > { %2947 = vst.msk [vmem:[#allocation2 + $0x8] sm:$0xff] %vm204_vm3, %v2882_v43  ;;  %v2756_v22 = vadd.f32 %v2572_v1, %v2142_v24  ;;  %v6377_v24 = vld [vmem:[#allocation69_spill] sm:$0xff]  ;;  %v6378_v43 = vld [vmem:[#allocation68_spill] sm:$0xff]  ;;  %3143 = vst.msk [vmem:[%s5719_s7 + $0x10] sm:$0xff] %vm204_vm3, %v3079_v54  ;;  %v2889_v44 = vadd.f32 %v2825_v31, %v2761_v61  ;;  %v3081_v10 = vmul.f32 0.0052083335, %v3017_v58  ;;  %v2148_v31 = vadd.f32 %v5447_v7, %v6380_v11 }
 0x27f   : > { %v2149_v38 = vadd.f32 %v5433_v8, %v6377_v24  ;;  %v2146_v47 = vadd.f32 %v5435_v40, %v6378_v43  ;;  %v2827_v1 = vld [vmem:[#allocation2 + $0x50] sm:$0xff]  ;;  %v2826_v24 = vld [vmem:[#allocation2 + $0x48] sm:$0xff] }
 0x280   : > { %v2884_v14 = vadd.f32 %v2820_v20, %v2756_v22  ;;  %v2593_v22 = vpop.xlane.xlu1 %2592  ;;  %2954 = vst.msk [vmem:[#allocation2 + $0x40] sm:$0xff] %vm204_vm3, %v2889_v44  ;;  %3145 = vst.msk [vmem:[%s5719_s7 + $0x20] sm:$0xff] %vm204_vm3, %v3081_v10  ;;  %v3019_v54 = vld [vmem:[#allocation2 + $0x30] sm:$0xff]  ;;  %v6381_v44 = vld [vmem:[#allocation76_spill] sm:$0xff] }
 0x281   : > { %v2578_v16 = vpop.xlane.xlu0 %2577  ;;  %v2763_v8 = vadd.f32 %v2593_v22, %v2149_v38  ;;  %v3083_v43 = vmul.f32 0.0052083335, %v3019_v54  ;;  %v6383_v11 = vld [vmem:[#allocation88_spill] sm:$0xff] }
 0x282   : > { %2949 = vst.msk [vmem:[#allocation2 + $0x18] sm:$0xff] %vm204_vm3, %v2884_v14  ;;  %v2758_v50 = vadd.f32 %v2578_v16, %v2144_v5  ;;  %v2151_v14 = vadd.f32 %v5445_v6, %v6379_v45  ;;  %v2829_v16 = vld [vmem:[#allocation2 + $0x60] sm:$0xff] }
 0x283   : > { %v2891_v34 = vadd.f32 %v2827_v1, %v2763_v8  ;;  %v6382_v1 = vld [vmem:[#allocation73_spill] sm:$0xff]  ;;  %3147 = vst.msk [vmem:[%s5719_s7 + $0x30] sm:$0xff] %vm204_vm3, %v3083_v43  ;;  %v2828_v8 = vld [vmem:[#allocation2 + $0x58] sm:$0xff]  ;;  %v2830_v43 = vld [vmem:[#allocation2 + $0x68] sm:$0xff] }
 0x284   : > { %v2886_v20 = vadd.f32 %v2822_v3, %v2758_v50  ;;  %v2599_v50 = vpop.xlane.xlu1 %2598  ;;  %v2150_v58 = vadd.f32 %v5459_v23, %v6382_v1  ;;  %v6386_v1 = vld [vmem:[#allocation81_spill] sm:$0xff] }
 0x285   : > { %v3014_v62 = vld [vmem:[#allocation2 + $0x8] sm:$0xff]  ;;  %v2584_v53 = vpop.xlane.xlu0 %2583  ;;  %2956 = vst.msk [vmem:[#allocation2 + $0x50] sm:$0xff] %vm204_vm3, %v2891_v34  ;;  %v2765_v6 = vadd.f32 %v2599_v50, %v2151_v14  ;;  %v6384_v34 = vld [vmem:[#allocation85_spill] sm:$0xff] }
 0x286   : > { %v3078_v5 = vmul.f32 0.0052083335, %v3014_v62  ;;  %2951 = vst.msk [vmem:[#allocation2 + $0x28] sm:$0xff] %vm204_vm3, %v2886_v20  ;;  %v2760_v40 = vadd.f32 %v2584_v53, %v2146_v47  ;;  %v2153_v20 = vadd.f32 %v5457_v35, %v6381_v44  ;;  %v6385_v44 = vld [vmem:[#allocation84_spill] sm:$0xff] }
 0x287   : > { %v2893_v62 = vadd.f32 %v2829_v16, %v2765_v6  ;;  %v3021_v53 = vld [vmem:[#allocation2 + $0x40] sm:$0xff] }
 0x288   : > { %3142 = vst.msk [vmem:[%s5719_s7 + $0x8] sm:$0xff] %vm204_vm3, %v3078_v5  ;;  %v2888_v3 = vadd.f32 %v2824_v12, %v2760_v40  ;;  %v2831_v12 = vld [vmem:[#allocation2 + $0x70] sm:$0xff]  ;;  %v2605_v5 = vpop.xlane.xlu1 %2604  ;;  %v3085_v45 = vmul.f32 0.0052083335, %v3021_v53 }
 0x289   : > { %v3016_v61 = vld [vmem:[#allocation2 + $0x18] sm:$0xff]  ;;  %v2590_v38 = vpop.xlane.xlu0 %2589  ;;  %2958 = vst.msk [vmem:[#allocation2 + $0x60] sm:$0xff] %vm204_vm3, %v2893_v62  ;;  %v2767_v35 = vadd.f32 %v2605_v5, %v2153_v20  ;;  %v2157_v20 = vadd.f32 %v5481_v52, %v6385_v44 }
 0x28a   : > { %v3080_v47 = vmul.f32 0.0052083335, %v3016_v61  ;;  %2953 = vst.msk [vmem:[#allocation2 + $0x38] sm:$0xff] %vm204_vm3, %v2888_v3  ;;  %v2762_v7 = vadd.f32 %v2590_v38, %v2148_v31  ;;  %v2155_v31 = vadd.f32 %v5469_v63, %v6383_v11  ;;  %v2152_v3 = vadd.f32 %v5471_v37, %v6384_v34  ;;  %3149 = vst.msk [vmem:[%s5719_s7 + $0x40] sm:$0xff] %vm204_vm3, %v3085_v45  ;;  %v2833_v61 = vld [vmem:[#allocation2 + $0x80] sm:$0xff]  ;;  %v6388_v11 = vld [vmem:[#allocation94_spill] sm:$0xff] }
 0x28b   : > { %v2895_v16 = vadd.f32 %v2831_v12, %v2767_v35  ;;  %v2835_v12 = vld [vmem:[#allocation2 + $0x90] sm:$0xff] }
 0x28c   : > { %3144 = vst.msk [vmem:[%s5719_s7 + $0x18] sm:$0xff] %vm204_vm3, %v3080_v47  ;;  %v2890_v22 = vadd.f32 %v2826_v24, %v2762_v7  ;;  %v3023_v50 = vld [vmem:[#allocation2 + $0x50] sm:$0xff]  ;;  %v2611_v38 = vpop.xlane.xlu1 %2610 }
 0x28d   : > { %v3018_v10 = vld [vmem:[#allocation2 + $0x28] sm:$0xff]  ;;  %v2596_v40 = vpop.xlane.xlu0 %2595  ;;  %v3087_v6 = vmul.f32 0.0052083335, %v3023_v50  ;;  %2960 = vst.msk [vmem:[#allocation2 + $0x70] sm:$0xff] %vm204_vm3, %v2895_v16  ;;  %v2769_v63 = vadd.f32 %v2611_v38, %v2155_v31  ;;  %v6387_v35 = vld [vmem:[#allocation97_spill] sm:$0xff]  ;;  %v2156_v31 = vadd.f32 %v5495_v36, %v6388_v11  ;;  %v2837_v16 = vld [vmem:[#allocation2 + $0xa0] sm:$0xff] }
 0x28e   : > { %v3082_v14 = vmul.f32 0.0052083335, %v3018_v10  ;;  %2955 = vst.msk [vmem:[#allocation2 + $0x48] sm:$0xff] %vm204_vm3, %v2890_v22  ;;  %v2764_v23 = vadd.f32 %v2596_v40, %v2150_v58  ;;  %v2154_v58 = vadd.f32 %v5483_v55, %v6386_v1  ;;  %v2839_v1 = vld [vmem:[#allocation2 + $0xb0] sm:$0xff] }
 0x28f   : > { %3151 = vst.msk [vmem:[%s5719_s7 + $0x50] sm:$0xff] %vm204_vm3, %v3087_v6  ;;  %v2897_v62 = vadd.f32 %v2833_v61, %v2769_v63  ;;  %v6389_v6 = vld [vmem:[#allocation93_spill] sm:$0xff] }
 0x290   : > { %3146 = vst.msk [vmem:[%s5719_s7 + $0x28] sm:$0xff] %vm204_vm3, %v3082_v14  ;;  %v2892_v54 = vadd.f32 %v2828_v8, %v2764_v23  ;;  %v3025_v53 = vld [vmem:[#allocation2 + $0x60] sm:$0xff]  ;;  %v2617_v5 = vpop.xlane.xlu1 %2616  ;;  %v2832_v8 = vld [vmem:[#allocation2 + $0x78] sm:$0xff]  ;;  %v2159_v23 = vadd.f32 %v5493_v26, %v6387_v35  ;;  %v6390_v63 = vld [vmem:[#allocation89_spill] sm:$0xff] }
 0x291   : > { %v3020_v24 = vld [vmem:[#allocation2 + $0x38] sm:$0xff]  ;;  %v2602_v47 = vpop.xlane.xlu0 %2601  ;;  %v3089_v45 = vmul.f32 0.0052083335, %v3025_v53  ;;  %2962 = vst.msk [vmem:[#allocation2 + $0x80] sm:$0xff] %vm204_vm3, %v2897_v62  ;;  %v2771_v52 = vadd.f32 %v2617_v5, %v2157_v20  ;;  %v2841_v35 = vld [vmem:[#allocation2 + $0xc0] sm:$0xff] }
 0x292   : > { %v3084_v7 = vmul.f32 0.0052083335, %v3020_v24  ;;  %2957 = vst.msk [vmem:[#allocation2 + $0x58] sm:$0xff] %vm204_vm3, %v2892_v54  ;;  %v2766_v37 = vadd.f32 %v2602_v47, %v2152_v3  ;;  %v2834_v24 = vld [vmem:[#allocation2 + $0x88] sm:$0xff] }
 0x293   : > { %3153 = vst.msk [vmem:[%s5719_s7 + $0x60] sm:$0xff] %vm204_vm3, %v3089_v45  ;;  %v2899_v34 = vadd.f32 %v2835_v12, %v2771_v52  ;;  %v2836_v12 = vld [vmem:[#allocation2 + $0x98] sm:$0xff] }
 0x294   : > { %3148 = vst.msk [vmem:[%s5719_s7 + $0x38] sm:$0xff] %vm204_vm3, %v3084_v7  ;;  %v2894_v22 = vadd.f32 %v2830_v43, %v2766_v37  ;;  %v3027_v54 = vld [vmem:[#allocation2 + $0x70] sm:$0xff]  ;;  %v2623_v50 = vpop.xlane.xlu1 %2622  ;;  %v2161_v7 = vadd.f32 %v5505_v59, %v6389_v6  ;;  %v2158_v37 = vadd.f32 %v5507_v32, %v6390_v63  ;;  %v6392_v45 = vld [vmem:[#allocation102_spill] sm:$0xff] }
 0x295   : > { %v3022_v10 = vld [vmem:[#allocation2 + $0x48] sm:$0xff]  ;;  %v2608_v40 = vpop.xlane.xlu0 %2607  ;;  %v3091_v43 = vmul.f32 0.0052083335, %v3027_v54  ;;  %2964 = vst.msk [vmem:[#allocation2 + $0x90] sm:$0xff] %vm204_vm3, %v2899_v34  ;;  %v2773_v26 = vadd.f32 %v2623_v50, %v2159_v23  ;;  %v2840_v63 = vld [vmem:[#allocation2 + $0xb8] sm:$0xff] }
 0x296   : > { %v3086_v14 = vmul.f32 0.0052083335, %v3022_v10  ;;  %2959 = vst.msk [vmem:[#allocation2 + $0x68] sm:$0xff] %vm204_vm3, %v2894_v22  ;;  %v2768_v55 = vadd.f32 %v2608_v40, %v2154_v58  ;;  %v2838_v34 = vld [vmem:[#allocation2 + $0xa8] sm:$0xff] }
 0x297   : > { %3155 = vst.msk [vmem:[%s5719_s7 + $0x70] sm:$0xff] %vm204_vm3, %v3091_v43  ;;  %v2901_v44 = vadd.f32 %v2837_v16, %v2773_v26  ;;  %v2843_v26 = vld [vmem:[#allocation2 + $0xd0] sm:$0xff] }
 0x298   : > { %3150 = vst.msk [vmem:[%s5719_s7 + $0x48] sm:$0xff] %vm204_vm3, %v3086_v14  ;;  %v2896_v3 = vadd.f32 %v2832_v8, %v2768_v55  ;;  %v3029_v58 = vld [vmem:[#allocation2 + $0x80] sm:$0xff]  ;;  %v2629_v22 = vpop.xlane.xlu1 %2628  ;;  %v2160_v14 = vadd.f32 %v5519_v41, %v6392_v45 }
 0x299   : > { %v3024_v61 = vld [vmem:[#allocation2 + $0x58] sm:$0xff]  ;;  %v2614_v38 = vpop.xlane.xlu0 %2613  ;;  %v3093_v10 = vmul.f32 0.0052083335, %v3029_v58  ;;  %2966 = vst.msk [vmem:[#allocation2 + $0xa0] sm:$0xff] %vm204_vm3, %v2901_v44  ;;  %v2775_v59 = vadd.f32 %v2629_v22, %v2161_v7  ;;  %v6391_v8 = vld [vmem:[#allocation103_spill] sm:$0xff]  ;;  %v6397_v22 = vld [vmem:[#allocation5_spill] sm:$0xff] }
 0x29a   : > { %v3088_v47 = vmul.f32 0.0052083335, %v3024_v61  ;;  %2961 = vst.msk [vmem:[#allocation2 + $0x78] sm:$0xff] %vm204_vm3, %v2896_v3  ;;  %v2770_v36 = vadd.f32 %v2614_v38, %v2156_v31  ;;  %v2163_v40 = vadd.f32 %v5517_v56, %v6391_v8  ;;  %v6393_v61 = vld [vmem:[#allocation101_spill] sm:$0xff] }
 0x29b   : > { %3157 = vst.msk [vmem:[%s5719_s7 + $0x80] sm:$0xff] %vm204_vm3, %v3093_v10  ;;  %v2903_v52 = vadd.f32 %v2839_v1, %v2775_v59  ;;  %v2165_v50 = vadd.f32 %v5529_v21, %v6393_v61  ;;  %v6395_v1 = vld [vmem:[#allocation7_spill] sm:$0xff]  ;;  %v2844_v61 = vld [vmem:[#allocation2 + $0xd8] sm:$0xff] }
 0x29c   : > { %3152 = vst.msk [vmem:[%s5719_s7 + $0x58] sm:$0xff] %vm204_vm3, %v3088_v47  ;;  %v2898_v20 = vadd.f32 %v2834_v24, %v2770_v36  ;;  %v3031_v23 = vld [vmem:[#allocation2 + $0x90] sm:$0xff]  ;;  %v2635_v31 = vpop.xlane.xlu1 %2634  ;;  %v6394_v24 = vld [vmem:[#allocation98_spill] sm:$0xff]  ;;  %v2167_v58 = vadd.f32 %v6395_v1, %v5182_v48  ;;  %v2846_v1 = vld [vmem:[#allocation2 + $0xe8] sm:$0xff] }
 0x29d   : > { %v3026_v62 = vld [vmem:[#allocation2 + $0x68] sm:$0xff]  ;;  %v2620_v53 = vpop.xlane.xlu0 %2619  ;;  %v3095_v16 = vmul.f32 0.0052083335, %v3031_v23  ;;  %2968 = vst.msk [vmem:[#allocation2 + $0xb0] sm:$0xff] %vm204_vm3, %v2903_v52  ;;  %v2777_v56 = vadd.f32 %v2635_v31, %v2163_v40  ;;  %v2162_v38 = vadd.f32 %v5531_v57, %v6394_v24 }
 0x29e   : > { %v3090_v5 = vmul.f32 0.0052083335, %v3026_v62  ;;  %2963 = vst.msk [vmem:[#allocation2 + $0x88] sm:$0xff] %vm204_vm3, %v2898_v20  ;;  %v2772_v32 = vadd.f32 %v2620_v53, %v2158_v37  ;;  %v6396_v62 = vld [vmem:[#allocation106_spill] sm:$0xff]  ;;  %v2842_v40 = vld [vmem:[#allocation2 + $0xc8] sm:$0xff] }
 0x29f   : > { %3159 = vst.msk [vmem:[%s5719_s7 + $0x90] sm:$0xff] %vm204_vm3, %v3095_v16  ;;  %v2905_v43 = vadd.f32 %v2841_v35, %v2777_v56  ;;  %v6398_v35 = vld [vmem:[#allocation54_spill] sm:$0xff]  ;;  %v2847_v16 = vld [vmem:[#allocation2 + $0xf0] sm:$0xff] }
 0x2a0   : > { %3154 = vst.msk [vmem:[%s5719_s7 + $0x68] sm:$0xff] %vm204_vm3, %v3090_v5  ;;  %v2900_v55 = vadd.f32 %v2836_v12, %v2772_v32  ;;  %v3033_v36 = vld [vmem:[#allocation2 + $0xa0] sm:$0xff]  ;;  %v2641_v7 = vpop.xlane.xlu1 %2640  ;;  %v2164_v12 = vadd.f32 %v6397_v22, %v6396_v62  ;;  %v2169_v23 = vadd.f32 %v5553_v18, %v6398_v35  ;;  %v2848_v35 = vld [vmem:[#allocation2 + $0xf8] sm:$0xff] }
 0x2a1   : > { %v3028_v11 = vld [vmem:[#allocation2 + $0x78] sm:$0xff]  ;;  %v2626_v3 = vpop.xlane.xlu0 %2625  ;;  %v3097_v44 = vmul.f32 0.0052083335, %v3033_v36  ;;  %2970 = vst.msk [vmem:[#allocation2 + $0xc0] sm:$0xff] %vm204_vm3, %v2905_v43  ;;  %v2779_v21 = vadd.f32 %v2641_v7, %v2165_v50  ;;  %v2845_v5 = vld [vmem:[#allocation2 + $0xe0] sm:$0xff]  ;;  %v6402_v36 = vld [vmem:[#allocation108_spill] sm:$0xff] }
 0x2a2   : > { %v3092_v54 = vmul.f32 0.0052083335, %v3028_v11  ;;  %2965 = vst.msk [vmem:[#allocation2 + $0x98] sm:$0xff] %vm204_vm3, %v2900_v55  ;;  %v2774_v41 = vadd.f32 %v2626_v3, %v2160_v14  ;;  %v6399_v11 = vld [vmem:[#allocation105_spill] sm:$0xff]  ;;  %v6400_v43 = vld [vmem:[#allocation59_spill] sm:$0xff] }
 0x2a3   : > { %3161 = vst.msk [vmem:[%s5719_s7 + $0xa0] sm:$0xff] %vm204_vm3, %v3097_v44  ;;  %v2907_v53 = vadd.f32 %v2843_v26, %v2779_v21  ;;  %v2166_v31 = vadd.f32 %v5555_v28, %v6399_v11  ;;  %v2849_v44 = vld [vmem:[#allocation2 + $0x100] sm:$0xff] }
 0x2a4   : > { %3156 = vst.msk [vmem:[%s5719_s7 + $0x78] sm:$0xff] %vm204_vm3, %v3092_v54  ;;  %v2902_v47 = vadd.f32 %v2838_v34, %v2774_v41  ;;  %v3035_v59 = vld [vmem:[#allocation2 + $0xb0] sm:$0xff]  ;;  %v2647_v8 = vpop.xlane.xlu1 %2646 }
 0x2a5   : > { %v3030_v6 = vld [vmem:[#allocation2 + $0x88] sm:$0xff]  ;;  %v2632_v37 = vpop.xlane.xlu0 %2631  ;;  %v3099_v14 = vmul.f32 0.0052083335, %v3035_v59  ;;  %2972 = vst.msk [vmem:[#allocation2 + $0xd0] sm:$0xff] %vm204_vm3, %v2907_v53  ;;  %v2781_v48 = vadd.f32 %v2647_v8, %v2167_v58  ;;  %v6405_v59 = vld [vmem:[#allocation107_spill] sm:$0xff] }
 0x2a6   : > { %v3094_v20 = vmul.f32 0.0052083335, %v3030_v6  ;;  %2967 = vst.msk [vmem:[#allocation2 + $0xa8] sm:$0xff] %vm204_vm3, %v2902_v47  ;;  %v2776_v57 = vadd.f32 %v2632_v37, %v2162_v38  ;;  %v6401_v47 = vld [vmem:[#allocation9_spill] sm:$0xff]  ;;  %v6403_v6 = vld [vmem:[#allocation6_spill] sm:$0xff] }
 0x2a7   : > { %3163 = vst.msk [vmem:[%s5719_s7 + $0xb0] sm:$0xff] %vm204_vm3, %v3099_v14  ;;  %v2909_v34 = vadd.f32 %v2845_v5, %v2781_v48  ;;  %v2171_v26 = vadd.f32 %v6401_v47, %v6400_v43  ;;  %v2168_v7 = vadd.f32 %v6403_v6, %v6402_v36  ;;  %v2851_v14 = vld [vmem:[#allocation2 + $0x110] sm:$0xff]  ;;  %v2850_v47 = vld [vmem:[#allocation2 + $0x108] sm:$0xff] }
 0x2a8   : > { %3158 = vst.msk [vmem:[%s5719_s7 + $0x88] sm:$0xff] %vm204_vm3, %v3094_v20  ;;  %v2904_v10 = vadd.f32 %v2840_v63, %v2776_v57  ;;  %v3037_v54 = vld [vmem:[#allocation2 + $0xc0] sm:$0xff]  ;;  %v2653_v41 = vpop.xlane.xlu1 %2652 }
 0x2a9   : > { %v3032_v32 = vld [vmem:[#allocation2 + $0x98] sm:$0xff]  ;;  %v2638_v45 = vpop.xlane.xlu0 %2637  ;;  %v3101_v24 = vmul.f32 0.0052083335, %v3037_v54  ;;  %2974 = vst.msk [vmem:[#allocation2 + $0xe0] sm:$0xff] %vm204_vm3, %v2909_v34  ;;  %v2783_v18 = vadd.f32 %v2653_v41, %v2169_v23  ;;  %v6410_v41 = vld [vmem:[#allocation12_spill] sm:$0xff] }
 0x2aa   : > { %v3096_v52 = vmul.f32 0.0052083335, %v3032_v32  ;;  %2969 = vst.msk [vmem:[#allocation2 + $0xb8] sm:$0xff] %vm204_vm3, %v2904_v10  ;;  %v2778_v55 = vadd.f32 %v2638_v45, %v2164_v12  ;;  %v6404_v10 = vld [vmem:[#allocation57_spill] sm:$0xff]  ;;  %v6406_v32 = vld [vmem:[#allocation11_spill] sm:$0xff] }
 0x2ab   : > { %3165 = vst.msk [vmem:[%s5719_s7 + $0xc0] sm:$0xff] %vm204_vm3, %v3101_v24  ;;  %v2911_v63 = vadd.f32 %v2847_v16, %v2783_v18  ;;  %v2173_v5 = vadd.f32 %v5575_v46, %v6404_v10  ;;  %v2170_v8 = vadd.f32 %v6406_v32, %v6405_v59  ;;  %v6408_v16 = vld [vmem:[#allocation8_spill] sm:$0xff]  ;;  %v6413_v32 = vld [vmem:[#allocation74_spill] sm:$0xff] }
 0x2ac   : > { %3160 = vst.msk [vmem:[%s5719_s7 + $0x98] sm:$0xff] %vm204_vm3, %v3096_v52  ;;  %v2906_v3 = vadd.f32 %v2842_v40, %v2778_v55  ;;  %v3039_v20 = vld [vmem:[#allocation2 + $0xd0] sm:$0xff]  ;;  %v2659_v57 = vpop.xlane.xlu1 %2658 }
 0x2ad   : > { %v3034_v56 = vld [vmem:[#allocation2 + $0xa8] sm:$0xff]  ;;  %v2644_v50 = vpop.xlane.xlu0 %2643  ;;  %v3103_v62 = vmul.f32 0.0052083335, %v3039_v20  ;;  %2976 = vst.msk [vmem:[#allocation2 + $0xf0] sm:$0xff] %vm204_vm3, %v2911_v63  ;;  %v2785_v12 = vadd.f32 %v2659_v57, %v2171_v26 }
 0x2ae   : > { %v3098_v38 = vmul.f32 0.0052083335, %v3034_v56  ;;  %2971 = vst.msk [vmem:[#allocation2 + $0xc8] sm:$0xff] %vm204_vm3, %v2906_v3  ;;  %v2780_v28 = vadd.f32 %v2644_v50, %v2166_v31  ;;  %v6407_v3 = vld [vmem:[#allocation13_spill] sm:$0xff]  ;;  %v6409_v56 = vld [vmem:[#allocation66_spill] sm:$0xff]  ;;  %v6412_v20 = vld [vmem:[#allocation64_spill] sm:$0xff] }
 0x2af   : > { %3167 = vst.msk [vmem:[%s5719_s7 + $0xd0] sm:$0xff] %vm204_vm3, %v3103_v62  ;;  %v2913_v40 = vadd.f32 %v2849_v44, %v2785_v12  ;;  %v2175_v54 = vadd.f32 %v6408_v16, %v6407_v3 }
 0x2b0   : > { %3162 = vst.msk [vmem:[%s5719_s7 + $0xa8] sm:$0xff] %vm204_vm3, %v3098_v38  ;;  %v2908_v37 = vadd.f32 %v2844_v61, %v2780_v28  ;;  %v3041_v52 = vld [vmem:[#allocation2 + $0xe0] sm:$0xff]  ;;  %v2665_v55 = vpop.xlane.xlu1 %2664  ;;  %v2172_v61 = vadd.f32 %v6410_v41, %v6409_v56 }
 0x2b1   : > { %v3036_v21 = vld [vmem:[#allocation2 + $0xb8] sm:$0xff]  ;;  %v2650_v58 = vpop.xlane.xlu0 %2649  ;;  %v3105_v11 = vmul.f32 0.0052083335, %v3041_v52  ;;  %2978 = vst.msk [vmem:[#allocation2 + $0x100] sm:$0xff] %vm204_vm3, %v2913_v40  ;;  %v2787_v46 = vadd.f32 %v2665_v55, %v2173_v5  ;;  %v2853_v38 = vld [vmem:[#allocation2 + $0x120] sm:$0xff] }
 0x2b2   : > { %v3100_v22 = vmul.f32 0.0052083335, %v3036_v21  ;;  %2973 = vst.msk [vmem:[#allocation2 + $0xd8] sm:$0xff] %vm204_vm3, %v2908_v37  ;;  %v2782_v53 = vadd.f32 %v2650_v58, %v2168_v7  ;;  %v6411_v37 = vld [vmem:[#allocation65_spill] sm:$0xff]  ;;  %v2174_v21 = vadd.f32 %v5599_v0, %v6412_v20  ;;  %v6417_v41 = vld [vmem:[#allocation19_spill] sm:$0xff]  ;;  %v6420_v20 = vld [vmem:[#allocation82_spill] sm:$0xff] }
 0x2b3   : > { %3169 = vst.msk [vmem:[%s5719_s7 + $0xe0] sm:$0xff] %vm204_vm3, %v3105_v11  ;;  %v2915_v50 = vadd.f32 %v2851_v14, %v2787_v46  ;;  %v2177_v44 = vadd.f32 %v5597_v27, %v6411_v37  ;;  %v2855_v58 = vld [vmem:[#allocation2 + $0x130] sm:$0xff]  ;;  %v6416_v14 = vld [vmem:[#allocation14_spill] sm:$0xff]  ;;  %v2854_v46 = vld [vmem:[#allocation2 + $0x128] sm:$0xff] }
 0x2b4   : > { %3164 = vst.msk [vmem:[%s5719_s7 + $0xb8] sm:$0xff] %vm204_vm3, %v3100_v22  ;;  %v2910_v45 = vadd.f32 %v2846_v1, %v2782_v53  ;;  %v3043_v18 = vld [vmem:[#allocation2 + $0xf0] sm:$0xff]  ;;  %v2671_v43 = vpop.xlane.xlu1 %2670  ;;  %v2852_v53 = vld [vmem:[#allocation2 + $0x118] sm:$0xff] }
 0x2b5   : > { %v3038_v48 = vld [vmem:[#allocation2 + $0xc8] sm:$0xff]  ;;  %v2656_v23 = vpop.xlane.xlu0 %2655  ;;  %v3107_v36 = vmul.f32 0.0052083335, %v3043_v18  ;;  %2980 = vst.msk [vmem:[#allocation2 + $0x110] sm:$0xff] %vm204_vm3, %v2915_v50  ;;  %v2789_v7 = vadd.f32 %v2671_v43, %v2175_v54  ;;  %v2859_v43 = vld [vmem:[#allocation2 + $0x150] sm:$0xff] }
 0x2b6   : > { %v3102_v31 = vmul.f32 0.0052083335, %v3038_v48  ;;  %2975 = vst.msk [vmem:[#allocation2 + $0xe8] sm:$0xff] %vm204_vm3, %v2910_v45  ;;  %v2784_v34 = vadd.f32 %v2656_v23, %v2170_v8  ;;  %v6414_v8 = vld [vmem:[#allocation10_spill] sm:$0xff]  ;;  %v6415_v45 = vld [vmem:[#allocation71_spill] sm:$0xff]  ;;  %v6418_v50 = vld [vmem:[#allocation16_spill] sm:$0xff] }
 0x2b7   : > { %3171 = vst.msk [vmem:[%s5719_s7 + $0xf0] sm:$0xff] %vm204_vm3, %v3107_v36  ;;  %v2917_v57 = vadd.f32 %v2853_v38, %v2789_v7  ;;  %v2179_v40 = vadd.f32 %v6414_v8, %v6413_v32  ;;  %v2176_v52 = vadd.f32 %v6416_v14, %v6415_v45  ;;  %v6424_v14 = vld [vmem:[#allocation78_spill] sm:$0xff] }
 0x2b8   : > { %3166 = vst.msk [vmem:[%s5719_s7 + $0xc8] sm:$0xff] %vm204_vm3, %v3102_v31  ;;  %v2912_v24 = vadd.f32 %v2848_v35, %v2784_v34  ;;  %v3045_v62 = vld [vmem:[#allocation2 + $0x100] sm:$0xff]  ;;  %v2677_v12 = vpop.xlane.xlu1 %2676 }
 0x2b9   : > { %v3040_v28 = vld [vmem:[#allocation2 + $0xd8] sm:$0xff]  ;;  %v2662_v26 = vpop.xlane.xlu0 %2661  ;;  %v3109_v5 = vmul.f32 0.0052083335, %v3045_v62  ;;  %2982 = vst.msk [vmem:[#allocation2 + $0x120] sm:$0xff] %vm204_vm3, %v2917_v57  ;;  %v2791_v27 = vadd.f32 %v2677_v12, %v2177_v44  ;;  %v2857_v35 = vld [vmem:[#allocation2 + $0x140] sm:$0xff] }
 0x2ba   : > { %v3104_v6 = vmul.f32 0.0052083335, %v3040_v28  ;;  %2977 = vst.msk [vmem:[#allocation2 + $0xf8] sm:$0xff] %vm204_vm3, %v2912_v24  ;;  %v2786_v63 = vadd.f32 %v2662_v26, %v2172_v61  ;;  %v2181_v61 = vadd.f32 %v5617_v17, %v6417_v41  ;;  %v6419_v24 = vld [vmem:[#allocation15_spill] sm:$0xff]  ;;  %v6426_v41 = vld [vmem:[#allocation90_spill] sm:$0xff] }
 0x2bb   : > { %3173 = vst.msk [vmem:[%s5719_s7 + $0x100] sm:$0xff] %vm204_vm3, %v3109_v5  ;;  %v2919_v48 = vadd.f32 %v2855_v58, %v2791_v27  ;;  %v2178_v38 = vadd.f32 %v6419_v24, %v6418_v50  ;;  %v6423_v58 = vld [vmem:[#allocation18_spill] sm:$0xff]  ;;  %v2858_v27 = vld [vmem:[#allocation2 + $0x148] sm:$0xff]  ;;  %v6427_v50 = vld [vmem:[#allocation87_spill] sm:$0xff] }
 0x2bc   : > { %3168 = vst.msk [vmem:[%s5719_s7 + $0xd8] sm:$0xff] %vm204_vm3, %v3104_v6  ;;  %v2914_v1 = vadd.f32 %v2850_v47, %v2786_v63  ;;  %v3047_v23 = vld [vmem:[#allocation2 + $0x110] sm:$0xff]  ;;  %v2683_v31 = vpop.xlane.xlu1 %2682  ;;  %v2856_v6 = vld [vmem:[#allocation2 + $0x138] sm:$0xff]  ;;  %v6428_v24 = vld [vmem:[#allocation92_spill] sm:$0xff] }
 0x2bd   : > { %v3042_v22 = vld [vmem:[#allocation2 + $0xe8] sm:$0xff]  ;;  %v2668_v10 = vpop.xlane.xlu0 %2667  ;;  %v3111_v3 = vmul.f32 0.0052083335, %v3047_v23  ;;  %2984 = vst.msk [vmem:[#allocation2 + $0x130] sm:$0xff] %vm204_vm3, %v2919_v48  ;;  %v2793_v54 = vadd.f32 %v2683_v31, %v2179_v40  ;;  %v6425_v48 = vld [vmem:[#allocation75_spill] sm:$0xff] }
 0x2be   : > { %v3106_v59 = vmul.f32 0.0052083335, %v3042_v22  ;;  %2979 = vst.msk [vmem:[#allocation2 + $0x108] sm:$0xff] %vm204_vm3, %v2914_v1  ;;  %v2788_v0 = vadd.f32 %v2668_v10, %v2174_v21  ;;  %v6421_v21 = vld [vmem:[#allocation17_spill] sm:$0xff]  ;;  %v6422_v1 = vld [vmem:[#allocation79_spill] sm:$0xff] }
 0x2bf   : > { %3175 = vst.msk [vmem:[%s5719_s7 + $0x110] sm:$0xff] %vm204_vm3, %v3111_v3  ;;  %v2921_v18 = vadd.f32 %v2857_v35, %v2793_v54  ;;  %v2183_v57 = vadd.f32 %v6421_v21, %v6420_v20  ;;  %v2180_v62 = vadd.f32 %v6423_v58, %v6422_v1  ;;  %v2860_v3 = vld [vmem:[#allocation2 + $0x158] sm:$0xff]  ;;  %v6430_v21 = vld [vmem:[#allocation83_spill] sm:$0xff] }
 0x2c0   : > { %3170 = vst.msk [vmem:[%s5719_s7 + $0xe8] sm:$0xff] %vm204_vm3, %v3106_v59  ;;  %v2916_v55 = vadd.f32 %v2852_v53, %v2788_v0  ;;  %v3049_v47 = vld [vmem:[#allocation2 + $0x120] sm:$0xff]  ;;  %v2689_v36 = vpop.xlane.xlu1 %2688 }
 0x2c1   : > { %v3044_v11 = vld [vmem:[#allocation2 + $0xf8] sm:$0xff]  ;;  %v2674_v34 = vpop.xlane.xlu0 %2673  ;;  %v3113_v63 = vmul.f32 0.0052083335, %v3049_v47  ;;  %2986 = vst.msk [vmem:[#allocation2 + $0x140] sm:$0xff] %vm204_vm3, %v2921_v18  ;;  %v2795_v17 = vadd.f32 %v2689_v36, %v2181_v61  ;;  %v2861_v53 = vld [vmem:[#allocation2 + $0x160] sm:$0xff]  ;;  %v2187_v61 = vadd.f32 %v5644_v33, %v6426_v41 }
 0x2c2   : > { %v3108_v16 = vmul.f32 0.0052083335, %v3044_v11  ;;  %2981 = vst.msk [vmem:[#allocation2 + $0x118] sm:$0xff] %vm204_vm3, %v2916_v55  ;;  %v2790_v56 = vadd.f32 %v2674_v34, %v2176_v52  ;;  %v2185_v52 = vadd.f32 %v5636_v13, %v6424_v14  ;;  %v2182_v55 = vadd.f32 %v5638_v4, %v6425_v48  ;;  %v2863_v11 = vld [vmem:[#allocation2 + $0x170] sm:$0xff] }
 0x2c3   : > { %3177 = vst.msk [vmem:[%s5719_s7 + $0x120] sm:$0xff] %vm204_vm3, %v3113_v63  ;;  %v2923_v22 = vadd.f32 %v2859_v43, %v2795_v17  ;;  %v2865_v43 = vld [vmem:[#allocation2 + $0x180] sm:$0xff] }
 0x2c4   : > { %3172 = vst.msk [vmem:[%s5719_s7 + $0xf8] sm:$0xff] %vm204_vm3, %v3108_v16  ;;  %v2918_v28 = vadd.f32 %v2854_v46, %v2790_v56  ;;  %v3051_v10 = vld [vmem:[#allocation2 + $0x130] sm:$0xff]  ;;  %v2695_v59 = vpop.xlane.xlu1 %2694 }
 0x2c5   : > { %v3046_v26 = vld [vmem:[#allocation2 + $0x108] sm:$0xff]  ;;  %v2680_v7 = vpop.xlane.xlu0 %2679  ;;  %v3115_v32 = vmul.f32 0.0052083335, %v3051_v10  ;;  %2988 = vst.msk [vmem:[#allocation2 + $0x150] sm:$0xff] %vm204_vm3, %v2923_v22  ;;  %v2797_v40 = vadd.f32 %v2695_v59, %v2183_v57  ;;  %v2186_v57 = vadd.f32 %v5655_v15, %v6430_v21  ;;  %v2864_v10 = vld [vmem:[#allocation2 + $0x178] sm:$0xff] }
 0x2c6   : > { %v3110_v37 = vmul.f32 0.0052083335, %v3046_v26  ;;  %2983 = vst.msk [vmem:[#allocation2 + $0x128] sm:$0xff] %vm204_vm3, %v2918_v28  ;;  %v2792_v44 = vadd.f32 %v2680_v7, %v2178_v38  ;;  %v2184_v38 = vadd.f32 %v6428_v24, %v6427_v50  ;;  %v2868_v24 = vld [vmem:[#allocation2 + $0x198] sm:$0xff] }
 0x2c7   : > { %3179 = vst.msk [vmem:[%s5719_s7 + $0x130] sm:$0xff] %vm204_vm3, %v3115_v32  ;;  %v2925_v35 = vadd.f32 %v2861_v53, %v2797_v40 }
 0x2c8   : > { %3174 = vst.msk [vmem:[%s5719_s7 + $0x108] sm:$0xff] %vm204_vm3, %v3110_v37  ;;  %v2920_v12 = vadd.f32 %v2856_v6, %v2792_v44  ;;  %v3053_v31 = vld [vmem:[#allocation2 + $0x140] sm:$0xff]  ;;  %v2701_v34 = vpop.xlane.xlu1 %2700  ;;  %v2862_v6 = vld [vmem:[#allocation2 + $0x168] sm:$0xff]  ;;  %v6429_v44 = vld [vmem:[#allocation86_spill] sm:$0xff] }
 0x2c9   : > { %v3048_v5 = vld [vmem:[#allocation2 + $0x118] sm:$0xff]  ;;  %v2686_v0 = vpop.xlane.xlu0 %2685  ;;  %v3117_v54 = vmul.f32 0.0052083335, %v3053_v31  ;;  %2990 = vst.msk [vmem:[#allocation2 + $0x160] sm:$0xff] %vm204_vm3, %v2925_v35  ;;  %v2799_v13 = vadd.f32 %v2701_v34, %v2185_v52  ;;  %v2189_v20 = vadd.f32 %v5653_v49, %v6429_v44  ;;  %v2869_v52 = vld [vmem:[#allocation2 + $0x1a0] sm:$0xff]  ;;  %v2870_v44 = vld [vmem:[#allocation2 + $0x1a8] sm:$0xff] }
 0x2ca   : > { %v3112_v8 = vmul.f32 0.0052083335, %v3048_v5  ;;  %2985 = vst.msk [vmem:[#allocation2 + $0x138] sm:$0xff] %vm204_vm3, %v2920_v12  ;;  %v2794_v45 = vadd.f32 %v2686_v0, %v2180_v62  ;;  %v2867_v62 = vld [vmem:[#allocation2 + $0x190] sm:$0xff]  ;;  %v6431_v0 = vld [vmem:[#allocation99_spill] sm:$0xff] }
 0x2cb   : > { %3181 = vst.msk [vmem:[%s5719_s7 + $0x140] sm:$0xff] %vm204_vm3, %v3117_v54  ;;  %v2927_v18 = vadd.f32 %v2863_v11, %v2799_v13  ;;  %v2191_v32 = vadd.f32 %v5661_v42, %v6431_v0  ;;  %v6433_v34 = vld [vmem:[#allocation95_spill] sm:$0xff] }
 0x2cc   : > { %3176 = vst.msk [vmem:[%s5719_s7 + $0x118] sm:$0xff] %vm204_vm3, %v3112_v8  ;;  %v2922_v23 = vadd.f32 %v2858_v27, %v2794_v45  ;;  %v3055_v47 = vld [vmem:[#allocation2 + $0x150] sm:$0xff]  ;;  %v2707_v36 = vpop.xlane.xlu1 %2706  ;;  %v6432_v8 = vld [vmem:[#allocation96_spill] sm:$0xff] }
 0x2cd   : > { %v3050_v46 = vld [vmem:[#allocation2 + $0x128] sm:$0xff]  ;;  %v2692_v16 = vpop.xlane.xlu0 %2691  ;;  %v3119_v63 = vmul.f32 0.0052083335, %v3055_v47  ;;  %2992 = vst.msk [vmem:[#allocation2 + $0x170] sm:$0xff] %vm204_vm3, %v2927_v18  ;;  %v2801_v33 = vadd.f32 %v2707_v36, %v2187_v61  ;;  %v2188_v40 = vadd.f32 %v5663_v60, %v6432_v8  ;;  %v6439_v8 = vld [vmem:[#allocation3_spill] sm:$0xff] }
 0x2ce   : > { %v3114_v56 = vmul.f32 0.0052083335, %v3050_v46  ;;  %2987 = vst.msk [vmem:[#allocation2 + $0x148] sm:$0xff] %vm204_vm3, %v2922_v23  ;;  %v2796_v4 = vadd.f32 %v2692_v16, %v2182_v55  ;;  %v2866_v23 = vld [vmem:[#allocation2 + $0x188] sm:$0xff]  ;;  %v6434_v16 = vld [vmem:[#allocation91_spill] sm:$0xff] }
 0x2cf   : > { %3183 = vst.msk [vmem:[%s5719_s7 + $0x150] sm:$0xff] %vm204_vm3, %v3119_v63  ;;  %v2929_v1 = vadd.f32 %v2865_v43, %v2801_v33  ;;  %v2190_v54 = vadd.f32 %v5671_v39, %v6434_v16  ;;  %v6435_v43 = vld [vmem:[#allocation51_spill] sm:$0xff]  ;;  %v6442_v16 = vld [vmem:[#allocation109_spill] sm:$0xff] }
 0x2d0   : > { %3178 = vst.msk [vmem:[%s5719_s7 + $0x128] sm:$0xff] %vm204_vm3, %v3114_v56  ;;  %v2924_v28 = vadd.f32 %v2860_v3, %v2796_v4  ;;  %v3057_v22 = vld [vmem:[#allocation2 + $0x160] sm:$0xff]  ;;  %v2713_v53 = vpop.xlane.xlu1 %2712  ;;  %v2193_v3 = vadd.f32 %v5669_v29, %v6433_v34  ;;  %v2871_v4 = vld [vmem:[#allocation2 + $0x1b0] sm:$0xff]  ;;  %v2195_v47 = vadd.f32 %v5676_v2, %v6435_v43 }
 0x2d1   : > { %v3052_v26 = vld [vmem:[#allocation2 + $0x138] sm:$0xff]  ;;  %v2698_v7 = vpop.xlane.xlu0 %2697  ;;  %v3121_v59 = vmul.f32 0.0052083335, %v3057_v22  ;;  %2994 = vst.msk [vmem:[#allocation2 + $0x180] sm:$0xff] %vm204_vm3, %v2929_v1  ;;  %v2803_v49 = vadd.f32 %v2713_v53, %v2189_v20  ;;  %v2873_v63 = vld [vmem:[#allocation2 + $0x1c0] sm:$0xff]  ;;  %v6437_v1 = vld [vmem:[#allocation56_spill] sm:$0xff] }
 0x2d2   : > { %v3116_v37 = vmul.f32 0.0052083335, %v3052_v26  ;;  %2989 = vst.msk [vmem:[#allocation2 + $0x158] sm:$0xff] %vm204_vm3, %v2924_v28  ;;  %v2798_v17 = vadd.f32 %v2698_v7, %v2184_v38  ;;  %v6436_v26 = vld [vmem:[#allocation104_spill] sm:$0xff] }
 0x2d3   : > { %3185 = vst.msk [vmem:[%s5719_s7 + $0x160] sm:$0xff] %vm204_vm3, %v3121_v59  ;;  %v2931_v45 = vadd.f32 %v2867_v62, %v2803_v49  ;;  %v2192_v36 = vadd.f32 %v5678_v51, %v6436_v26  ;;  %v6438_v62 = vld [vmem:[#allocation100_spill] sm:$0xff]  ;;  %v2872_v49 = vld [vmem:[#allocation2 + $0x1b8] sm:$0xff] }
 0x2d4   : > { %3180 = vst.msk [vmem:[%s5719_s7 + $0x138] sm:$0xff] %vm204_vm3, %v3116_v37  ;;  %v2926_v58 = vadd.f32 %v2862_v6, %v2798_v17  ;;  %v3059_v48 = vld [vmem:[#allocation2 + $0x170] sm:$0xff]  ;;  %v2719_v35 = vpop.xlane.xlu1 %2718  ;;  %v2194_v22 = vadd.f32 %v5685_v25, %v6438_v62 }
 0x2d5   : > { %v3054_v12 = vld [vmem:[#allocation2 + $0x148] sm:$0xff]  ;;  %v2704_v5 = vpop.xlane.xlu0 %2703  ;;  %v3123_v31 = vmul.f32 0.0052083335, %v3059_v48  ;;  %2996 = vst.msk [vmem:[#allocation2 + $0x190] sm:$0xff] %vm204_vm3, %v2931_v45  ;;  %v2805_v42 = vadd.f32 %v2719_v35, %v2191_v32  ;;  %v6440_v45 = vld [vmem:[#allocation55_spill] sm:$0xff] }
 0x2d6   : > { %v3118_v27 = vmul.f32 0.0052083335, %v3054_v12  ;;  %2991 = vst.msk [vmem:[#allocation2 + $0x168] sm:$0xff] %vm204_vm3, %v2926_v58  ;;  %v2800_v15 = vadd.f32 %v2704_v5, %v2186_v57  ;;  %v2197_v58 = vadd.f32 %v5683_v30, %v6437_v1  ;;  %v2877_v35 = vld [vmem:[#allocation2 + $0x1e0] sm:$0xff]  ;;  %v6448_v1 = vld [vmem:[#allocation4_spill] sm:$0xff] }
 0x2d7   : > { %3187 = vst.msk [vmem:[%s5719_s7 + $0x170] sm:$0xff] %vm204_vm3, %v3123_v31  ;;  %v2933_v56 = vadd.f32 %v2869_v52, %v2805_v42 }
 0x2d8   : > { %3182 = vst.msk [vmem:[%s5719_s7 + $0x148] sm:$0xff] %vm204_vm3, %v3118_v27  ;;  %v2928_v14 = vadd.f32 %v2864_v10, %v2800_v15  ;;  %v3061_v41 = vld [vmem:[#allocation2 + $0x180] sm:$0xff]  ;;  %v2725_v50 = vpop.xlane.xlu1 %2724  ;;  %v2875_v10 = vld [vmem:[#allocation2 + $0x1d0] sm:$0xff] }
 0x2d9   : > { %v3056_v55 = vld [vmem:[#allocation2 + $0x158] sm:$0xff]  ;;  %v2710_v11 = vpop.xlane.xlu0 %2709  ;;  %v3125_v18 = vmul.f32 0.0052083335, %v3061_v41  ;;  %2998 = vst.msk [vmem:[#allocation2 + $0x1a0] sm:$0xff] %vm204_vm3, %v2933_v56  ;;  %v2807_v29 = vadd.f32 %v2725_v50, %v2193_v3 }
 0x2da   : > { %v3120_v46 = vmul.f32 0.0052083335, %v3056_v55  ;;  %2993 = vst.msk [vmem:[#allocation2 + $0x178] sm:$0xff] %vm204_vm3, %v2928_v14  ;;  %v2802_v60 = vadd.f32 %v2710_v11, %v2188_v40  ;;  %v2199_v40 = vadd.f32 %v5688_v19, %v6439_v8  ;;  %v6441_v14 = vld [vmem:[#allocation20_spill] sm:$0xff] }
 0x2db   : > { %3189 = vst.msk [vmem:[%s5719_s7 + $0x180] sm:$0xff] %vm204_vm3, %v3125_v18  ;;  %v2935_v6 = vadd.f32 %v2871_v4, %v2807_v29  ;;  %v2196_v52 = vadd.f32 %v6441_v14, %v6440_v45  ;;  %v6445_v4 = vld [vmem:[#allocation22_spill] sm:$0xff] }
 0x2dc   : > { %3184 = vst.msk [vmem:[%s5719_s7 + $0x158] sm:$0xff] %vm204_vm3, %v3120_v46  ;;  %v2930_v13 = vadd.f32 %v2866_v23, %v2802_v60  ;;  %v3063_v37 = vld [vmem:[#allocation2 + $0x190] sm:$0xff]  ;;  %v2731_v17 = vpop.xlane.xlu1 %2730  ;;  %v2874_v46 = vld [vmem:[#allocation2 + $0x1c8] sm:$0xff]  ;;  %v2876_v29 = vld [vmem:[#allocation2 + $0x1d8] sm:$0xff] }
 0x2dd   : > { %v3058_v61 = vld [vmem:[#allocation2 + $0x168] sm:$0xff]  ;;  %v2716_v38 = vpop.xlane.xlu0 %2715  ;;  %v3127_v21 = vmul.f32 0.0052083335, %v3063_v37  ;;  %3000 = vst.msk [vmem:[#allocation2 + $0x1b0] sm:$0xff] %vm204_vm3, %v2935_v6  ;;  %v2809_v2 = vadd.f32 %v2731_v17, %v2195_v47  ;;  %v6446_v6 = vld [vmem:[#allocation111_spill] sm:$0xff] }
 0x2de   : > { %v3122_v28 = vmul.f32 0.0052083335, %v3058_v61  ;;  %2995 = vst.msk [vmem:[#allocation2 + $0x188] sm:$0xff] %vm204_vm3, %v2930_v13  ;;  %v2804_v39 = vadd.f32 %v2716_v38, %v2190_v54  ;;  %v6443_v54 = vld [vmem:[#allocation21_spill] sm:$0xff]  ;;  %v6444_v13 = vld [vmem:[#allocation110_spill] sm:$0xff] }
 0x2df   : > { %3191 = vst.msk [vmem:[%s5719_s7 + $0x190] sm:$0xff] %vm204_vm3, %v3127_v21  ;;  %v2937_v12 = vadd.f32 %v2873_v63, %v2809_v2  ;;  %v2201_v56 = vadd.f32 %v6443_v54, %v6442_v16  ;;  %v2198_v41 = vadd.f32 %v6445_v4, %v6444_v13 }
 0x2e0   : > { %3186 = vst.msk [vmem:[%s5719_s7 + $0x168] sm:$0xff] %vm204_vm3, %v3122_v28  ;;  %v2932_v7 = vadd.f32 %v2868_v24, %v2804_v39  ;;  %v3065_v5 = vld [vmem:[#allocation2 + $0x1a0] sm:$0xff]  ;;  %v2737_v27 = vpop.xlane.xlu1 %2736  ;;  %v2879_v24 = vld [vmem:[#allocation2 + $0x1f0] sm:$0xff] }
 0x2e1   : > { %v3060_v33 = vld [vmem:[#allocation2 + $0x178] sm:$0xff]  ;;  %v2722_v20 = vpop.xlane.xlu0 %2721  ;;  %v3129_v0 = vmul.f32 0.0052083335, %v3065_v5  ;;  %3002 = vst.msk [vmem:[#allocation2 + $0x1c0] sm:$0xff] %vm204_vm3, %v2937_v12  ;;  %v2811_v30 = vadd.f32 %v2737_v27, %v2197_v58  ;;  %v2202_v58 = vadd.f32 %v5703_v9, %v6448_v1 }
 0x2e2   : > { %v3124_v57 = vmul.f32 0.0052083335, %v3060_v33  ;;  %2997 = vst.msk [vmem:[#allocation2 + $0x198] sm:$0xff] %vm204_vm3, %v2932_v7  ;;  %v2806_v51 = vadd.f32 %v2722_v20, %v2192_v36  ;;  %v6447_v7 = vld [vmem:[#allocation23_spill] sm:$0xff]  ;;  %v2878_v20 = vld [vmem:[#allocation2 + $0x1e8] sm:$0xff] }
 0x2e3   : > { %3193 = vst.msk [vmem:[%s5719_s7 + $0x1a0] sm:$0xff] %vm204_vm3, %v3129_v0  ;;  %v2939_v48 = vadd.f32 %v2875_v10, %v2811_v30  ;;  %v2200_v63 = vadd.f32 %v6447_v7, %v6446_v6 }
 0x2e4   : > { %3188 = vst.msk [vmem:[%s5719_s7 + $0x178] sm:$0xff] %vm204_vm3, %v3124_v57  ;;  %v2934_v53 = vadd.f32 %v2870_v44, %v2806_v51  ;;  %v3067_v23 = vld [vmem:[#allocation2 + $0x1b0] sm:$0xff]  ;;  %v2743_v31 = vpop.xlane.xlu1 %2742 }
 0x2e5   : > { %v3062_v59 = vld [vmem:[#allocation2 + $0x188] sm:$0xff]  ;;  %v2728_v15 = vpop.xlane.xlu0 %2727  ;;  %v3131_v60 = vmul.f32 0.0052083335, %v3067_v23  ;;  %3004 = vst.msk [vmem:[#allocation2 + $0x1d0] sm:$0xff] %vm204_vm3, %v2939_v48  ;;  %v2813_v19 = vadd.f32 %v2743_v31, %v2199_v40 }
 0x2e6   : > { %v3126_v32 = vmul.f32 0.0052083335, %v3062_v59  ;;  %2999 = vst.msk [vmem:[#allocation2 + $0x1a8] sm:$0xff] %vm204_vm3, %v2934_v53  ;;  %v2808_v25 = vadd.f32 %v2728_v15, %v2194_v22  ;;  %v2880_v53 = vld [vmem:[#allocation2 + $0x1f8] sm:$0xff] }
 0x2e7   : > { %3195 = vst.msk [vmem:[%s5719_s7 + $0x1b0] sm:$0xff] %vm204_vm3, %v3131_v60  ;;  %v2941_v61 = vadd.f32 %v2877_v35, %v2813_v19 }
 0x2e8   : > { %3190 = vst.msk [vmem:[%s5719_s7 + $0x188] sm:$0xff] %vm204_vm3, %v3126_v32  ;;  %v2936_v55 = vadd.f32 %v2872_v49, %v2808_v25  ;;  %v3069_v38 = vld [vmem:[#allocation2 + $0x1c0] sm:$0xff]  ;;  %v2749_v28 = vpop.xlane.xlu1 %2748 }
 0x2e9   : > { %v3064_v11 = vld [vmem:[#allocation2 + $0x198] sm:$0xff]  ;;  %v2734_v42 = vpop.xlane.xlu0 %2733  ;;  %v3133_v43 = vmul.f32 0.0052083335, %v3069_v38  ;;  %3006 = vst.msk [vmem:[#allocation2 + $0x1e0] sm:$0xff] %vm204_vm3, %v2941_v61  ;;  %v2815_v26 = vadd.f32 %v2749_v28, %v2201_v56 }
 0x2ea   : > { %v3128_v34 = vmul.f32 0.0052083335, %v3064_v11  ;;  %3001 = vst.msk [vmem:[#allocation2 + $0x1b8] sm:$0xff] %vm204_vm3, %v2936_v55  ;;  %v2810_v3 = vadd.f32 %v2734_v42, %v2196_v52 }
 0x2eb   : > { %3197 = vst.msk [vmem:[%s5719_s7 + $0x1c0] sm:$0xff] %vm204_vm3, %v3133_v43  ;;  %v2943_v37 = vadd.f32 %v2879_v24, %v2815_v26 }
 0x2ec   : > { %3192 = vst.msk [vmem:[%s5719_s7 + $0x198] sm:$0xff] %vm204_vm3, %v3128_v34  ;;  %v2938_v50 = vadd.f32 %v2874_v46, %v2810_v3  ;;  %v3071_v17 = vld [vmem:[#allocation2 + $0x1d0] sm:$0xff] }
 0x2ed   : > { %v3066_v18 = vld [vmem:[#allocation2 + $0x1a8] sm:$0xff]  ;;  %v2740_v39 = vpop.xlane.xlu0 %2739  ;;  %v3135_v57 = vmul.f32 0.0052083335, %v3071_v17  ;;  %3008 = vst.msk [vmem:[#allocation2 + $0x1f0] sm:$0xff] %vm204_vm3, %v2943_v37 }
 0x2ee   : > { %v3130_v47 = vmul.f32 0.0052083335, %v3066_v18  ;;  %3003 = vst.msk [vmem:[#allocation2 + $0x1c8] sm:$0xff] %vm204_vm3, %v2938_v50  ;;  %v2812_v36 = vadd.f32 %v2740_v39, %v2198_v41 }
 0x2ef   : > { %3199 = vst.msk [vmem:[%s5719_s7 + $0x1d0] sm:$0xff] %vm204_vm3, %v3135_v57 }
 0x2f0   : > { %3194 = vst.msk [vmem:[%s5719_s7 + $0x1a8] sm:$0xff] %vm204_vm3, %v3130_v47  ;;  %v2940_v33 = vadd.f32 %v2876_v29, %v2812_v36  ;;  %v3073_v22 = vld [vmem:[#allocation2 + $0x1e0] sm:$0xff] }
 0x2f1   : > { %v3068_v44 = vld [vmem:[#allocation2 + $0x1b8] sm:$0xff]  ;;  %v2746_v21 = vpop.xlane.xlu0 %2745  ;;  %v3137_v5 = vmul.f32 0.0052083335, %v3073_v22 }
 0x2f2   : > { %v3132_v2 = vmul.f32 0.0052083335, %v3068_v44  ;;  %3005 = vst.msk [vmem:[#allocation2 + $0x1d8] sm:$0xff] %vm204_vm3, %v2940_v33  ;;  %v2814_v51 = vadd.f32 %v2746_v21, %v2200_v63 }
 0x2f3   : > { %3201 = vst.msk [vmem:[%s5719_s7 + $0x1e0] sm:$0xff] %vm204_vm3, %v3137_v5 }
 0x2f4   : > { %3196 = vst.msk [vmem:[%s5719_s7 + $0x1b8] sm:$0xff] %vm204_vm3, %v3132_v2  ;;  %v2942_v62 = vadd.f32 %v2878_v20, %v2814_v51  ;;  %v3075_v49 = vld [vmem:[#allocation2 + $0x1f0] sm:$0xff] }
 0x2f5   : > { %v3070_v12 = vld [vmem:[#allocation2 + $0x1c8] sm:$0xff]  ;;  %v2752_v10 = vpop.xlane.xlu0 %2751  ;;  %v3139_v0 = vmul.f32 0.0052083335, %v3075_v49 }
 0x2f6   : > { %v3134_v59 = vmul.f32 0.0052083335, %v3070_v12  ;;  %3007 = vst.msk [vmem:[#allocation2 + $0x1e8] sm:$0xff] %vm204_vm3, %v2942_v62  ;;  %v2816_v27 = vadd.f32 %v2752_v10, %v2202_v58 }
 0x2f7   : > { %3203 = vst.msk [vmem:[%s5719_s7 + $0x1f0] sm:$0xff] %vm204_vm3, %v3139_v0 }
 0x2f8   : > { %3198 = vst.msk [vmem:[%s5719_s7 + $0x1c8] sm:$0xff] %vm204_vm3, %v3134_v59  ;;  %v2944_v9 = vadd.f32 %v2880_v53, %v2816_v27 }
 0x2f9   : > { %v3072_v15 = vld [vmem:[#allocation2 + $0x1d8] sm:$0xff] }
 0x2fa   : > { %v3136_v32 = vmul.f32 0.0052083335, %v3072_v15  ;;  %3009 = vst.msk [vmem:[#allocation2 + $0x1f8] sm:$0xff] %vm204_vm3, %v2944_v9 }
 0x2fc   : > { %3200 = vst.msk [vmem:[%s5719_s7 + $0x1d8] sm:$0xff] %vm204_vm3, %v3136_v32 }
 0x2fd   : > { %v3074_v30 = vld [vmem:[#allocation2 + $0x1e8] sm:$0xff] }
 0x2fe   : > { %v3138_v25 = vmul.f32 0.0052083335, %v3074_v30 }
 0x300   : > { %3202 = vst.msk [vmem:[%s5719_s7 + $0x1e8] sm:$0xff] %vm204_vm3, %v3138_v25 }
 0x301   : > { %v3076_v8 = vld [vmem:[#allocation2 + $0x1f8] sm:$0xff] }
 0x302   : > { %v3140_v40 = vmul.f32 0.0052083335, %v3076_v8 }
 0x304   : > { %3204 = vst.msk [vmem:[%s5719_s7 + $0x1f8] sm:$0xff] %vm204_vm3, %v3140_v40 }
 0x305 PF: > { %s13_s14 = sadd.s32 1, %s3801_s14   ;;  %s6449_s12 = smov %s3797_s13 }
 0x306   : > { %p10_p5 = scmp.ge.s32.totalorder %s13_s14, 4   ;;  %s6450_s13 = smov %s6452_s15 }
 0x308   :  { %12 = sbr.rel (!%p10_p5) target bundleno = 2 (0x2), region = 72 }

</bundles_post_ra>
